<compile_context>
chip_gen: v6e
topology: v6e:2x2x1
jax: 0.10.0
libtpu: 0.0.40
codegen_flags: <defaults>
</compile_context>

<pallas_src>
import jax
import jax.numpy as jnp
from jax.experimental import pallas as pl
from jax.experimental.pallas import tpu as pltpu


# --------------------------------------------------------------------------
# Pallas kernel: fused (conv-as-matmul) + maxpool(3x3) + bias + ReLU
# --------------------------------------------------------------------------
def _conv_relu_pool_kernel(a_ref, w_ref, b_ref, o_ref):
    # a_ref: (T=9, K, TILE_R) bf16 -- patch slabs, one per 3x3 pool tap
    # w_ref: (Cout_pad, K)    bf16 -- conv weights flattened in (Cin, kh, kw) order
    # b_ref: (Cout_pad, 1)    f32
    # o_ref: (Cout_pad, TILE_R) f32
    w = w_ref[...]                                   # resident bf16 weights
    # Running max over the 9 pool taps, kept entirely in vregs (no scratch).
    acc = jnp.dot(w, a_ref[0], preferred_element_type=jnp.float32)
    for t in range(1, a_ref.shape[0]):               # static, fully unrolled
        y = jnp.dot(w, a_ref[t], preferred_element_type=jnp.float32)
        acc = jnp.maximum(acc, y)
    # relu(maxpool(conv + b)) == relu(max_t(conv_t) + b): bias hoisted out of
    # the tap reduction; single lane-dense store into o_ref.
    o_ref[...] = jnp.maximum(acc + b_ref[...], 0.0).astype(o_ref.dtype)


def conv_relu_pool_pallas(patches, w2d, b2d, tile_r):
    """patches: (T, K, R_pad) bf16; w2d: (Cout_pad, K) bf16; b2d: (Cout_pad, 1) f32."""
    T, K, R_pad = patches.shape
    Cout_pad = w2d.shape[0]
    grid = (R_pad // tile_r,)
    return pl.pallas_call(
        _conv_relu_pool_kernel,
        out_shape=jax.ShapeDtypeStruct((Cout_pad, R_pad), jnp.float32),
        grid_spec=pltpu.PrefetchScalarGridSpec(
            num_scalar_prefetch=0,
            grid=grid,
            in_specs=[
                pl.BlockSpec((T, K, tile_r), lambda r: (0, 0, r)),
                pl.BlockSpec((Cout_pad, K), lambda r: (0, 0)),
                pl.BlockSpec((Cout_pad, 1), lambda r: (0, 0)),
            ],
            out_specs=pl.BlockSpec((Cout_pad, tile_r), lambda r: (0, r)),
        ),
        compiler_params=pltpu.CompilerParams(
            dimension_semantics=("parallel",)),
    )(patches, w2d, b2d)


# --------------------------------------------------------------------------
# Glue: im2col (single fused patch op, in bf16) + pool-tap folding
# --------------------------------------------------------------------------
def _ceil_div(a, b):
    return -(-a // b)


def _round_up(x, m):
    return _ceil_div(x, m) * m


def _pool_tap_patches(x, k=5, pool=3):
    """x: (N, Cin, H, W) -> (taps=pool*pool, K=Cin*k*k, R=N*PH*PW), (N, PH, PW)."""
    N, Cin, H, W = x.shape
    OH, OW = H - k + 1, W - k + 1
    PH, PW = OH // pool, OW // pool          # MaxPool2d(3,3) floor-mode semantics
    K = Cin * k * k
    # im2col via a grouped identity conv: (N, Cin*k*k, OH, OW),
    # feature ordering (Cin major, kh, kw minor) == torch weight flatten order.
    patches = jax.lax.conv_general_dilated_patches(
        x, filter_shape=(k, k), window_strides=(1, 1), padding="VALID")
    # Fold the pool x pool / stride-pool window into a leading taps axis.
    p = patches[:, :, :PH * pool, :PW * pool]
    p = p.reshape(N, K, PH, pool, PW, pool)
    p = p.transpose(3, 5, 1, 0, 2, 4)        # (pool, pool, K, N, PH, PW)
    p = p.reshape(pool * pool, K, N * PH * PW)
    return p, (N, PH, PW)


def _choose_tile_r(R, K, taps, prefer_tiles=2):
    """Lane-dense row tile: multiple of 128, minimal padding, VMEM-capped, and
    (when free) >=2 row tiles so the 'parallel' axis can use both v7x TCs."""
    m = _ceil_div(R, 128)                    # 128-lane row groups needed
    # Double-buffered (taps, K, tile_r) bf16 input block must stay well inside
    # v5e's 16 MiB default scoped VMEM (the strictest generation).
    budget = 12 * 1024 * 1024
    cap_groups = max(1, min(2048 // 128, budget // (taps * K * 2 * 2 * 128)))
    n = _ceil_div(m, cap_groups)             # tiles forced by the VMEM cap
    if m >= prefer_tiles and m % prefer_tiles == 0:
        n = max(n, prefer_tiles)             # free split: no extra lane padding
    n = min(n, m)
    return _ceil_div(m, n) * 128


def _stage(x, w, b, k=5, pool=3):
    """One conv(k)->relu->maxpool(pool) stage. x NCHW -> NCHW."""
    Cout = w.shape[0]
    # bf16 BEFORE im2col: the ~K*9x patch expansion (dominant HBM traffic) is
    # produced, transposed and DMA'd in bf16.
    patches, (N, PH, PW) = _pool_tap_patches(x.astype(jnp.bfloat16), k=k, pool=pool)
    T, K, R = patches.shape

    tile_r = _choose_tile_r(R, K, T)
    R_pad = _round_up(R, tile_r)             # == round_up(R, 128): minimal lane pad
    if R_pad != R:
        patches = jnp.pad(patches, ((0, 0), (0, 0), (0, R_pad - R)))

    # Pad Cout to a multiple of 8 -> full-sublane output vregs, unmasked stores.
    Cout_pad = _round_up(Cout, 8)
    w2d = w.reshape(Cout, K)
    b1d = b
    if Cout_pad != Cout:
        w2d = jnp.pad(w2d, ((0, Cout_pad - Cout), (0, 0)))
        b1d = jnp.pad(b1d, (0, Cout_pad - Cout))
    w2d = w2d.astype(jnp.bfloat16)
    b2d = b1d.reshape(Cout_pad, 1).astype(jnp.float32)

    out = conv_relu_pool_pallas(patches, w2d, b2d, tile_r)   # (Cout_pad, R_pad) f32
    out = out[:Cout, :R].reshape(Cout, N, PH, PW).transpose(1, 0, 2, 3)  # -> NCHW
    return out


# --------------------------------------------------------------------------
# Parameter init (deterministic, PyTorch Conv2d default-style uniform)
# --------------------------------------------------------------------------
def _init_conv(key, cout, cin, k):
    fan_in = cin * k * k
    bound = 1.0 / jnp.sqrt(float(fan_in))
    kw, kb = jax.random.split(key)
    w = jax.random.uniform(kw, (cout, cin, k, k), jnp.float32, -bound, bound)
    b = jax.random.uniform(kb, (cout,), jnp.float32, -bound, bound)
    return w, b


def cnn_forward(x, params):
    (w1, b1), (w2, b2), (w3, b3) = params
    x = _stage(x, w1, b1)   # conv1 3->6,   relu, maxpool 3x3
    x = _stage(x, w2, b2)   # conv2 6->16,  relu, maxpool 3x3
    x = _stage(x, w3, b3)   # conv3 16->20, relu, maxpool 3x3
    N, C, H, W = x.shape
    return x.reshape(N, C * H * W)  # torch.flatten(x, 1)


if __name__ == "__main__":
    key = jax.random.PRNGKey(0)
    k_in, k1, k2, k3 = jax.random.split(key, 4)

    # Smallest spatial size for which all three conv+pool stages are valid:
    # 79 -> conv(75) -> pool(25) -> conv(21) -> pool(7) -> conv(3) -> pool(1)
    N, Cin, H, W = 2, 3, 79, 79
    x = jax.random.normal(k_in, (N, Cin, H, W), jnp.float32)

    params = (
        _init_conv(k1, 6, 3, 5),
        _init_conv(k2, 16, 6, 5),
        _init_conv(k3, 20, 16, 5),
    )

    fwd = jax.jit(cnn_forward)
    out = fwd(x, params)
    out = jax.block_until_ready(out)

    assert out.shape == (N, 20), out.shape
    assert bool(jnp.all(jnp.isfinite(out)))
    print("KERNEL_OK")
</pallas_src>

<mosaic_0001>
module attributes {stable_mosaic.version = 11 : i64} {
  func.func @_conv_relu_pool_kernel(%arg0: i32, %arg1: memref<9x75x640xbf16, #tpu.memory_space<vmem>>, %arg2: memref<8x75xbf16, #tpu.memory_space<vmem>>, %arg3: memref<8x1xf32, #tpu.memory_space<vmem>>, %arg4: memref<8x640xf32, #tpu.memory_space<vmem>>) attributes {dimension_semantics = [#tpu.dimension_semantics<parallel>], iteration_bounds = array<i64: 2>, scalar_prefetch = 0 : i64, scratch_operands = 0 : i64, tpu.core_type = #tpu.core_type<tc>, window_params = [{transform_indices = @transform_0, window_bounds = array<i64: 9, 75, 640>}, {pipeline_mode = #tpu.pipeline_mode<synchronous>, transform_indices = @transform_1, window_bounds = array<i64: 8, 75>}, {pipeline_mode = #tpu.pipeline_mode<synchronous>, transform_indices = @transform_2, window_bounds = array<i64: 8, 1>}, {transform_indices = @transform_3, window_bounds = array<i64: 8, 640>}]} {
    %c0 = arith.constant 0 : index
    %c0_0 = arith.constant 0 : index
    %0 = vector.load %arg2[%c0, %c0_0] : memref<8x75xbf16, #tpu.memory_space<vmem>>, vector<8x75xbf16>
    %c0_1 = arith.constant 0 : index
    %c0_2 = arith.constant 0 : index
    %c0_3 = arith.constant 0 : index
    %1 = vector.load %arg1[%c0_1, %c0_2, %c0_3] : memref<9x75x640xbf16, #tpu.memory_space<vmem>>, vector<1x75x640xbf16>
    %2 = vector.shape_cast %1 : vector<1x75x640xbf16> to vector<75x640xbf16>
    %cst = arith.constant dense<0.000000e+00> : vector<8x640xf32>
    %3 = tpu.matmul %0, %2, %cst {dimension_numbers = #tpu.dot_dimension_numbers<[1], [0], [0], [1], [0, 0, 1, 1], [], []>} : vector<8x75xbf16>, vector<75x640xbf16>, vector<8x640xf32> -> vector<8x640xf32>
    %c1 = arith.constant 1 : index
    %c0_4 = arith.constant 0 : index
    %c0_5 = arith.constant 0 : index
    %4 = vector.load %arg1[%c1, %c0_4, %c0_5] : memref<9x75x640xbf16, #tpu.memory_space<vmem>>, vector<1x75x640xbf16>
    %5 = vector.shape_cast %4 : vector<1x75x640xbf16> to vector<75x640xbf16>
    %cst_6 = arith.constant dense<0.000000e+00> : vector<8x640xf32>
    %6 = tpu.matmul %0, %5, %cst_6 {dimension_numbers = #tpu.dot_dimension_numbers<[1], [0], [0], [1], [0, 0, 1, 1], [], []>} : vector<8x75xbf16>, vector<75x640xbf16>, vector<8x640xf32> -> vector<8x640xf32>
    %7 = arith.maximumf %3, %6 : vector<8x640xf32>
    %c2 = arith.constant 2 : index
    %c0_7 = arith.constant 0 : index
    %c0_8 = arith.constant 0 : index
    %8 = vector.load %arg1[%c2, %c0_7, %c0_8] : memref<9x75x640xbf16, #tpu.memory_space<vmem>>, vector<1x75x640xbf16>
    %9 = vector.shape_cast %8 : vector<1x75x640xbf16> to vector<75x640xbf16>
    %cst_9 = arith.constant dense<0.000000e+00> : vector<8x640xf32>
    %10 = tpu.matmul %0, %9, %cst_9 {dimension_numbers = #tpu.dot_dimension_numbers<[1], [0], [0], [1], [0, 0, 1, 1], [], []>} : vector<8x75xbf16>, vector<75x640xbf16>, vector<8x640xf32> -> vector<8x640xf32>
    %11 = arith.maximumf %7, %10 : vector<8x640xf32>
    %c3 = arith.constant 3 : index
    %c0_10 = arith.constant 0 : index
    %c0_11 = arith.constant 0 : index
    %12 = vector.load %arg1[%c3, %c0_10, %c0_11] : memref<9x75x640xbf16, #tpu.memory_space<vmem>>, vector<1x75x640xbf16>
    %13 = vector.shape_cast %12 : vector<1x75x640xbf16> to vector<75x640xbf16>
    %cst_12 = arith.constant dense<0.000000e+00> : vector<8x640xf32>
    %14 = tpu.matmul %0, %13, %cst_12 {dimension_numbers = #tpu.dot_dimension_numbers<[1], [0], [0], [1], [0, 0, 1, 1], [], []>} : vector<8x75xbf16>, vector<75x640xbf16>, vector<8x640xf32> -> vector<8x640xf32>
    %15 = arith.maximumf %11, %14 : vector<8x640xf32>
    %c4 = arith.constant 4 : index
    %c0_13 = arith.constant 0 : index
    %c0_14 = arith.constant 0 : index
    %16 = vector.load %arg1[%c4, %c0_13, %c0_14] : memref<9x75x640xbf16, #tpu.memory_space<vmem>>, vector<1x75x640xbf16>
    %17 = vector.shape_cast %16 : vector<1x75x640xbf16> to vector<75x640xbf16>
    %cst_15 = arith.constant dense<0.000000e+00> : vector<8x640xf32>
    %18 = tpu.matmul %0, %17, %cst_15 {dimension_numbers = #tpu.dot_dimension_numbers<[1], [0], [0], [1], [0, 0, 1, 1], [], []>} : vector<8x75xbf16>, vector<75x640xbf16>, vector<8x640xf32> -> vector<8x640xf32>
    %19 = arith.maximumf %15, %18 : vector<8x640xf32>
    %c5 = arith.constant 5 : index
    %c0_16 = arith.constant 0 : index
    %c0_17 = arith.constant 0 : index
    %20 = vector.load %arg1[%c5, %c0_16, %c0_17] : memref<9x75x640xbf16, #tpu.memory_space<vmem>>, vector<1x75x640xbf16>
    %21 = vector.shape_cast %20 : vector<1x75x640xbf16> to vector<75x640xbf16>
    %cst_18 = arith.constant dense<0.000000e+00> : vector<8x640xf32>
    %22 = tpu.matmul %0, %21, %cst_18 {dimension_numbers = #tpu.dot_dimension_numbers<[1], [0], [0], [1], [0, 0, 1, 1], [], []>} : vector<8x75xbf16>, vector<75x640xbf16>, vector<8x640xf32> -> vector<8x640xf32>
    %23 = arith.maximumf %19, %22 : vector<8x640xf32>
    %c6 = arith.constant 6 : index
    %c0_19 = arith.constant 0 : index
    %c0_20 = arith.constant 0 : index
    %24 = vector.load %arg1[%c6, %c0_19, %c0_20] : memref<9x75x640xbf16, #tpu.memory_space<vmem>>, vector<1x75x640xbf16>
    %25 = vector.shape_cast %24 : vector<1x75x640xbf16> to vector<75x640xbf16>
    %cst_21 = arith.constant dense<0.000000e+00> : vector<8x640xf32>
    %26 = tpu.matmul %0, %25, %cst_21 {dimension_numbers = #tpu.dot_dimension_numbers<[1], [0], [0], [1], [0, 0, 1, 1], [], []>} : vector<8x75xbf16>, vector<75x640xbf16>, vector<8x640xf32> -> vector<8x640xf32>
    %27 = arith.maximumf %23, %26 : vector<8x640xf32>
    %c7 = arith.constant 7 : index
    %c0_22 = arith.constant 0 : index
    %c0_23 = arith.constant 0 : index
    %28 = vector.load %arg1[%c7, %c0_22, %c0_23] : memref<9x75x640xbf16, #tpu.memory_space<vmem>>, vector<1x75x640xbf16>
    %29 = vector.shape_cast %28 : vector<1x75x640xbf16> to vector<75x640xbf16>
    %cst_24 = arith.constant dense<0.000000e+00> : vector<8x640xf32>
    %30 = tpu.matmul %0, %29, %cst_24 {dimension_numbers = #tpu.dot_dimension_numbers<[1], [0], [0], [1], [0, 0, 1, 1], [], []>} : vector<8x75xbf16>, vector<75x640xbf16>, vector<8x640xf32> -> vector<8x640xf32>
    %31 = arith.maximumf %27, %30 : vector<8x640xf32>
    %c8 = arith.constant 8 : index
    %c0_25 = arith.constant 0 : index
    %c0_26 = arith.constant 0 : index
    %32 = vector.load %arg1[%c8, %c0_25, %c0_26] : memref<9x75x640xbf16, #tpu.memory_space<vmem>>, vector<1x75x640xbf16>
    %33 = vector.shape_cast %32 : vector<1x75x640xbf16> to vector<75x640xbf16>
    %cst_27 = arith.constant dense<0.000000e+00> : vector<8x640xf32>
    %34 = tpu.matmul %0, %33, %cst_27 {dimension_numbers = #tpu.dot_dimension_numbers<[1], [0], [0], [1], [0, 0, 1, 1], [], []>} : vector<8x75xbf16>, vector<75x640xbf16>, vector<8x640xf32> -> vector<8x640xf32>
    %35 = arith.maximumf %31, %34 : vector<8x640xf32>
    %c0_28 = arith.constant 0 : index
    %c0_29 = arith.constant 0 : index
    %36 = vector.load %arg3[%c0_28, %c0_29] : memref<8x1xf32, #tpu.memory_space<vmem>>, vector<8x1xf32>
    %37 = vector.broadcast %36 : vector<8x1xf32> to vector<8x640xf32>
    %38 = arith.addf %35, %37 : vector<8x640xf32>
    %cst_30 = arith.constant 0.000000e+00 : f32
    %39 = vector.broadcast %cst_30 : f32 to vector<8x640xf32>
    %40 = arith.maximumf %38, %39 : vector<8x640xf32>
    %c0_31 = arith.constant 0 : index
    %c0_32 = arith.constant 0 : index
    %41 = vector.load %arg4[%c0_31, %c0_32] : memref<8x640xf32, #tpu.memory_space<vmem>>, vector<8x640xf32>
    tpu.vector_store %arg4[%c0_31, %c0_32], %40 {strides = array<i32>} : memref<8x640xf32, #tpu.memory_space<vmem>>, vector<8x640xf32>,
    return
  }
  func.func @transform_0(%arg0: i32) -> (i32, i32, i32) {
    %c0_i32 = arith.constant 0 : i32
    %c0_i32_0 = arith.constant 0 : i32
    %c0_i32_1 = arith.constant 0 : i32
    return %c0_i32, %c0_i32_0, %arg0 : i32, i32, i32
  }
  func.func @transform_1(%arg0: i32) -> (i32, i32) {
    %c0_i32 = arith.constant 0 : i32
    %c0_i32_0 = arith.constant 0 : i32
    %c0_i32_1 = arith.constant 0 : i32
    return %c0_i32, %c0_i32_0 : i32, i32
  }
  func.func @transform_2(%arg0: i32) -> (i32, i32) {
    %c0_i32 = arith.constant 0 : i32
    %c0_i32_0 = arith.constant 0 : i32
    %c0_i32_1 = arith.constant 0 : i32
    return %c0_i32, %c0_i32_0 : i32, i32
  }
  func.func @transform_3(%arg0: i32) -> (i32, i32) {
    %c0_i32 = arith.constant 0 : i32
    %c0_i32_0 = arith.constant 0 : i32
    return %c0_i32, %arg0 : i32, i32
  }
}

module attributes {stable_mosaic.version = 11 : i64} {
  func.func @_conv_relu_pool_kernel(%arg0: i32, %arg1: memref<9x150x128xbf16, #tpu.memory_space<vmem>>, %arg2: memref<16x150xbf16, #tpu.memory_space<vmem>>, %arg3: memref<16x1xf32, #tpu.memory_space<vmem>>, %arg4: memref<16x128xf32, #tpu.memory_space<vmem>>) attributes {dimension_semantics = [#tpu.dimension_semantics<parallel>], iteration_bounds = array<i64: 1>, scalar_prefetch = 0 : i64, scratch_operands = 0 : i64, tpu.core_type = #tpu.core_type<tc>, window_params = [{transform_indices = @transform_0, window_bounds = array<i64: 9, 150, 128>}, {pipeline_mode = #tpu.pipeline_mode<synchronous>, transform_indices = @transform_1, window_bounds = array<i64: 16, 150>}, {pipeline_mode = #tpu.pipeline_mode<synchronous>, transform_indices = @transform_2, window_bounds = array<i64: 16, 1>}, {transform_indices = @transform_3, window_bounds = array<i64: 16, 128>}]} {
    %c0 = arith.constant 0 : index
    %c0_0 = arith.constant 0 : index
    %0 = vector.load %arg2[%c0, %c0_0] : memref<16x150xbf16, #tpu.memory_space<vmem>>, vector<16x150xbf16>
    %c0_1 = arith.constant 0 : index
    %c0_2 = arith.constant 0 : index
    %c0_3 = arith.constant 0 : index
    %1 = vector.load %arg1[%c0_1, %c0_2, %c0_3] : memref<9x150x128xbf16, #tpu.memory_space<vmem>>, vector<1x150x128xbf16>
    %2 = vector.shape_cast %1 : vector<1x150x128xbf16> to vector<150x128xbf16>
    %cst = arith.constant dense<0.000000e+00> : vector<16x128xf32>
    %3 = tpu.matmul %0, %2, %cst {dimension_numbers = #tpu.dot_dimension_numbers<[1], [0], [0], [1], [0, 0, 1, 1], [], []>} : vector<16x150xbf16>, vector<150x128xbf16>, vector<16x128xf32> -> vector<16x128xf32>
    %c1 = arith.constant 1 : index
    %c0_4 = arith.constant 0 : index
    %c0_5 = arith.constant 0 : index
    %4 = vector.load %arg1[%c1, %c0_4, %c0_5] : memref<9x150x128xbf16, #tpu.memory_space<vmem>>, vector<1x150x128xbf16>
    %5 = vector.shape_cast %4 : vector<1x150x128xbf16> to vector<150x128xbf16>
    %cst_6 = arith.constant dense<0.000000e+00> : vector<16x128xf32>
    %6 = tpu.matmul %0, %5, %cst_6 {dimension_numbers = #tpu.dot_dimension_numbers<[1], [0], [0], [1], [0, 0, 1, 1], [], []>} : vector<16x150xbf16>, vector<150x128xbf16>, vector<16x128xf32> -> vector<16x128xf32>
    %7 = arith.maximumf %3, %6 : vector<16x128xf32>
    %c2 = arith.constant 2 : index
    %c0_7 = arith.constant 0 : index
    %c0_8 = arith.constant 0 : index
    %8 = vector.load %arg1[%c2, %c0_7, %c0_8] : memref<9x150x128xbf16, #tpu.memory_space<vmem>>, vector<1x150x128xbf16>
    %9 = vector.shape_cast %8 : vector<1x150x128xbf16> to vector<150x128xbf16>
    %cst_9 = arith.constant dense<0.000000e+00> : vector<16x128xf32>
    %10 = tpu.matmul %0, %9, %cst_9 {dimension_numbers = #tpu.dot_dimension_numbers<[1], [0], [0], [1], [0, 0, 1, 1], [], []>} : vector<16x150xbf16>, vector<150x128xbf16>, vector<16x128xf32> -> vector<16x128xf32>
    %11 = arith.maximumf %7, %10 : vector<16x128xf32>
    %c3 = arith.constant 3 : index
    %c0_10 = arith.constant 0 : index
    %c0_11 = arith.constant 0 : index
    %12 = vector.load %arg1[%c3, %c0_10, %c0_11] : memref<9x150x128xbf16, #tpu.memory_space<vmem>>, vector<1x150x128xbf16>
    %13 = vector.shape_cast %12 : vector<1x150x128xbf16> to vector<150x128xbf16>
    %cst_12 = arith.constant dense<0.000000e+00> : vector<16x128xf32>
    %14 = tpu.matmul %0, %13, %cst_12 {dimension_numbers = #tpu.dot_dimension_numbers<[1], [0], [0], [1], [0, 0, 1, 1], [], []>} : vector<16x150xbf16>, vector<150x128xbf16>, vector<16x128xf32> -> vector<16x128xf32>
    %15 = arith.maximumf %11, %14 : vector<16x128xf32>
    %c4 = arith.constant 4 : index
    %c0_13 = arith.constant 0 : index
    %c0_14 = arith.constant 0 : index
    %16 = vector.load %arg1[%c4, %c0_13, %c0_14] : memref<9x150x128xbf16, #tpu.memory_space<vmem>>, vector<1x150x128xbf16>
    %17 = vector.shape_cast %16 : vector<1x150x128xbf16> to vector<150x128xbf16>
    %cst_15 = arith.constant dense<0.000000e+00> : vector<16x128xf32>
    %18 = tpu.matmul %0, %17, %cst_15 {dimension_numbers = #tpu.dot_dimension_numbers<[1], [0], [0], [1], [0, 0, 1, 1], [], []>} : vector<16x150xbf16>, vector<150x128xbf16>, vector<16x128xf32> -> vector<16x128xf32>
    %19 = arith.maximumf %15, %18 : vector<16x128xf32>
    %c5 = arith.constant 5 : index
    %c0_16 = arith.constant 0 : index
    %c0_17 = arith.constant 0 : index
    %20 = vector.load %arg1[%c5, %c0_16, %c0_17] : memref<9x150x128xbf16, #tpu.memory_space<vmem>>, vector<1x150x128xbf16>
    %21 = vector.shape_cast %20 : vector<1x150x128xbf16> to vector<150x128xbf16>
    %cst_18 = arith.constant dense<0.000000e+00> : vector<16x128xf32>
    %22 = tpu.matmul %0, %21, %cst_18 {dimension_numbers = #tpu.dot_dimension_numbers<[1], [0], [0], [1], [0, 0, 1, 1], [], []>} : vector<16x150xbf16>, vector<150x128xbf16>, vector<16x128xf32> -> vector<16x128xf32>
    %23 = arith.maximumf %19, %22 : vector<16x128xf32>
    %c6 = arith.constant 6 : index
    %c0_19 = arith.constant 0 : index
    %c0_20 = arith.constant 0 : index
    %24 = vector.load %arg1[%c6, %c0_19, %c0_20] : memref<9x150x128xbf16, #tpu.memory_space<vmem>>, vector<1x150x128xbf16>
    %25 = vector.shape_cast %24 : vector<1x150x128xbf16> to vector<150x128xbf16>
    %cst_21 = arith.constant dense<0.000000e+00> : vector<16x128xf32>
    %26 = tpu.matmul %0, %25, %cst_21 {dimension_numbers = #tpu.dot_dimension_numbers<[1], [0], [0], [1], [0, 0, 1, 1], [], []>} : vector<16x150xbf16>, vector<150x128xbf16>, vector<16x128xf32> -> vector<16x128xf32>
    %27 = arith.maximumf %23, %26 : vector<16x128xf32>
    %c7 = arith.constant 7 : index
    %c0_22 = arith.constant 0 : index
    %c0_23 = arith.constant 0 : index
    %28 = vector.load %arg1[%c7, %c0_22, %c0_23] : memref<9x150x128xbf16, #tpu.memory_space<vmem>>, vector<1x150x128xbf16>
    %29 = vector.shape_cast %28 : vector<1x150x128xbf16> to vector<150x128xbf16>
    %cst_24 = arith.constant dense<0.000000e+00> : vector<16x128xf32>
    %30 = tpu.matmul %0, %29, %cst_24 {dimension_numbers = #tpu.dot_dimension_numbers<[1], [0], [0], [1], [0, 0, 1, 1], [], []>} : vector<16x150xbf16>, vector<150x128xbf16>, vector<16x128xf32> -> vector<16x128xf32>
    %31 = arith.maximumf %27, %30 : vector<16x128xf32>
    %c8 = arith.constant 8 : index
    %c0_25 = arith.constant 0 : index
    %c0_26 = arith.constant 0 : index
    %32 = vector.load %arg1[%c8, %c0_25, %c0_26] : memref<9x150x128xbf16, #tpu.memory_space<vmem>>, vector<1x150x128xbf16>
    %33 = vector.shape_cast %32 : vector<1x150x128xbf16> to vector<150x128xbf16>
    %cst_27 = arith.constant dense<0.000000e+00> : vector<16x128xf32>
    %34 = tpu.matmul %0, %33, %cst_27 {dimension_numbers = #tpu.dot_dimension_numbers<[1], [0], [0], [1], [0, 0, 1, 1], [], []>} : vector<16x150xbf16>, vector<150x128xbf16>, vector<16x128xf32> -> vector<16x128xf32>
    %35 = arith.maximumf %31, %34 : vector<16x128xf32>
    %c0_28 = arith.constant 0 : index
    %c0_29 = arith.constant 0 : index
    %36 = vector.load %arg3[%c0_28, %c0_29] : memref<16x1xf32, #tpu.memory_space<vmem>>, vector<16x1xf32>
    %37 = vector.broadcast %36 : vector<16x1xf32> to vector<16x128xf32>
    %38 = arith.addf %35, %37 : vector<16x128xf32>
    %cst_30 = arith.constant 0.000000e+00 : f32
    %39 = vector.broadcast %cst_30 : f32 to vector<16x128xf32>
    %40 = arith.maximumf %38, %39 : vector<16x128xf32>
    %c0_31 = arith.constant 0 : index
    %c0_32 = arith.constant 0 : index
    %41 = vector.load %arg4[%c0_31, %c0_32] : memref<16x128xf32, #tpu.memory_space<vmem>>, vector<16x128xf32>
    tpu.vector_store %arg4[%c0_31, %c0_32], %40 {strides = array<i32>} : memref<16x128xf32, #tpu.memory_space<vmem>>, vector<16x128xf32>,
    return
  }
  func.func @transform_0(%arg0: i32) -> (i32, i32, i32) {
    %c0_i32 = arith.constant 0 : i32
    %c0_i32_0 = arith.constant 0 : i32
    %c0_i32_1 = arith.constant 0 : i32
    return %c0_i32, %c0_i32_0, %arg0 : i32, i32, i32
  }
  func.func @transform_1(%arg0: i32) -> (i32, i32) {
    %c0_i32 = arith.constant 0 : i32
    %c0_i32_0 = arith.constant 0 : i32
    %c0_i32_1 = arith.constant 0 : i32
    return %c0_i32, %c0_i32_0 : i32, i32
  }
  func.func @transform_2(%arg0: i32) -> (i32, i32) {
    %c0_i32 = arith.constant 0 : i32
    %c0_i32_0 = arith.constant 0 : i32
    %c0_i32_1 = arith.constant 0 : i32
    return %c0_i32, %c0_i32_0 : i32, i32
  }
  func.func @transform_3(%arg0: i32) -> (i32, i32) {
    %c0_i32 = arith.constant 0 : i32
    %c0_i32_0 = arith.constant 0 : i32
    return %c0_i32, %arg0 : i32, i32
  }
}

module attributes {stable_mosaic.version = 11 : i64} {
  func.func @_conv_relu_pool_kernel(%arg0: i32, %arg1: memref<9x400x128xbf16, #tpu.memory_space<vmem>>, %arg2: memref<24x400xbf16, #tpu.memory_space<vmem>>, %arg3: memref<24x1xf32, #tpu.memory_space<vmem>>, %arg4: memref<24x128xf32, #tpu.memory_space<vmem>>) attributes {dimension_semantics = [#tpu.dimension_semantics<parallel>], iteration_bounds = array<i64: 1>, scalar_prefetch = 0 : i64, scratch_operands = 0 : i64, tpu.core_type = #tpu.core_type<tc>, window_params = [{transform_indices = @transform_0, window_bounds = array<i64: 9, 400, 128>}, {pipeline_mode = #tpu.pipeline_mode<synchronous>, transform_indices = @transform_1, window_bounds = array<i64: 24, 400>}, {pipeline_mode = #tpu.pipeline_mode<synchronous>, transform_indices = @transform_2, window_bounds = array<i64: 24, 1>}, {transform_indices = @transform_3, window_bounds = array<i64: 24, 128>}]} {
    %c0 = arith.constant 0 : index
    %c0_0 = arith.constant 0 : index
    %0 = vector.load %arg2[%c0, %c0_0] : memref<24x400xbf16, #tpu.memory_space<vmem>>, vector<24x400xbf16>
    %c0_1 = arith.constant 0 : index
    %c0_2 = arith.constant 0 : index
    %c0_3 = arith.constant 0 : index
    %1 = vector.load %arg1[%c0_1, %c0_2, %c0_3] : memref<9x400x128xbf16, #tpu.memory_space<vmem>>, vector<1x400x128xbf16>
    %2 = vector.shape_cast %1 : vector<1x400x128xbf16> to vector<400x128xbf16>
    %cst = arith.constant dense<0.000000e+00> : vector<24x128xf32>
    %3 = tpu.matmul %0, %2, %cst {dimension_numbers = #tpu.dot_dimension_numbers<[1], [0], [0], [1], [0, 0, 1, 1], [], []>} : vector<24x400xbf16>, vector<400x128xbf16>, vector<24x128xf32> -> vector<24x128xf32>
    %c1 = arith.constant 1 : index
    %c0_4 = arith.constant 0 : index
    %c0_5 = arith.constant 0 : index
    %4 = vector.load %arg1[%c1, %c0_4, %c0_5] : memref<9x400x128xbf16, #tpu.memory_space<vmem>>, vector<1x400x128xbf16>
    %5 = vector.shape_cast %4 : vector<1x400x128xbf16> to vector<400x128xbf16>
    %cst_6 = arith.constant dense<0.000000e+00> : vector<24x128xf32>
    %6 = tpu.matmul %0, %5, %cst_6 {dimension_numbers = #tpu.dot_dimension_numbers<[1], [0], [0], [1], [0, 0, 1, 1], [], []>} : vector<24x400xbf16>, vector<400x128xbf16>, vector<24x128xf32> -> vector<24x128xf32>
    %7 = arith.maximumf %3, %6 : vector<24x128xf32>
    %c2 = arith.constant 2 : index
    %c0_7 = arith.constant 0 : index
    %c0_8 = arith.constant 0 : index
    %8 = vector.load %arg1[%c2, %c0_7, %c0_8] : memref<9x400x128xbf16, #tpu.memory_space<vmem>>, vector<1x400x128xbf16>
    %9 = vector.shape_cast %8 : vector<1x400x128xbf16> to vector<400x128xbf16>
    %cst_9 = arith.constant dense<0.000000e+00> : vector<24x128xf32>
    %10 = tpu.matmul %0, %9, %cst_9 {dimension_numbers = #tpu.dot_dimension_numbers<[1], [0], [0], [1], [0, 0, 1, 1], [], []>} : vector<24x400xbf16>, vector<400x128xbf16>, vector<24x128xf32> -> vector<24x128xf32>
    %11 = arith.maximumf %7, %10 : vector<24x128xf32>
    %c3 = arith.constant 3 : index
    %c0_10 = arith.constant 0 : index
    %c0_11 = arith.constant 0 : index
    %12 = vector.load %arg1[%c3, %c0_10, %c0_11] : memref<9x400x128xbf16, #tpu.memory_space<vmem>>, vector<1x400x128xbf16>
    %13 = vector.shape_cast %12 : vector<1x400x128xbf16> to vector<400x128xbf16>
    %cst_12 = arith.constant dense<0.000000e+00> : vector<24x128xf32>
    %14 = tpu.matmul %0, %13, %cst_12 {dimension_numbers = #tpu.dot_dimension_numbers<[1], [0], [0], [1], [0, 0, 1, 1], [], []>} : vector<24x400xbf16>, vector<400x128xbf16>, vector<24x128xf32> -> vector<24x128xf32>
    %15 = arith.maximumf %11, %14 : vector<24x128xf32>
    %c4 = arith.constant 4 : index
    %c0_13 = arith.constant 0 : index
    %c0_14 = arith.constant 0 : index
    %16 = vector.load %arg1[%c4, %c0_13, %c0_14] : memref<9x400x128xbf16, #tpu.memory_space<vmem>>, vector<1x400x128xbf16>
    %17 = vector.shape_cast %16 : vector<1x400x128xbf16> to vector<400x128xbf16>
    %cst_15 = arith.constant dense<0.000000e+00> : vector<24x128xf32>
    %18 = tpu.matmul %0, %17, %cst_15 {dimension_numbers = #tpu.dot_dimension_numbers<[1], [0], [0], [1], [0, 0, 1, 1], [], []>} : vector<24x400xbf16>, vector<400x128xbf16>, vector<24x128xf32> -> vector<24x128xf32>
    %19 = arith.maximumf %15, %18 : vector<24x128xf32>
    %c5 = arith.constant 5 : index
    %c0_16 = arith.constant 0 : index
    %c0_17 = arith.constant 0 : index
    %20 = vector.load %arg1[%c5, %c0_16, %c0_17] : memref<9x400x128xbf16, #tpu.memory_space<vmem>>, vector<1x400x128xbf16>
    %21 = vector.shape_cast %20 : vector<1x400x128xbf16> to vector<400x128xbf16>
    %cst_18 = arith.constant dense<0.000000e+00> : vector<24x128xf32>
    %22 = tpu.matmul %0, %21, %cst_18 {dimension_numbers = #tpu.dot_dimension_numbers<[1], [0], [0], [1], [0, 0, 1, 1], [], []>} : vector<24x400xbf16>, vector<400x128xbf16>, vector<24x128xf32> -> vector<24x128xf32>
    %23 = arith.maximumf %19, %22 : vector<24x128xf32>
    %c6 = arith.constant 6 : index
    %c0_19 = arith.constant 0 : index
    %c0_20 = arith.constant 0 : index
    %24 = vector.load %arg1[%c6, %c0_19, %c0_20] : memref<9x400x128xbf16, #tpu.memory_space<vmem>>, vector<1x400x128xbf16>
    %25 = vector.shape_cast %24 : vector<1x400x128xbf16> to vector<400x128xbf16>
    %cst_21 = arith.constant dense<0.000000e+00> : vector<24x128xf32>
    %26 = tpu.matmul %0, %25, %cst_21 {dimension_numbers = #tpu.dot_dimension_numbers<[1], [0], [0], [1], [0, 0, 1, 1], [], []>} : vector<24x400xbf16>, vector<400x128xbf16>, vector<24x128xf32> -> vector<24x128xf32>
    %27 = arith.maximumf %23, %26 : vector<24x128xf32>
    %c7 = arith.constant 7 : index
    %c0_22 = arith.constant 0 : index
    %c0_23 = arith.constant 0 : index
    %28 = vector.load %arg1[%c7, %c0_22, %c0_23] : memref<9x400x128xbf16, #tpu.memory_space<vmem>>, vector<1x400x128xbf16>
    %29 = vector.shape_cast %28 : vector<1x400x128xbf16> to vector<400x128xbf16>
    %cst_24 = arith.constant dense<0.000000e+00> : vector<24x128xf32>
    %30 = tpu.matmul %0, %29, %cst_24 {dimension_numbers = #tpu.dot_dimension_numbers<[1], [0], [0], [1], [0, 0, 1, 1], [], []>} : vector<24x400xbf16>, vector<400x128xbf16>, vector<24x128xf32> -> vector<24x128xf32>
    %31 = arith.maximumf %27, %30 : vector<24x128xf32>
    %c8 = arith.constant 8 : index
    %c0_25 = arith.constant 0 : index
    %c0_26 = arith.constant 0 : index
    %32 = vector.load %arg1[%c8, %c0_25, %c0_26] : memref<9x400x128xbf16, #tpu.memory_space<vmem>>, vector<1x400x128xbf16>
    %33 = vector.shape_cast %32 : vector<1x400x128xbf16> to vector<400x128xbf16>
    %cst_27 = arith.constant dense<0.000000e+00> : vector<24x128xf32>
    %34 = tpu.matmul %0, %33, %cst_27 {dimension_numbers = #tpu.dot_dimension_numbers<[1], [0], [0], [1], [0, 0, 1, 1], [], []>} : vector<24x400xbf16>, vector<400x128xbf16>, vector<24x128xf32> -> vector<24x128xf32>
    %35 = arith.maximumf %31, %34 : vector<24x128xf32>
    %c0_28 = arith.constant 0 : index
    %c0_29 = arith.constant 0 : index
    %36 = vector.load %arg3[%c0_28, %c0_29] : memref<24x1xf32, #tpu.memory_space<vmem>>, vector<24x1xf32>
    %37 = vector.broadcast %36 : vector<24x1xf32> to vector<24x128xf32>
    %38 = arith.addf %35, %37 : vector<24x128xf32>
    %cst_30 = arith.constant 0.000000e+00 : f32
    %39 = vector.broadcast %cst_30 : f32 to vector<24x128xf32>
    %40 = arith.maximumf %38, %39 : vector<24x128xf32>
    %c0_31 = arith.constant 0 : index
    %c0_32 = arith.constant 0 : index
    %41 = vector.load %arg4[%c0_31, %c0_32] : memref<24x128xf32, #tpu.memory_space<vmem>>, vector<24x128xf32>
    tpu.vector_store %arg4[%c0_31, %c0_32], %40 {strides = array<i32>} : memref<24x128xf32, #tpu.memory_space<vmem>>, vector<24x128xf32>,
    return
  }
  func.func @transform_0(%arg0: i32) -> (i32, i32, i32) {
    %c0_i32 = arith.constant 0 : i32
    %c0_i32_0 = arith.constant 0 : i32
    %c0_i32_1 = arith.constant 0 : i32
    return %c0_i32, %c0_i32_0, %arg0 : i32, i32, i32
  }
  func.func @transform_1(%arg0: i32) -> (i32, i32) {
    %c0_i32 = arith.constant 0 : i32
    %c0_i32_0 = arith.constant 0 : i32
    %c0_i32_1 = arith.constant 0 : i32
    return %c0_i32, %c0_i32_0 : i32, i32
  }
  func.func @transform_2(%arg0: i32) -> (i32, i32) {
    %c0_i32 = arith.constant 0 : i32
    %c0_i32_0 = arith.constant 0 : i32
    %c0_i32_1 = arith.constant 0 : i32
    return %c0_i32, %c0_i32_0 : i32, i32
  }
  func.func @transform_3(%arg0: i32) -> (i32, i32) {
    %c0_i32 = arith.constant 0 : i32
    %c0_i32_0 = arith.constant 0 : i32
    return %c0_i32, %arg0 : i32, i32
  }
}

</mosaic_0001>

<bundles_post_ra>
// kernel: cnn_forward.3
= control target key start
LH: loop header
LB: loop body
LE: loop exit
PB: predicated region body
PF: predicated region fallthrough
CT: control target
= control target key end

     0   :  { %s4771_s12 = smov 0   ;;  %s4773_s13 = smov 0   ;;  %s5826_s0 = inlined_call_operand.vmem [shape: bf16[9,75,1280], index: 0, kind: input, shape index: {}]   ;;  %s5827_s1 = inlined_call_operand.vmem [shape: bf16[8,75], index: 1, kind: input, shape index: {}]   ;;  %s5828_s2 = inlined_call_operand.vmem [shape: f32[8,1], index: 2, kind: input, shape index: {}]   ;;  %s5829_s3 = inlined_call_operand.vmem [shape: f32[8,1280], index: 3, kind: output, shape index: {}]  }
   0x1   :  { %s4775_s14 = smov 0  }
   0x2 LB: > { %s3514_s15 = sadd.s32 4294967295, %s4745_s14   ;;  %s4788_s16 = sadd.s32 1, %s4745_s14   ;;  %s4745_s14 = sphi %s4775_s14, %s5832_s14   ;;  %s4741_s13 = sphi %s4773_s13, %s5831_s13   ;;  %s4737_s12 = sphi %s4771_s12, %s5830_s12  }
   0x3   : > { %s17_s17 = ssub.s32 %s4745_s14, %s4788_s16  ;;  %s20_s18 = sadd.s32 1, %s4741_s13 }
   0x4   : > { %p18_p0 = scmp.eq.s32.totalorder %s17_s17, 0  ;;  %p27_p1 = scmp.ne.s32.totalorder %s4741_s13, %s4737_s12 }
   0x5   : > { %p28_p2 = scmp.eq.s32.totalorder %s4745_s14, 0  ;;  %p3517_p4 = scmp.ge.s32.totalorder %s4745_s14, 2 }
   0x6   : > { %s4797_s19 = scalar_select %p18_p0, %s4741_s13, %s20_s18  }
   0x7   : > { %p29_p3 = por %p28_p2, %p27_p1  ;;  %127 = sbr.rel (%p3517_p4) target bundleno = 167 (0xa7), region = 24 }
   0xc   : > { %130 = sbr.rel (!%p29_p3) target bundleno = 167 (0xa7), region = 28  ;;  %s132_s20 = sand.u32 (%p29_p3), 1, %s4741_s13  }
   0xd   : > { %s4195_s21 = smul.u32 (%p29_p3), 20, %s4745_s14 }
   0xe   : > { %s4376_s22 = smul.u32 (%p29_p3), 1800, %s132_s20 }
   0xf   : > { %s4805_s25 = scalar_lea.vmem (%p29_p3), %s5826_s0, %s4195_s21 }
  0x10   : > { %v152_v0 = vld [vmem:[%s4805_s25] sm:$0xff] (%p29_p3)  ;;  %v154_v1 = vld [vmem:[%s4805_s25 + $0x8] sm:$0xff] (%p29_p3)  ;;  %s4810_s26 = scalar_lea.vmem (%p29_p3), [#allocation2], %s4376_s22  ;;  %v158_v3 = vld [vmem:[%s4805_s25 + $0x30] sm:$0xff] (%p29_p3) }
  0x11   : > { %v156_v2 = vld [vmem:[%s4805_s25 + $0x28] sm:$0xff]  ;;  %153 = vst [vmem:[%s4810_s26] sm:$0xff] %v152_v0  ;;  %155 = vst [vmem:[%s4810_s26 + $0x8] sm:$0xff] %v154_v1  ;;  %v160_v4 = vld [vmem:[%s4805_s25 + $0x50] sm:$0xff] }
  0x12   : > { %157 = vst [vmem:[%s4810_s26 + $0x14] sm:$0xff] %v156_v2  ;;  %v162_v5 = vld [vmem:[%s4805_s25 + $0x58] sm:$0xff]  ;;  %159 = vst [vmem:[%s4810_s26 + $0x1c] sm:$0xff] %v158_v3  ;;  %v166_v7 = vld [vmem:[%s4805_s25 + $0x80] sm:$0xff] }
  0x13   : > { %161 = vst [vmem:[%s4810_s26 + $0x28] sm:$0xff] %v160_v4  ;;  %163 = vst [vmem:[%s4810_s26 + $0x30] sm:$0xff] %v162_v5  ;;  %v164_v6 = vld [vmem:[%s4805_s25 + $0x78] sm:$0xff]  ;;  %v168_v8 = vld [vmem:[%s4805_s25 + $0xa0] sm:$0xff] }
  0x14   : > { %165 = vst [vmem:[%s4810_s26 + $0x3c] sm:$0xff] %v164_v6  ;;  %167 = vst [vmem:[%s4810_s26 + $0x44] sm:$0xff] %v166_v7  ;;  %v170_v9 = vld [vmem:[%s4805_s25 + $0xa8] sm:$0xff]  ;;  %v174_v11 = vld [vmem:[%s4805_s25 + $0xd0] sm:$0xff] }
  0x15   : > { %169 = vst [vmem:[%s4810_s26 + $0x50] sm:$0xff] %v168_v8  ;;  %v172_v10 = vld [vmem:[%s4805_s25 + $0xc8] sm:$0xff]  ;;  %171 = vst [vmem:[%s4810_s26 + $0x58] sm:$0xff] %v170_v9  ;;  %v176_v12 = vld [vmem:[%s4805_s25 + $0xf0] sm:$0xff] }
  0x16   : > { %173 = vst [vmem:[%s4810_s26 + $0x64] sm:$0xff] %v172_v10  ;;  %175 = vst [vmem:[%s4810_s26 + $0x6c] sm:$0xff] %v174_v11  ;;  %v178_v13 = vld [vmem:[%s4805_s25 + $0xf8] sm:$0xff]  ;;  %v182_v15 = vld [vmem:[%s4805_s25 + $0x120] sm:$0xff] }
  0x17   : > { %v180_v14 = vld [vmem:[%s4805_s25 + $0x118] sm:$0xff]  ;;  %177 = vst [vmem:[%s4810_s26 + $0x78] sm:$0xff] %v176_v12  ;;  %179 = vst [vmem:[%s4810_s26 + $0x80] sm:$0xff] %v178_v13  ;;  %v184_v16 = vld [vmem:[%s4805_s25 + $0x140] sm:$0xff] }
  0x18   : > { %181 = vst [vmem:[%s4810_s26 + $0x8c] sm:$0xff] %v180_v14  ;;  %v186_v17 = vld [vmem:[%s4805_s25 + $0x148] sm:$0xff]  ;;  %183 = vst [vmem:[%s4810_s26 + $0x94] sm:$0xff] %v182_v15  ;;  %v190_v19 = vld [vmem:[%s4805_s25 + $0x170] sm:$0xff] }
  0x19   : > { %185 = vst [vmem:[%s4810_s26 + $0xa0] sm:$0xff] %v184_v16  ;;  %187 = vst [vmem:[%s4810_s26 + $0xa8] sm:$0xff] %v186_v17  ;;  %v188_v18 = vld [vmem:[%s4805_s25 + $0x168] sm:$0xff]  ;;  %v192_v20 = vld [vmem:[%s4805_s25 + $0x190] sm:$0xff] }
  0x1a   : > { %189 = vst [vmem:[%s4810_s26 + $0xb4] sm:$0xff] %v188_v18  ;;  %191 = vst [vmem:[%s4810_s26 + $0xbc] sm:$0xff] %v190_v19  ;;  %v194_v21 = vld [vmem:[%s4805_s25 + $0x198] sm:$0xff]  ;;  %v198_v23 = vld [vmem:[%s4805_s25 + $0x1c0] sm:$0xff] }
  0x1b   : > { %193 = vst [vmem:[%s4810_s26 + $0xc8] sm:$0xff] %v192_v20  ;;  %v196_v22 = vld [vmem:[%s4805_s25 + $0x1b8] sm:$0xff]  ;;  %195 = vst [vmem:[%s4810_s26 + $0xd0] sm:$0xff] %v194_v21  ;;  %v200_v24 = vld [vmem:[%s4805_s25 + $0x1e0] sm:$0xff] }
  0x1c   : > { %197 = vst [vmem:[%s4810_s26 + $0xdc] sm:$0xff] %v196_v22  ;;  %199 = vst [vmem:[%s4810_s26 + $0xe4] sm:$0xff] %v198_v23  ;;  %v202_v25 = vld [vmem:[%s4805_s25 + $0x1e8] sm:$0xff]  ;;  %v206_v27 = vld [vmem:[%s4805_s25 + $0x210] sm:$0xff] }
  0x1d   : > { %v204_v26 = vld [vmem:[%s4805_s25 + $0x208] sm:$0xff]  ;;  %201 = vst [vmem:[%s4810_s26 + $0xf0] sm:$0xff] %v200_v24  ;;  %203 = vst [vmem:[%s4810_s26 + $0xf8] sm:$0xff] %v202_v25  ;;  %v208_v28 = vld [vmem:[%s4805_s25 + $0x230] sm:$0xff] }
  0x1e   : > { %205 = vst [vmem:[%s4810_s26 + $0x104] sm:$0xff] %v204_v26  ;;  %v210_v29 = vld [vmem:[%s4805_s25 + $0x238] sm:$0xff]  ;;  %207 = vst [vmem:[%s4810_s26 + $0x10c] sm:$0xff] %v206_v27  ;;  %v214_v31 = vld [vmem:[%s4805_s25 + $0x260] sm:$0xff] }
  0x1f   : > { %209 = vst [vmem:[%s4810_s26 + $0x118] sm:$0xff] %v208_v28  ;;  %211 = vst [vmem:[%s4810_s26 + $0x120] sm:$0xff] %v210_v29  ;;  %v212_v30 = vld [vmem:[%s4805_s25 + $0x258] sm:$0xff]  ;;  %v216_v32 = vld [vmem:[%s4805_s25 + $0x280] sm:$0xff] }
  0x20   : > { %213 = vst [vmem:[%s4810_s26 + $0x12c] sm:$0xff] %v212_v30  ;;  %215 = vst [vmem:[%s4810_s26 + $0x134] sm:$0xff] %v214_v31  ;;  %v218_v33 = vld [vmem:[%s4805_s25 + $0x288] sm:$0xff]  ;;  %v222_v35 = vld [vmem:[%s4805_s25 + $0x2b0] sm:$0xff] }
  0x21   : > { %217 = vst [vmem:[%s4810_s26 + $0x140] sm:$0xff] %v216_v32  ;;  %v220_v34 = vld [vmem:[%s4805_s25 + $0x2a8] sm:$0xff]  ;;  %219 = vst [vmem:[%s4810_s26 + $0x148] sm:$0xff] %v218_v33  ;;  %v224_v36 = vld [vmem:[%s4805_s25 + $0x2d0] sm:$0xff] }
  0x22   : > { %221 = vst [vmem:[%s4810_s26 + $0x154] sm:$0xff] %v220_v34  ;;  %223 = vst [vmem:[%s4810_s26 + $0x15c] sm:$0xff] %v222_v35  ;;  %v226_v37 = vld [vmem:[%s4805_s25 + $0x2d8] sm:$0xff]  ;;  %v230_v39 = vld [vmem:[%s4805_s25 + $0x300] sm:$0xff] }
  0x23   : > { %v228_v38 = vld [vmem:[%s4805_s25 + $0x2f8] sm:$0xff]  ;;  %225 = vst [vmem:[%s4810_s26 + $0x168] sm:$0xff] %v224_v36  ;;  %227 = vst [vmem:[%s4810_s26 + $0x170] sm:$0xff] %v226_v37  ;;  %v232_v40 = vld [vmem:[%s4805_s25 + $0x320] sm:$0xff] }
  0x24   : > { %229 = vst [vmem:[%s4810_s26 + $0x17c] sm:$0xff] %v228_v38  ;;  %v234_v41 = vld [vmem:[%s4805_s25 + $0x328] sm:$0xff]  ;;  %231 = vst [vmem:[%s4810_s26 + $0x184] sm:$0xff] %v230_v39  ;;  %v238_v43 = vld [vmem:[%s4805_s25 + $0x350] sm:$0xff] }
  0x25   : > { %233 = vst [vmem:[%s4810_s26 + $0x190] sm:$0xff] %v232_v40  ;;  %235 = vst [vmem:[%s4810_s26 + $0x198] sm:$0xff] %v234_v41  ;;  %v236_v42 = vld [vmem:[%s4805_s25 + $0x348] sm:$0xff]  ;;  %v240_v44 = vld [vmem:[%s4805_s25 + $0x370] sm:$0xff] }
  0x26   : > { %237 = vst [vmem:[%s4810_s26 + $0x1a4] sm:$0xff] %v236_v42  ;;  %239 = vst [vmem:[%s4810_s26 + $0x1ac] sm:$0xff] %v238_v43  ;;  %v242_v45 = vld [vmem:[%s4805_s25 + $0x378] sm:$0xff]  ;;  %v246_v47 = vld [vmem:[%s4805_s25 + $0x3a0] sm:$0xff] }
  0x27   : > { %241 = vst [vmem:[%s4810_s26 + $0x1b8] sm:$0xff] %v240_v44  ;;  %v244_v46 = vld [vmem:[%s4805_s25 + $0x398] sm:$0xff]  ;;  %243 = vst [vmem:[%s4810_s26 + $0x1c0] sm:$0xff] %v242_v45  ;;  %v248_v48 = vld [vmem:[%s4805_s25 + $0x3c0] sm:$0xff] }
  0x28   : > { %245 = vst [vmem:[%s4810_s26 + $0x1cc] sm:$0xff] %v244_v46  ;;  %247 = vst [vmem:[%s4810_s26 + $0x1d4] sm:$0xff] %v246_v47  ;;  %v250_v49 = vld [vmem:[%s4805_s25 + $0x3c8] sm:$0xff]  ;;  %v254_v51 = vld [vmem:[%s4805_s25 + $0x3f0] sm:$0xff] }
  0x29   : > { %v252_v50 = vld [vmem:[%s4805_s25 + $0x3e8] sm:$0xff]  ;;  %249 = vst [vmem:[%s4810_s26 + $0x1e0] sm:$0xff] %v248_v48  ;;  %251 = vst [vmem:[%s4810_s26 + $0x1e8] sm:$0xff] %v250_v49  ;;  %v256_v52 = vld [vmem:[%s4805_s25 + $0x410] sm:$0xff] }
  0x2a   : > { %253 = vst [vmem:[%s4810_s26 + $0x1f4] sm:$0xff] %v252_v50  ;;  %v258_v53 = vld [vmem:[%s4805_s25 + $0x418] sm:$0xff]  ;;  %255 = vst [vmem:[%s4810_s26 + $0x1fc] sm:$0xff] %v254_v51  ;;  %v262_v55 = vld [vmem:[%s4805_s25 + $0x440] sm:$0xff] }
  0x2b   : > { %257 = vst [vmem:[%s4810_s26 + $0x208] sm:$0xff] %v256_v52  ;;  %259 = vst [vmem:[%s4810_s26 + $0x210] sm:$0xff] %v258_v53  ;;  %v260_v54 = vld [vmem:[%s4805_s25 + $0x438] sm:$0xff]  ;;  %v264_v56 = vld [vmem:[%s4805_s25 + $0x460] sm:$0xff] }
  0x2c   : > { %261 = vst [vmem:[%s4810_s26 + $0x21c] sm:$0xff] %v260_v54  ;;  %263 = vst [vmem:[%s4810_s26 + $0x224] sm:$0xff] %v262_v55  ;;  %v266_v57 = vld [vmem:[%s4805_s25 + $0x468] sm:$0xff]  ;;  %v270_v59 = vld [vmem:[%s4805_s25 + $0x490] sm:$0xff] }
  0x2d   : > { %265 = vst [vmem:[%s4810_s26 + $0x230] sm:$0xff] %v264_v56  ;;  %v268_v58 = vld [vmem:[%s4805_s25 + $0x488] sm:$0xff]  ;;  %267 = vst [vmem:[%s4810_s26 + $0x238] sm:$0xff] %v266_v57  ;;  %v272_v60 = vld [vmem:[%s4805_s25 + $0x4b0] sm:$0xff] }
  0x2e   : > { %269 = vst [vmem:[%s4810_s26 + $0x244] sm:$0xff] %v268_v58  ;;  %271 = vst [vmem:[%s4810_s26 + $0x24c] sm:$0xff] %v270_v59  ;;  %v274_v61 = vld [vmem:[%s4805_s25 + $0x4b8] sm:$0xff]  ;;  %v278_v63 = vld [vmem:[%s4805_s25 + $0x4e0] sm:$0xff] }
  0x2f   : > { %v276_v62 = vld [vmem:[%s4805_s25 + $0x4d8] sm:$0xff]  ;;  %273 = vst [vmem:[%s4810_s26 + $0x258] sm:$0xff] %v272_v60  ;;  %275 = vst [vmem:[%s4810_s26 + $0x260] sm:$0xff] %v274_v61  ;;  %v280_v0 = vld [vmem:[%s4805_s25 + $0x500] sm:$0xff] }
  0x30   : > { %277 = vst [vmem:[%s4810_s26 + $0x26c] sm:$0xff] %v276_v62  ;;  %v282_v1 = vld [vmem:[%s4805_s25 + $0x508] sm:$0xff]  ;;  %279 = vst [vmem:[%s4810_s26 + $0x274] sm:$0xff] %v278_v63  ;;  %v286_v3 = vld [vmem:[%s4805_s25 + $0x530] sm:$0xff] }
  0x31   : > { %281 = vst [vmem:[%s4810_s26 + $0x280] sm:$0xff] %v280_v0  ;;  %283 = vst [vmem:[%s4810_s26 + $0x288] sm:$0xff] %v282_v1  ;;  %v284_v2 = vld [vmem:[%s4805_s25 + $0x528] sm:$0xff]  ;;  %v288_v4 = vld [vmem:[%s4805_s25 + $0x550] sm:$0xff] }
  0x32   : > { %285 = vst [vmem:[%s4810_s26 + $0x294] sm:$0xff] %v284_v2  ;;  %287 = vst [vmem:[%s4810_s26 + $0x29c] sm:$0xff] %v286_v3  ;;  %v290_v5 = vld [vmem:[%s4805_s25 + $0x558] sm:$0xff]  ;;  %v294_v7 = vld [vmem:[%s4805_s25 + $0x580] sm:$0xff] }
  0x33   : > { %289 = vst [vmem:[%s4810_s26 + $0x2a8] sm:$0xff] %v288_v4  ;;  %v292_v6 = vld [vmem:[%s4805_s25 + $0x578] sm:$0xff]  ;;  %291 = vst [vmem:[%s4810_s26 + $0x2b0] sm:$0xff] %v290_v5  ;;  %v296_v8 = vld [vmem:[%s4805_s25 + $0x5a0] sm:$0xff] }
  0x34   : > { %293 = vst [vmem:[%s4810_s26 + $0x2bc] sm:$0xff] %v292_v6  ;;  %295 = vst [vmem:[%s4810_s26 + $0x2c4] sm:$0xff] %v294_v7  ;;  %v298_v9 = vld [vmem:[%s4805_s25 + $0x5a8] sm:$0xff]  ;;  %v302_v11 = vld [vmem:[%s4805_s25 + $0x5d0] sm:$0xff] }
  0x35   : > { %v300_v10 = vld [vmem:[%s4805_s25 + $0x5c8] sm:$0xff]  ;;  %297 = vst [vmem:[%s4810_s26 + $0x2d0] sm:$0xff] %v296_v8  ;;  %299 = vst [vmem:[%s4810_s26 + $0x2d8] sm:$0xff] %v298_v9  ;;  %v304_v12 = vld [vmem:[%s4805_s25 + $0x5f0] sm:$0xff] }
  0x36   : > { %301 = vst [vmem:[%s4810_s26 + $0x2e4] sm:$0xff] %v300_v10  ;;  %v306_v13 = vld [vmem:[%s4805_s25 + $0x5f8] sm:$0xff]  ;;  %303 = vst [vmem:[%s4810_s26 + $0x2ec] sm:$0xff] %v302_v11  ;;  %v310_v15 = vld [vmem:[%s4805_s25 + $0x620] sm:$0xff] }
  0x37   : > { %305 = vst [vmem:[%s4810_s26 + $0x2f8] sm:$0xff] %v304_v12  ;;  %307 = vst [vmem:[%s4810_s26 + $0x300] sm:$0xff] %v306_v13  ;;  %v308_v14 = vld [vmem:[%s4805_s25 + $0x618] sm:$0xff]  ;;  %v312_v16 = vld [vmem:[%s4805_s25 + $0x640] sm:$0xff] }
  0x38   : > { %309 = vst [vmem:[%s4810_s26 + $0x30c] sm:$0xff] %v308_v14  ;;  %311 = vst [vmem:[%s4810_s26 + $0x314] sm:$0xff] %v310_v15  ;;  %v314_v17 = vld [vmem:[%s4805_s25 + $0x648] sm:$0xff]  ;;  %v318_v19 = vld [vmem:[%s4805_s25 + $0x670] sm:$0xff] }
  0x39   : > { %313 = vst [vmem:[%s4810_s26 + $0x320] sm:$0xff] %v312_v16  ;;  %v316_v18 = vld [vmem:[%s4805_s25 + $0x668] sm:$0xff]  ;;  %315 = vst [vmem:[%s4810_s26 + $0x328] sm:$0xff] %v314_v17  ;;  %v320_v20 = vld [vmem:[%s4805_s25 + $0x690] sm:$0xff] }
  0x3a   : > { %317 = vst [vmem:[%s4810_s26 + $0x334] sm:$0xff] %v316_v18  ;;  %319 = vst [vmem:[%s4810_s26 + $0x33c] sm:$0xff] %v318_v19  ;;  %v322_v21 = vld [vmem:[%s4805_s25 + $0x698] sm:$0xff]  ;;  %v326_v23 = vld [vmem:[%s4805_s25 + $0x6c0] sm:$0xff] }
  0x3b   : > { %v324_v22 = vld [vmem:[%s4805_s25 + $0x6b8] sm:$0xff]  ;;  %321 = vst [vmem:[%s4810_s26 + $0x348] sm:$0xff] %v320_v20  ;;  %323 = vst [vmem:[%s4810_s26 + $0x350] sm:$0xff] %v322_v21  ;;  %v328_v24 = vld [vmem:[%s4805_s25 + $0x6e0] sm:$0xff] }
  0x3c   : > { %325 = vst [vmem:[%s4810_s26 + $0x35c] sm:$0xff] %v324_v22  ;;  %v330_v25 = vld [vmem:[%s4805_s25 + $0x6e8] sm:$0xff]  ;;  %327 = vst [vmem:[%s4810_s26 + $0x364] sm:$0xff] %v326_v23  ;;  %v334_v27 = vld [vmem:[%s4805_s25 + $0x710] sm:$0xff] }
  0x3d   : > { %329 = vst [vmem:[%s4810_s26 + $0x370] sm:$0xff] %v328_v24  ;;  %331 = vst [vmem:[%s4810_s26 + $0x378] sm:$0xff] %v330_v25  ;;  %v332_v26 = vld [vmem:[%s4805_s25 + $0x708] sm:$0xff]  ;;  %v336_v28 = vld [vmem:[%s4805_s25 + $0x730] sm:$0xff] }
  0x3e   : > { %333 = vst [vmem:[%s4810_s26 + $0x384] sm:$0xff] %v332_v26  ;;  %335 = vst [vmem:[%s4810_s26 + $0x38c] sm:$0xff] %v334_v27  ;;  %v338_v29 = vld [vmem:[%s4805_s25 + $0x738] sm:$0xff]  ;;  %v342_v31 = vld [vmem:[%s4805_s25 + $0x760] sm:$0xff] }
  0x3f   : > { %337 = vst [vmem:[%s4810_s26 + $0x398] sm:$0xff] %v336_v28  ;;  %v340_v30 = vld [vmem:[%s4805_s25 + $0x758] sm:$0xff]  ;;  %339 = vst [vmem:[%s4810_s26 + $0x3a0] sm:$0xff] %v338_v29  ;;  %v344_v32 = vld [vmem:[%s4805_s25 + $0x780] sm:$0xff] }
  0x40   : > { %341 = vst [vmem:[%s4810_s26 + $0x3ac] sm:$0xff] %v340_v30  ;;  %343 = vst [vmem:[%s4810_s26 + $0x3b4] sm:$0xff] %v342_v31  ;;  %v346_v33 = vld [vmem:[%s4805_s25 + $0x788] sm:$0xff]  ;;  %v350_v35 = vld [vmem:[%s4805_s25 + $0x7b0] sm:$0xff] }
  0x41   : > { %v348_v34 = vld [vmem:[%s4805_s25 + $0x7a8] sm:$0xff]  ;;  %345 = vst [vmem:[%s4810_s26 + $0x3c0] sm:$0xff] %v344_v32  ;;  %347 = vst [vmem:[%s4810_s26 + $0x3c8] sm:$0xff] %v346_v33  ;;  %v352_v36 = vld [vmem:[%s4805_s25 + $0x7d0] sm:$0xff] }
  0x42   : > { %349 = vst [vmem:[%s4810_s26 + $0x3d4] sm:$0xff] %v348_v34  ;;  %v354_v37 = vld [vmem:[%s4805_s25 + $0x7d8] sm:$0xff]  ;;  %351 = vst [vmem:[%s4810_s26 + $0x3dc] sm:$0xff] %v350_v35  ;;  %v358_v39 = vld [vmem:[%s4805_s25 + $0x800] sm:$0xff] }
  0x43   : > { %353 = vst [vmem:[%s4810_s26 + $0x3e8] sm:$0xff] %v352_v36  ;;  %355 = vst [vmem:[%s4810_s26 + $0x3f0] sm:$0xff] %v354_v37  ;;  %v356_v38 = vld [vmem:[%s4805_s25 + $0x7f8] sm:$0xff]  ;;  %v360_v40 = vld [vmem:[%s4805_s25 + $0x820] sm:$0xff] }
  0x44   : > { %357 = vst [vmem:[%s4810_s26 + $0x3fc] sm:$0xff] %v356_v38  ;;  %359 = vst [vmem:[%s4810_s26 + $0x404] sm:$0xff] %v358_v39  ;;  %v362_v41 = vld [vmem:[%s4805_s25 + $0x828] sm:$0xff]  ;;  %v366_v43 = vld [vmem:[%s4805_s25 + $0x850] sm:$0xff] }
  0x45   : > { %361 = vst [vmem:[%s4810_s26 + $0x410] sm:$0xff] %v360_v40  ;;  %v364_v42 = vld [vmem:[%s4805_s25 + $0x848] sm:$0xff]  ;;  %363 = vst [vmem:[%s4810_s26 + $0x418] sm:$0xff] %v362_v41  ;;  %v368_v44 = vld [vmem:[%s4805_s25 + $0x870] sm:$0xff] }
  0x46   : > { %365 = vst [vmem:[%s4810_s26 + $0x424] sm:$0xff] %v364_v42  ;;  %367 = vst [vmem:[%s4810_s26 + $0x42c] sm:$0xff] %v366_v43  ;;  %v370_v45 = vld [vmem:[%s4805_s25 + $0x878] sm:$0xff]  ;;  %v374_v47 = vld [vmem:[%s4805_s25 + $0x8a0] sm:$0xff] }
  0x47   : > { %v372_v46 = vld [vmem:[%s4805_s25 + $0x898] sm:$0xff]  ;;  %369 = vst [vmem:[%s4810_s26 + $0x438] sm:$0xff] %v368_v44  ;;  %371 = vst [vmem:[%s4810_s26 + $0x440] sm:$0xff] %v370_v45  ;;  %v376_v48 = vld [vmem:[%s4805_s25 + $0x8c0] sm:$0xff] }
  0x48   : > { %373 = vst [vmem:[%s4810_s26 + $0x44c] sm:$0xff] %v372_v46  ;;  %v378_v49 = vld [vmem:[%s4805_s25 + $0x8c8] sm:$0xff]  ;;  %375 = vst [vmem:[%s4810_s26 + $0x454] sm:$0xff] %v374_v47  ;;  %v382_v51 = vld [vmem:[%s4805_s25 + $0x8f0] sm:$0xff] }
  0x49   : > { %377 = vst [vmem:[%s4810_s26 + $0x460] sm:$0xff] %v376_v48  ;;  %379 = vst [vmem:[%s4810_s26 + $0x468] sm:$0xff] %v378_v49  ;;  %v380_v50 = vld [vmem:[%s4805_s25 + $0x8e8] sm:$0xff]  ;;  %v384_v52 = vld [vmem:[%s4805_s25 + $0x910] sm:$0xff] }
  0x4a   : > { %381 = vst [vmem:[%s4810_s26 + $0x474] sm:$0xff] %v380_v50  ;;  %383 = vst [vmem:[%s4810_s26 + $0x47c] sm:$0xff] %v382_v51  ;;  %v386_v53 = vld [vmem:[%s4805_s25 + $0x918] sm:$0xff]  ;;  %v390_v55 = vld [vmem:[%s4805_s25 + $0x940] sm:$0xff] }
  0x4b   : > { %385 = vst [vmem:[%s4810_s26 + $0x488] sm:$0xff] %v384_v52  ;;  %v388_v54 = vld [vmem:[%s4805_s25 + $0x938] sm:$0xff]  ;;  %387 = vst [vmem:[%s4810_s26 + $0x490] sm:$0xff] %v386_v53  ;;  %v392_v56 = vld [vmem:[%s4805_s25 + $0x960] sm:$0xff] }
  0x4c   : > { %389 = vst [vmem:[%s4810_s26 + $0x49c] sm:$0xff] %v388_v54  ;;  %391 = vst [vmem:[%s4810_s26 + $0x4a4] sm:$0xff] %v390_v55  ;;  %v394_v57 = vld [vmem:[%s4805_s25 + $0x968] sm:$0xff]  ;;  %v398_v59 = vld [vmem:[%s4805_s25 + $0x990] sm:$0xff] }
  0x4d   : > { %v396_v58 = vld [vmem:[%s4805_s25 + $0x988] sm:$0xff]  ;;  %393 = vst [vmem:[%s4810_s26 + $0x4b0] sm:$0xff] %v392_v56  ;;  %395 = vst [vmem:[%s4810_s26 + $0x4b8] sm:$0xff] %v394_v57  ;;  %v400_v60 = vld [vmem:[%s4805_s25 + $0x9b0] sm:$0xff] }
  0x4e   : > { %397 = vst [vmem:[%s4810_s26 + $0x4c4] sm:$0xff] %v396_v58  ;;  %v402_v61 = vld [vmem:[%s4805_s25 + $0x9b8] sm:$0xff]  ;;  %399 = vst [vmem:[%s4810_s26 + $0x4cc] sm:$0xff] %v398_v59  ;;  %v406_v63 = vld [vmem:[%s4805_s25 + $0x9e0] sm:$0xff] }
  0x4f   : > { %401 = vst [vmem:[%s4810_s26 + $0x4d8] sm:$0xff] %v400_v60  ;;  %403 = vst [vmem:[%s4810_s26 + $0x4e0] sm:$0xff] %v402_v61  ;;  %v404_v62 = vld [vmem:[%s4805_s25 + $0x9d8] sm:$0xff]  ;;  %v408_v0 = vld [vmem:[%s4805_s25 + $0xa00] sm:$0xff] }
  0x50   : > { %405 = vst [vmem:[%s4810_s26 + $0x4ec] sm:$0xff] %v404_v62  ;;  %407 = vst [vmem:[%s4810_s26 + $0x4f4] sm:$0xff] %v406_v63  ;;  %v410_v1 = vld [vmem:[%s4805_s25 + $0xa08] sm:$0xff]  ;;  %v414_v3 = vld [vmem:[%s4805_s25 + $0xa30] sm:$0xff] }
  0x51   : > { %409 = vst [vmem:[%s4810_s26 + $0x500] sm:$0xff] %v408_v0  ;;  %v412_v2 = vld [vmem:[%s4805_s25 + $0xa28] sm:$0xff]  ;;  %411 = vst [vmem:[%s4810_s26 + $0x508] sm:$0xff] %v410_v1  ;;  %v416_v4 = vld [vmem:[%s4805_s25 + $0xa50] sm:$0xff] }
  0x52   : > { %413 = vst [vmem:[%s4810_s26 + $0x514] sm:$0xff] %v412_v2  ;;  %415 = vst [vmem:[%s4810_s26 + $0x51c] sm:$0xff] %v414_v3  ;;  %v418_v5 = vld [vmem:[%s4805_s25 + $0xa58] sm:$0xff]  ;;  %v422_v7 = vld [vmem:[%s4805_s25 + $0xa80] sm:$0xff] }
  0x53   : > { %v420_v6 = vld [vmem:[%s4805_s25 + $0xa78] sm:$0xff]  ;;  %417 = vst [vmem:[%s4810_s26 + $0x528] sm:$0xff] %v416_v4  ;;  %419 = vst [vmem:[%s4810_s26 + $0x530] sm:$0xff] %v418_v5  ;;  %v424_v8 = vld [vmem:[%s4805_s25 + $0xaa0] sm:$0xff] }
  0x54   : > { %421 = vst [vmem:[%s4810_s26 + $0x53c] sm:$0xff] %v420_v6  ;;  %v426_v9 = vld [vmem:[%s4805_s25 + $0xaa8] sm:$0xff]  ;;  %423 = vst [vmem:[%s4810_s26 + $0x544] sm:$0xff] %v422_v7  ;;  %v430_v11 = vld [vmem:[%s4805_s25 + $0xad0] sm:$0xff] }
  0x55   : > { %425 = vst [vmem:[%s4810_s26 + $0x550] sm:$0xff] %v424_v8  ;;  %427 = vst [vmem:[%s4810_s26 + $0x558] sm:$0xff] %v426_v9  ;;  %v428_v10 = vld [vmem:[%s4805_s25 + $0xac8] sm:$0xff]  ;;  %v432_v12 = vld [vmem:[%s4805_s25 + $0xaf0] sm:$0xff] }
  0x56   : > { %429 = vst [vmem:[%s4810_s26 + $0x564] sm:$0xff] %v428_v10  ;;  %431 = vst [vmem:[%s4810_s26 + $0x56c] sm:$0xff] %v430_v11  ;;  %v434_v13 = vld [vmem:[%s4805_s25 + $0xaf8] sm:$0xff]  ;;  %v438_v15 = vld [vmem:[%s4805_s25 + $0xb20] sm:$0xff] }
  0x57   : > { %433 = vst [vmem:[%s4810_s26 + $0x578] sm:$0xff] %v432_v12  ;;  %v436_v14 = vld [vmem:[%s4805_s25 + $0xb18] sm:$0xff]  ;;  %435 = vst [vmem:[%s4810_s26 + $0x580] sm:$0xff] %v434_v13  ;;  %v440_v16 = vld [vmem:[%s4805_s25 + $0xb40] sm:$0xff] }
  0x58   : > { %437 = vst [vmem:[%s4810_s26 + $0x58c] sm:$0xff] %v436_v14  ;;  %439 = vst [vmem:[%s4810_s26 + $0x594] sm:$0xff] %v438_v15  ;;  %v442_v17 = vld [vmem:[%s4805_s25 + $0xb48] sm:$0xff]  ;;  %v446_v19 = vld [vmem:[%s4805_s25 + $0xb70] sm:$0xff] }
  0x59   : > { %v444_v18 = vld [vmem:[%s4805_s25 + $0xb68] sm:$0xff]  ;;  %441 = vst [vmem:[%s4810_s26 + $0x5a0] sm:$0xff] %v440_v16  ;;  %443 = vst [vmem:[%s4810_s26 + $0x5a8] sm:$0xff] %v442_v17  ;;  %v448_v20 = vld [vmem:[%s4805_s25 + $0xb90] sm:$0xff] }
  0x5a   : > { %445 = vst [vmem:[%s4810_s26 + $0x5b4] sm:$0xff] %v444_v18  ;;  %v450_v21 = vld [vmem:[%s4805_s25 + $0xb98] sm:$0xff]  ;;  %447 = vst [vmem:[%s4810_s26 + $0x5bc] sm:$0xff] %v446_v19  ;;  %v454_v23 = vld [vmem:[%s4805_s25 + $0xbc0] sm:$0xff] }
  0x5b   : > { %449 = vst [vmem:[%s4810_s26 + $0x5c8] sm:$0xff] %v448_v20  ;;  %451 = vst [vmem:[%s4810_s26 + $0x5d0] sm:$0xff] %v450_v21  ;;  %v452_v22 = vld [vmem:[%s4805_s25 + $0xbb8] sm:$0xff]  ;;  %v456_v24 = vld [vmem:[%s4805_s25 + $0xbe0] sm:$0xff] }
  0x5c   : > { %453 = vst [vmem:[%s4810_s26 + $0x5dc] sm:$0xff] %v452_v22  ;;  %455 = vst [vmem:[%s4810_s26 + $0x5e4] sm:$0xff] %v454_v23  ;;  %v458_v25 = vld [vmem:[%s4805_s25 + $0xbe8] sm:$0xff]  ;;  %v462_v27 = vld [vmem:[%s4805_s25 + $0xc10] sm:$0xff] }
  0x5d   : > { %457 = vst [vmem:[%s4810_s26 + $0x5f0] sm:$0xff] %v456_v24  ;;  %v460_v26 = vld [vmem:[%s4805_s25 + $0xc08] sm:$0xff]  ;;  %459 = vst [vmem:[%s4810_s26 + $0x5f8] sm:$0xff] %v458_v25  ;;  %v464_v28 = vld [vmem:[%s4805_s25 + $0xc30] sm:$0xff] }
  0x5e   : > { %461 = vst [vmem:[%s4810_s26 + $0x604] sm:$0xff] %v460_v26  ;;  %463 = vst [vmem:[%s4810_s26 + $0x60c] sm:$0xff] %v462_v27  ;;  %v466_v29 = vld [vmem:[%s4805_s25 + $0xc38] sm:$0xff]  ;;  %v470_v31 = vld [vmem:[%s4805_s25 + $0xc60] sm:$0xff] }
  0x5f   : > { %v468_v30 = vld [vmem:[%s4805_s25 + $0xc58] sm:$0xff]  ;;  %465 = vst [vmem:[%s4810_s26 + $0x618] sm:$0xff] %v464_v28  ;;  %467 = vst [vmem:[%s4810_s26 + $0x620] sm:$0xff] %v466_v29  ;;  %v472_v32 = vld [vmem:[%s4805_s25 + $0xc80] sm:$0xff] }
  0x60   : > { %469 = vst [vmem:[%s4810_s26 + $0x62c] sm:$0xff] %v468_v30  ;;  %v474_v33 = vld [vmem:[%s4805_s25 + $0xc88] sm:$0xff]  ;;  %471 = vst [vmem:[%s4810_s26 + $0x634] sm:$0xff] %v470_v31  ;;  %v478_v35 = vld [vmem:[%s4805_s25 + $0xcb0] sm:$0xff] }
  0x61   : > { %473 = vst [vmem:[%s4810_s26 + $0x640] sm:$0xff] %v472_v32  ;;  %475 = vst [vmem:[%s4810_s26 + $0x648] sm:$0xff] %v474_v33  ;;  %v476_v34 = vld [vmem:[%s4805_s25 + $0xca8] sm:$0xff]  ;;  %v480_v36 = vld [vmem:[%s4805_s25 + $0xcd0] sm:$0xff] }
  0x62   : > { %477 = vst [vmem:[%s4810_s26 + $0x654] sm:$0xff] %v476_v34  ;;  %479 = vst [vmem:[%s4810_s26 + $0x65c] sm:$0xff] %v478_v35  ;;  %v482_v37 = vld [vmem:[%s4805_s25 + $0xcd8] sm:$0xff]  ;;  %v486_v39 = vld [vmem:[%s4805_s25 + $0xd00] sm:$0xff] }
  0x63   : > { %481 = vst [vmem:[%s4810_s26 + $0x668] sm:$0xff] %v480_v36  ;;  %v484_v38 = vld [vmem:[%s4805_s25 + $0xcf8] sm:$0xff]  ;;  %483 = vst [vmem:[%s4810_s26 + $0x670] sm:$0xff] %v482_v37  ;;  %v488_v40 = vld [vmem:[%s4805_s25 + $0xd20] sm:$0xff] }
  0x64   : > { %485 = vst [vmem:[%s4810_s26 + $0x67c] sm:$0xff] %v484_v38  ;;  %487 = vst [vmem:[%s4810_s26 + $0x684] sm:$0xff] %v486_v39  ;;  %v490_v41 = vld [vmem:[%s4805_s25 + $0xd28] sm:$0xff]  ;;  %v494_v43 = vld [vmem:[%s4805_s25 + $0xd50] sm:$0xff] }
  0x65   : > { %v492_v42 = vld [vmem:[%s4805_s25 + $0xd48] sm:$0xff]  ;;  %489 = vst [vmem:[%s4810_s26 + $0x690] sm:$0xff] %v488_v40  ;;  %491 = vst [vmem:[%s4810_s26 + $0x698] sm:$0xff] %v490_v41  ;;  %v496_v44 = vld [vmem:[%s4805_s25 + $0xd70] sm:$0xff] }
  0x66   : > { %493 = vst [vmem:[%s4810_s26 + $0x6a4] sm:$0xff] %v492_v42  ;;  %v498_v45 = vld [vmem:[%s4805_s25 + $0xd78] sm:$0xff]  ;;  %495 = vst [vmem:[%s4810_s26 + $0x6ac] sm:$0xff] %v494_v43  ;;  %v502_v47 = vld [vmem:[%s4805_s25 + $0xda0] sm:$0xff] }
  0x67   : > { %497 = vst [vmem:[%s4810_s26 + $0x6b8] sm:$0xff] %v496_v44  ;;  %499 = vst [vmem:[%s4810_s26 + $0x6c0] sm:$0xff] %v498_v45  ;;  %v500_v46 = vld [vmem:[%s4805_s25 + $0xd98] sm:$0xff]  ;;  %v504_v48 = vld [vmem:[%s4805_s25 + $0xdc0] sm:$0xff] }
  0x68   : > { %501 = vst [vmem:[%s4810_s26 + $0x6cc] sm:$0xff] %v500_v46  ;;  %503 = vst [vmem:[%s4810_s26 + $0x6d4] sm:$0xff] %v502_v47  ;;  %v506_v49 = vld [vmem:[%s4805_s25 + $0xdc8] sm:$0xff]  ;;  %v510_v51 = vld [vmem:[%s4805_s25 + $0xdf0] sm:$0xff] }
  0x69   : > { %505 = vst [vmem:[%s4810_s26 + $0x6e0] sm:$0xff] %v504_v48  ;;  %v508_v50 = vld [vmem:[%s4805_s25 + $0xde8] sm:$0xff]  ;;  %507 = vst [vmem:[%s4810_s26 + $0x6e8] sm:$0xff] %v506_v49  ;;  %v3519_v52 = vld [vmem:[%s4805_s25 + $0x10] sm:$0xf] }
  0x6a   : > { %509 = vst [vmem:[%s4810_s26 + $0x6f4] sm:$0xff] %v508_v50  ;;  %511 = vst [vmem:[%s4810_s26 + $0x6fc] sm:$0xff] %v510_v51  ;;  %v3521_v53 = vld [vmem:[%s4805_s25 + $0x38] sm:$0xf]  ;;  %v3523_v54 = vld [vmem:[%s4805_s25 + $0x60] sm:$0xf] }
  0x6b   : > { %3520 = vst [vmem:[%s4810_s26 + $0x10] sm:$0xf] %v3519_v52  ;;  %3522 = vst [vmem:[%s4810_s26 + $0x24] sm:$0xf] %v3521_v53  ;;  %v3525_v55 = vld [vmem:[%s4805_s25 + $0x88] sm:$0xf] }
  0x6c   : > { %3524 = vst [vmem:[%s4810_s26 + $0x38] sm:$0xf] %v3523_v54  ;;  %v3527_v56 = vld [vmem:[%s4805_s25 + $0xb0] sm:$0xf]  ;;  %v3529_v57 = vld [vmem:[%s4805_s25 + $0xd8] sm:$0xf] }
  0x6d   : > { %3526 = vst [vmem:[%s4810_s26 + $0x4c] sm:$0xf] %v3525_v55  ;;  %3528 = vst [vmem:[%s4810_s26 + $0x60] sm:$0xf] %v3527_v56  ;;  %v3531_v58 = vld [vmem:[%s4805_s25 + $0x100] sm:$0xf] }
  0x6e   : > { %3530 = vst [vmem:[%s4810_s26 + $0x74] sm:$0xf] %v3529_v57  ;;  %v3533_v59 = vld [vmem:[%s4805_s25 + $0x128] sm:$0xf]  ;;  %v3535_v60 = vld [vmem:[%s4805_s25 + $0x150] sm:$0xf] }
  0x6f   : > { %3532 = vst [vmem:[%s4810_s26 + $0x88] sm:$0xf] %v3531_v58  ;;  %3534 = vst [vmem:[%s4810_s26 + $0x9c] sm:$0xf] %v3533_v59  ;;  %v3537_v61 = vld [vmem:[%s4805_s25 + $0x178] sm:$0xf] }
  0x70   : > { %3536 = vst [vmem:[%s4810_s26 + $0xb0] sm:$0xf] %v3535_v60  ;;  %v3539_v62 = vld [vmem:[%s4805_s25 + $0x1a0] sm:$0xf]  ;;  %v3541_v63 = vld [vmem:[%s4805_s25 + $0x1c8] sm:$0xf] }
  0x71   : > { %3538 = vst [vmem:[%s4810_s26 + $0xc4] sm:$0xf] %v3537_v61  ;;  %3540 = vst [vmem:[%s4810_s26 + $0xd8] sm:$0xf] %v3539_v62  ;;  %v3543_v0 = vld [vmem:[%s4805_s25 + $0x1f0] sm:$0xf] }
  0x72   : > { %3542 = vst [vmem:[%s4810_s26 + $0xec] sm:$0xf] %v3541_v63  ;;  %v3545_v1 = vld [vmem:[%s4805_s25 + $0x218] sm:$0xf]  ;;  %v3547_v2 = vld [vmem:[%s4805_s25 + $0x240] sm:$0xf] }
  0x73   : > { %3544 = vst [vmem:[%s4810_s26 + $0x100] sm:$0xf] %v3543_v0  ;;  %3546 = vst [vmem:[%s4810_s26 + $0x114] sm:$0xf] %v3545_v1  ;;  %v3549_v3 = vld [vmem:[%s4805_s25 + $0x268] sm:$0xf] }
  0x74   : > { %3548 = vst [vmem:[%s4810_s26 + $0x128] sm:$0xf] %v3547_v2  ;;  %v3551_v4 = vld [vmem:[%s4805_s25 + $0x290] sm:$0xf]  ;;  %v3553_v5 = vld [vmem:[%s4805_s25 + $0x2b8] sm:$0xf] }
  0x75   : > { %3550 = vst [vmem:[%s4810_s26 + $0x13c] sm:$0xf] %v3549_v3  ;;  %3552 = vst [vmem:[%s4810_s26 + $0x150] sm:$0xf] %v3551_v4  ;;  %v3555_v6 = vld [vmem:[%s4805_s25 + $0x2e0] sm:$0xf] }
  0x76   : > { %3554 = vst [vmem:[%s4810_s26 + $0x164] sm:$0xf] %v3553_v5  ;;  %v3557_v7 = vld [vmem:[%s4805_s25 + $0x308] sm:$0xf]  ;;  %v3559_v8 = vld [vmem:[%s4805_s25 + $0x330] sm:$0xf] }
  0x77   : > { %3556 = vst [vmem:[%s4810_s26 + $0x178] sm:$0xf] %v3555_v6  ;;  %3558 = vst [vmem:[%s4810_s26 + $0x18c] sm:$0xf] %v3557_v7  ;;  %v3561_v9 = vld [vmem:[%s4805_s25 + $0x358] sm:$0xf] }
  0x78   : > { %3560 = vst [vmem:[%s4810_s26 + $0x1a0] sm:$0xf] %v3559_v8  ;;  %v3563_v10 = vld [vmem:[%s4805_s25 + $0x380] sm:$0xf]  ;;  %v3565_v11 = vld [vmem:[%s4805_s25 + $0x3a8] sm:$0xf] }
  0x79   : > { %3562 = vst [vmem:[%s4810_s26 + $0x1b4] sm:$0xf] %v3561_v9  ;;  %3564 = vst [vmem:[%s4810_s26 + $0x1c8] sm:$0xf] %v3563_v10  ;;  %v3567_v12 = vld [vmem:[%s4805_s25 + $0x3d0] sm:$0xf] }
  0x7a   : > { %3566 = vst [vmem:[%s4810_s26 + $0x1dc] sm:$0xf] %v3565_v11  ;;  %v3569_v13 = vld [vmem:[%s4805_s25 + $0x3f8] sm:$0xf]  ;;  %v3571_v14 = vld [vmem:[%s4805_s25 + $0x420] sm:$0xf] }
  0x7b   : > { %3568 = vst [vmem:[%s4810_s26 + $0x1f0] sm:$0xf] %v3567_v12  ;;  %3570 = vst [vmem:[%s4810_s26 + $0x204] sm:$0xf] %v3569_v13  ;;  %v3573_v15 = vld [vmem:[%s4805_s25 + $0x448] sm:$0xf] }
  0x7c   : > { %3572 = vst [vmem:[%s4810_s26 + $0x218] sm:$0xf] %v3571_v14  ;;  %v3575_v16 = vld [vmem:[%s4805_s25 + $0x470] sm:$0xf]  ;;  %v3577_v17 = vld [vmem:[%s4805_s25 + $0x498] sm:$0xf] }
  0x7d   : > { %3574 = vst [vmem:[%s4810_s26 + $0x22c] sm:$0xf] %v3573_v15  ;;  %3576 = vst [vmem:[%s4810_s26 + $0x240] sm:$0xf] %v3575_v16  ;;  %v3579_v18 = vld [vmem:[%s4805_s25 + $0x4c0] sm:$0xf] }
  0x7e   : > { %3578 = vst [vmem:[%s4810_s26 + $0x254] sm:$0xf] %v3577_v17  ;;  %v3581_v19 = vld [vmem:[%s4805_s25 + $0x4e8] sm:$0xf]  ;;  %v3583_v20 = vld [vmem:[%s4805_s25 + $0x510] sm:$0xf] }
  0x7f   : > { %3580 = vst [vmem:[%s4810_s26 + $0x268] sm:$0xf] %v3579_v18  ;;  %3582 = vst [vmem:[%s4810_s26 + $0x27c] sm:$0xf] %v3581_v19  ;;  %v3585_v21 = vld [vmem:[%s4805_s25 + $0x538] sm:$0xf] }
  0x80   : > { %3584 = vst [vmem:[%s4810_s26 + $0x290] sm:$0xf] %v3583_v20  ;;  %v3587_v22 = vld [vmem:[%s4805_s25 + $0x560] sm:$0xf]  ;;  %v3589_v23 = vld [vmem:[%s4805_s25 + $0x588] sm:$0xf] }
  0x81   : > { %3586 = vst [vmem:[%s4810_s26 + $0x2a4] sm:$0xf] %v3585_v21  ;;  %3588 = vst [vmem:[%s4810_s26 + $0x2b8] sm:$0xf] %v3587_v22  ;;  %v3591_v24 = vld [vmem:[%s4805_s25 + $0x5b0] sm:$0xf] }
  0x82   : > { %3590 = vst [vmem:[%s4810_s26 + $0x2cc] sm:$0xf] %v3589_v23  ;;  %v3593_v25 = vld [vmem:[%s4805_s25 + $0x5d8] sm:$0xf]  ;;  %v3595_v26 = vld [vmem:[%s4805_s25 + $0x600] sm:$0xf] }
  0x83   : > { %3592 = vst [vmem:[%s4810_s26 + $0x2e0] sm:$0xf] %v3591_v24  ;;  %3594 = vst [vmem:[%s4810_s26 + $0x2f4] sm:$0xf] %v3593_v25  ;;  %v3597_v27 = vld [vmem:[%s4805_s25 + $0x628] sm:$0xf] }
  0x84   : > { %3596 = vst [vmem:[%s4810_s26 + $0x308] sm:$0xf] %v3595_v26  ;;  %v3599_v28 = vld [vmem:[%s4805_s25 + $0x650] sm:$0xf]  ;;  %v3601_v29 = vld [vmem:[%s4805_s25 + $0x678] sm:$0xf] }
  0x85   : > { %3598 = vst [vmem:[%s4810_s26 + $0x31c] sm:$0xf] %v3597_v27  ;;  %3600 = vst [vmem:[%s4810_s26 + $0x330] sm:$0xf] %v3599_v28  ;;  %v3603_v30 = vld [vmem:[%s4805_s25 + $0x6a0] sm:$0xf] }
  0x86   : > { %3602 = vst [vmem:[%s4810_s26 + $0x344] sm:$0xf] %v3601_v29  ;;  %v3605_v31 = vld [vmem:[%s4805_s25 + $0x6c8] sm:$0xf]  ;;  %v3607_v32 = vld [vmem:[%s4805_s25 + $0x6f0] sm:$0xf] }
  0x87   : > { %3604 = vst [vmem:[%s4810_s26 + $0x358] sm:$0xf] %v3603_v30  ;;  %3606 = vst [vmem:[%s4810_s26 + $0x36c] sm:$0xf] %v3605_v31  ;;  %v3609_v33 = vld [vmem:[%s4805_s25 + $0x718] sm:$0xf] }
  0x88   : > { %3608 = vst [vmem:[%s4810_s26 + $0x380] sm:$0xf] %v3607_v32  ;;  %v3611_v34 = vld [vmem:[%s4805_s25 + $0x740] sm:$0xf]  ;;  %v3613_v35 = vld [vmem:[%s4805_s25 + $0x768] sm:$0xf] }
  0x89   : > { %3610 = vst [vmem:[%s4810_s26 + $0x394] sm:$0xf] %v3609_v33  ;;  %3612 = vst [vmem:[%s4810_s26 + $0x3a8] sm:$0xf] %v3611_v34  ;;  %v3615_v36 = vld [vmem:[%s4805_s25 + $0x790] sm:$0xf] }
  0x8a   : > { %3614 = vst [vmem:[%s4810_s26 + $0x3bc] sm:$0xf] %v3613_v35  ;;  %v3617_v37 = vld [vmem:[%s4805_s25 + $0x7b8] sm:$0xf]  ;;  %v3619_v38 = vld [vmem:[%s4805_s25 + $0x7e0] sm:$0xf] }
  0x8b   : > { %3616 = vst [vmem:[%s4810_s26 + $0x3d0] sm:$0xf] %v3615_v36  ;;  %3618 = vst [vmem:[%s4810_s26 + $0x3e4] sm:$0xf] %v3617_v37  ;;  %v3621_v39 = vld [vmem:[%s4805_s25 + $0x808] sm:$0xf] }
  0x8c   : > { %3620 = vst [vmem:[%s4810_s26 + $0x3f8] sm:$0xf] %v3619_v38  ;;  %v3623_v40 = vld [vmem:[%s4805_s25 + $0x830] sm:$0xf]  ;;  %v3625_v41 = vld [vmem:[%s4805_s25 + $0x858] sm:$0xf] }
  0x8d   : > { %3622 = vst [vmem:[%s4810_s26 + $0x40c] sm:$0xf] %v3621_v39  ;;  %3624 = vst [vmem:[%s4810_s26 + $0x420] sm:$0xf] %v3623_v40  ;;  %v3627_v42 = vld [vmem:[%s4805_s25 + $0x880] sm:$0xf] }
  0x8e   : > { %3626 = vst [vmem:[%s4810_s26 + $0x434] sm:$0xf] %v3625_v41  ;;  %v3629_v43 = vld [vmem:[%s4805_s25 + $0x8a8] sm:$0xf]  ;;  %v3631_v44 = vld [vmem:[%s4805_s25 + $0x8d0] sm:$0xf] }
  0x8f   : > { %3628 = vst [vmem:[%s4810_s26 + $0x448] sm:$0xf] %v3627_v42  ;;  %3630 = vst [vmem:[%s4810_s26 + $0x45c] sm:$0xf] %v3629_v43  ;;  %v3633_v45 = vld [vmem:[%s4805_s25 + $0x8f8] sm:$0xf] }
  0x90   : > { %3632 = vst [vmem:[%s4810_s26 + $0x470] sm:$0xf] %v3631_v44  ;;  %v3635_v46 = vld [vmem:[%s4805_s25 + $0x920] sm:$0xf]  ;;  %v3637_v47 = vld [vmem:[%s4805_s25 + $0x948] sm:$0xf] }
  0x91   : > { %3634 = vst [vmem:[%s4810_s26 + $0x484] sm:$0xf] %v3633_v45  ;;  %3636 = vst [vmem:[%s4810_s26 + $0x498] sm:$0xf] %v3635_v46  ;;  %v3639_v48 = vld [vmem:[%s4805_s25 + $0x970] sm:$0xf] }
  0x92   : > { %3638 = vst [vmem:[%s4810_s26 + $0x4ac] sm:$0xf] %v3637_v47  ;;  %v3641_v49 = vld [vmem:[%s4805_s25 + $0x998] sm:$0xf]  ;;  %v3643_v50 = vld [vmem:[%s4805_s25 + $0x9c0] sm:$0xf] }
  0x93   : > { %3640 = vst [vmem:[%s4810_s26 + $0x4c0] sm:$0xf] %v3639_v48  ;;  %3642 = vst [vmem:[%s4810_s26 + $0x4d4] sm:$0xf] %v3641_v49  ;;  %v3645_v51 = vld [vmem:[%s4805_s25 + $0x9e8] sm:$0xf] }
  0x94   : > { %3644 = vst [vmem:[%s4810_s26 + $0x4e8] sm:$0xf] %v3643_v50  ;;  %v3647_v52 = vld [vmem:[%s4805_s25 + $0xa10] sm:$0xf]  ;;  %v3649_v53 = vld [vmem:[%s4805_s25 + $0xa38] sm:$0xf] }
  0x95   : > { %3646 = vst [vmem:[%s4810_s26 + $0x4fc] sm:$0xf] %v3645_v51  ;;  %3648 = vst [vmem:[%s4810_s26 + $0x510] sm:$0xf] %v3647_v52  ;;  %v3651_v54 = vld [vmem:[%s4805_s25 + $0xa60] sm:$0xf] }
  0x96   : > { %3650 = vst [vmem:[%s4810_s26 + $0x524] sm:$0xf] %v3649_v53  ;;  %v3653_v55 = vld [vmem:[%s4805_s25 + $0xa88] sm:$0xf]  ;;  %v3655_v56 = vld [vmem:[%s4805_s25 + $0xab0] sm:$0xf] }
  0x97   : > { %3652 = vst [vmem:[%s4810_s26 + $0x538] sm:$0xf] %v3651_v54  ;;  %3654 = vst [vmem:[%s4810_s26 + $0x54c] sm:$0xf] %v3653_v55  ;;  %v3657_v57 = vld [vmem:[%s4805_s25 + $0xad8] sm:$0xf] }
  0x98   : > { %3656 = vst [vmem:[%s4810_s26 + $0x560] sm:$0xf] %v3655_v56  ;;  %v3659_v58 = vld [vmem:[%s4805_s25 + $0xb00] sm:$0xf]  ;;  %v3661_v59 = vld [vmem:[%s4805_s25 + $0xb28] sm:$0xf] }
  0x99   : > { %3658 = vst [vmem:[%s4810_s26 + $0x574] sm:$0xf] %v3657_v57  ;;  %3660 = vst [vmem:[%s4810_s26 + $0x588] sm:$0xf] %v3659_v58  ;;  %v3663_v60 = vld [vmem:[%s4805_s25 + $0xb50] sm:$0xf] }
  0x9a   : > { %3662 = vst [vmem:[%s4810_s26 + $0x59c] sm:$0xf] %v3661_v59  ;;  %v3665_v61 = vld [vmem:[%s4805_s25 + $0xb78] sm:$0xf]  ;;  %v3667_v62 = vld [vmem:[%s4805_s25 + $0xba0] sm:$0xf] }
  0x9b   : > { %3664 = vst [vmem:[%s4810_s26 + $0x5b0] sm:$0xf] %v3663_v60  ;;  %3666 = vst [vmem:[%s4810_s26 + $0x5c4] sm:$0xf] %v3665_v61  ;;  %v3669_v63 = vld [vmem:[%s4805_s25 + $0xbc8] sm:$0xf] }
  0x9c   : > { %3668 = vst [vmem:[%s4810_s26 + $0x5d8] sm:$0xf] %v3667_v62  ;;  %v3671_v0 = vld [vmem:[%s4805_s25 + $0xbf0] sm:$0xf]  ;;  %v3673_v1 = vld [vmem:[%s4805_s25 + $0xc18] sm:$0xf] }
  0x9d   : > { %3670 = vst [vmem:[%s4810_s26 + $0x5ec] sm:$0xf] %v3669_v63  ;;  %3672 = vst [vmem:[%s4810_s26 + $0x600] sm:$0xf] %v3671_v0  ;;  %v3675_v2 = vld [vmem:[%s4805_s25 + $0xc40] sm:$0xf] }
  0x9e   : > { %3674 = vst [vmem:[%s4810_s26 + $0x614] sm:$0xf] %v3673_v1  ;;  %v3677_v3 = vld [vmem:[%s4805_s25 + $0xc68] sm:$0xf]  ;;  %v3679_v4 = vld [vmem:[%s4805_s25 + $0xc90] sm:$0xf] }
  0x9f   : > { %3676 = vst [vmem:[%s4810_s26 + $0x628] sm:$0xf] %v3675_v2  ;;  %3678 = vst [vmem:[%s4810_s26 + $0x63c] sm:$0xf] %v3677_v3  ;;  %v3681_v5 = vld [vmem:[%s4805_s25 + $0xcb8] sm:$0xf] }
  0xa0   : > { %3680 = vst [vmem:[%s4810_s26 + $0x650] sm:$0xf] %v3679_v4  ;;  %v3683_v6 = vld [vmem:[%s4805_s25 + $0xce0] sm:$0xf]  ;;  %v3685_v7 = vld [vmem:[%s4805_s25 + $0xd08] sm:$0xf] }
  0xa1   : > { %3682 = vst [vmem:[%s4810_s26 + $0x664] sm:$0xf] %v3681_v5  ;;  %3684 = vst [vmem:[%s4810_s26 + $0x678] sm:$0xf] %v3683_v6  ;;  %v3687_v8 = vld [vmem:[%s4805_s25 + $0xd30] sm:$0xf] }
  0xa2   : > { %3686 = vst [vmem:[%s4810_s26 + $0x68c] sm:$0xf] %v3685_v7  ;;  %v3689_v9 = vld [vmem:[%s4805_s25 + $0xd58] sm:$0xf]  ;;  %v3691_v10 = vld [vmem:[%s4805_s25 + $0xd80] sm:$0xf] }
  0xa3   : > { %3688 = vst [vmem:[%s4810_s26 + $0x6a0] sm:$0xf] %v3687_v8  ;;  %3690 = vst [vmem:[%s4810_s26 + $0x6b4] sm:$0xf] %v3689_v9  ;;  %v3693_v11 = vld [vmem:[%s4805_s25 + $0xda8] sm:$0xf] }
  0xa4   : > { %3692 = vst [vmem:[%s4810_s26 + $0x6c8] sm:$0xf] %v3691_v10  ;;  %v3695_v12 = vld [vmem:[%s4805_s25 + $0xdd0] sm:$0xf]  ;;  %v3697_v13 = vld [vmem:[%s4805_s25 + $0xdf8] sm:$0xf] }
  0xa5   : > { %3694 = vst [vmem:[%s4810_s26 + $0x6dc] sm:$0xf] %v3693_v11  ;;  %3696 = vst [vmem:[%s4810_s26 + $0x6f0] sm:$0xf] %v3695_v12 }
  0xa6   : > { %3698 = vst [vmem:[%s4810_s26 + $0x704] sm:$0xf] %v3697_v13 }
  0xa7 PF: > { %p3699_p5 = scmp.ge.s32.totalorder %s4745_s14, 1  ;;  %p704_p6 = scmp.lt.s32.totalorder %s4745_s14, 3 }
  0xa9   : > { %p705_p7 = pnand %p3699_p5, %p704_p6 }
  0xaa   : > { %s711_s27 = sand.u32 (!%p705_p7), 1, %s4737_s12   ;;  %s735_s9 = smul.u32 (!%p705_p7), 5, %s3514_s15 }
  0xab   : > { %708 = sbr.rel (%p705_p7) target bundleno = 661 (0x295), region = 54 }
  0xac   : > { %s4377_s28 = smul.u32 (!%p705_p7), 1800, %s711_s27  ;;  %p736_p8 = scmp.lt.s32.totalorder (!%p705_p7), %s735_s9, 9 }
  0xae   : > { %s5357_s29 = scalar_lea.vmem (!%p705_p7), [#allocation2], %s4377_s28 }
  0xb0   : > { %vm902_vm0 = vcmask 1044480   ;;  %vm903_vm1 = vcmask 1045504   ;;  %v4747_v14 = vmov 65535   ;;  %v4748_v16 = vmov 0   ;;  %v4413_v24 = vld [vmem:[%s5357_s29 + $0x7c] ss:$20 sps:$4 sm:$0xff]  }
  0xb1   : > { %v904_v15 = vsel %vm902_vm0, 4294967295, %v4747_v14  ;;  %953 = vmatprep.mubr.bf16.mxu0 %v4748_v16  ;;  %994 = vmatprep.mubr.bf16.mxu1 %v4748_v16  ;;  %v4407_v18 = vld [vmem:[%s5357_s29 + $0xa4] ss:$20 sps:$4 sm:$0x3f]   ;;  %v4418_v29 = vld [vmem:[%s5357_s29 + $0x80] ss:$20 sps:$4 sm:$0xff]  }
  0xb2   : > { %4406 = vset.pattern.permute.xlu0 %v4748_v16  ;;  %v5355_v17 = vsel %vm903_vm1, %v904_v15, 0  ;;  %v4409_v19 = vld [vmem:[%s5357_s29 + $0xac] ss:$20 sps:$4 sm:$0x3f]   ;;  %v4415_v27 = vld [vmem:[%s5357_s29 + $0x84] ss:$20 sps:$4 sm:$0xff]  }
  0xb3   : > { %v910_v20 = vand.u32 %v4407_v18, %v5355_v17  ;;  %v4411_v21 = vld [vmem:[%s5357_s29 + $0xa0] ss:$20 sps:$4 sm:$0x3f]   ;;  %v4412_v22 = vld [vmem:[%s5357_s29 + $0xa8] ss:$20 sps:$4 sm:$0x3f]   ;;  %v916_v23 = vand.u32 %v4409_v19, %v5355_v17 }
  0xb4   : > { %v907_v25 = vand.u32 %v4411_v21, %v5355_v17  ;;  %v913_v26 = vand.u32 %v4412_v22, %v5355_v17  ;;  %v4417_v28 = vld [vmem:[%s5357_s29 + $0x78] ss:$20 sps:$4 sm:$0xff]   ;;  %v4419_v30 = vld [vmem:[%s5357_s29 + $0x54] ss:$20 sps:$4 sm:$0xff]   ;;  %v4421_v31 = vld [vmem:[%s5357_s29 + $0x5c] ss:$20 sps:$4 sm:$0xff]  }
  0xb5   : > { %927 = vmatprep.subr.bf16.mxu0 %v910_v20  ;;  %968 = vmatprep.subr.bf16.mxu1 %v916_v23  ;;  %v4423_v32 = vld [vmem:[%s5357_s29 + $0x50] ss:$20 sps:$4 sm:$0xff]   ;;  %v4424_v33 = vld [vmem:[%s5357_s29 + $0x58] ss:$20 sps:$4 sm:$0xff]   ;;  %v4427_v35 = vld [vmem:[%s5357_s29 + $0x34] ss:$20 sps:$4 sm:$0xff]  }
  0xb6   : > { %928 = vmatpush1.bf16.msra.mxu0 %v907_v25  ;;  %969 = vmatpush1.bf16.msra.mxu1 %v913_v26  ;;  %v4425_v34 = vld [vmem:[%s5357_s29 + $0x2c] ss:$20 sps:$4 sm:$0xff]   ;;  %v4429_v36 = vld [vmem:[%s5357_s29 + $0x28] ss:$20 sps:$4 sm:$0xff]   ;;  %v4430_v37 = vld [vmem:[%s5357_s29 + $0x30] ss:$20 sps:$4 sm:$0xff]  }
  0xb7   : > { %929 = vmatprep.subr.bf16.mxu0 %v4413_v24  ;;  %970 = vmatprep.subr.bf16.mxu1 %v4415_v27  ;;  %v4431_v38 = vld [vmem:[%s5357_s29 + $0x4] ss:$20 sps:$4 sm:$0xff]   ;;  %v4433_v39 = vld [vmem:[%s5357_s29 + $0xc] ss:$20 sps:$4 sm:$0xff]   ;;  %v4436_v42 = vld [vmem:[%s5357_s29 + $0x8] ss:$20 sps:$4 sm:$0xff]  }
  0xb8   : > { %v4439_v40 = vld [vmem:[%s5357_s29 + $0x16c] ss:$20 sps:$4 sm:$0x3f]   ;;  %v4437_v43 = vld [vmem:[%s5357_s29 + $0x168] ss:$20 sps:$4 sm:$0x3f]  }
  0xb9   : > { %v4435_v41 = vld [vmem:[%s5357_s29] ss:$20 sps:$4 sm:$0xff]   ;;  %v4440_v44 = vld [vmem:[%s5357_s29 + $0xb0] ss:$20 sps:$4 sm:$0x3f]   ;;  %v1203_v45 = vand.u32 %v4439_v40, %v5355_v17  ;;  %vm898_vm2 = vcmask 613376   ;;  %v1200_v48 = vand.u32 %v4437_v43, %v5355_v17 }
  0xba   : > { %930 = vmatpush1.bf16.msra.mxu0 %v4417_v28  ;;  %971 = vmatpush1.bf16.msra.mxu1 %v4418_v29  ;;  %v5390_v46 = vld [vmem:[%s5827_s1] sm:$0xf]  ;;  %v919_v47 = vand.u32 %v4440_v44, %v5355_v17  ;;  %v4749_v49 = vmov 0.0   ;;  %v4444_v52 = vld [vmem:[%s5357_s29 + $0x88] ss:$20 sps:$4 sm:$0xff]   ;;  %vm4750_vm3 = vmmov 0  }
  0xbb   : > { %931 = vmatprep.subr.bf16.mxu0 %v4419_v30  ;;  %972 = vmatprep.subr.bf16.mxu1 %v4421_v31  ;;  %v4443_v50 = vld [vmem:[%s5357_s29 + $0x144] ss:$20 sps:$4 sm:$0xff]   ;;  %v4441_v51 = vld [vmem:[%s5357_s29 + $0x140] ss:$20 sps:$4 sm:$0xff]   ;;  %v4447_v53 = vld [vmem:[%s5357_s29 + $0x11c] ss:$20 sps:$4 sm:$0xff]  }
  0xbc   : > { %v4445_v54 = vld [vmem:[%s5357_s29 + $0x118] ss:$20 sps:$4 sm:$0xff]   ;;  %v4448_v55 = vld [vmem:[%s5357_s29 + $0x60] ss:$20 sps:$4 sm:$0xff]   ;;  %v4449_v57 = vld [vmem:[%s5357_s29 + $0xf0] ss:$20 sps:$4 sm:$0xff]  }
  0xbd   : > { %v4451_v56 = vld [vmem:[%s5357_s29 + $0xf4] ss:$20 sps:$4 sm:$0xff]   ;;  %v4452_v58 = vld [vmem:[%s5357_s29 + $0x38] ss:$20 sps:$4 sm:$0xff]   ;;  %v4456_v62 = vld [vmem:[%s5357_s29 + $0x10] ss:$20 sps:$4 sm:$0xff]  }
  0xbe   : > { %932 = vmatpush1.bf16.msra.mxu0 %v4423_v32  ;;  %973 = vmatpush1.bf16.msra.mxu1 %v4424_v33  ;;  %v4455_v59 = vld [vmem:[%s5357_s29 + $0xcc] ss:$20 sps:$4 sm:$0xff]   ;;  %v4459_v60 = vld [vmem:[%s5357_s29 + $0x174] ss:$20 sps:$4 sm:$0x3f]   ;;  %s5834_s9 = smov (!%p736_p8, %s735_s9), 9 }
  0xbf   : > { %933 = vmatprep.subr.bf16.mxu0 %v4425_v34  ;;  %974 = vmatprep.subr.bf16.mxu1 %v4427_v35  ;;  %v4453_v61 = vld [vmem:[%s5357_s29 + $0xc8] ss:$20 sps:$4 sm:$0xff]   ;;  %v4457_v63 = vld [vmem:[%s5357_s29 + $0x170] ss:$20 sps:$4 sm:$0x3f]   ;;  %v1209_v1 = vand.u32 %v4459_v60, %v5355_v17  ;;  %s3700_s10 = sshll.u32 %s5834_s9, 3 }
  0xc0   : > { %v4460_v0 = vld [vmem:[%s5357_s29 + $0x178] ss:$20 sps:$4 sm:$0x3f]   ;;  %v1206_v2 = vand.u32 %v4457_v63, %v5355_v17  ;;  %v4461_v5 = vld [vmem:[%s5357_s29 + $0x148] ss:$20 sps:$4 sm:$0xff]   ;;  %s739_s14 = scalar_lea.vmem %s5829_s3, %s3700_s10 }
  0xc1   : > { %v1212_v3 = vand.u32 %v4460_v0, %v5355_v17  ;;  %v4463_v4 = vld [vmem:[%s5357_s29 + $0x14c] ss:$20 sps:$4 sm:$0xff]   ;;  %v4464_v6 = vld [vmem:[%s5357_s29 + $0x150] ss:$20 sps:$4 sm:$0xff]   ;;  %v4468_v9 = vld [vmem:[%s5357_s29 + $0x128] ss:$20 sps:$4 sm:$0xff]  }
  0xc2   : > { %934 = vmatpush1.bf16.msra.mxu0 %v4429_v36  ;;  %975 = vmatpush1.bf16.msra.mxu1 %v4430_v37  ;;  %v4467_v7 = vld [vmem:[%s5357_s29 + $0x124] ss:$20 sps:$4 sm:$0xff]   ;;  %v4465_v8 = vld [vmem:[%s5357_s29 + $0x120] ss:$20 sps:$4 sm:$0xff]   ;;  %v4471_v10 = vld [vmem:[%s5357_s29 + $0xfc] ss:$20 sps:$4 sm:$0xff]  }
  0xc3   : > { %935 = vmatprep.subr.bf16.mxu0 %v4431_v38  ;;  %976 = vmatprep.subr.bf16.mxu1 %v4433_v39  ;;  %v4469_v11 = vld [vmem:[%s5357_s29 + $0xf8] ss:$20 sps:$4 sm:$0xff]   ;;  %v4472_v12 = vld [vmem:[%s5357_s29 + $0x100] ss:$20 sps:$4 sm:$0xff]   ;;  %v4473_v18 = vld [vmem:[%s5357_s29 + $0xd0] ss:$20 sps:$4 sm:$0xff]  }
  0xc4   : > { %v4475_v13 = vld [vmem:[%s5357_s29 + $0xd4] ss:$20 sps:$4 sm:$0xff]   ;;  %v4482_v15 = vld [vmem:[%s5357_s29 + $0x23c] ss:$20 sps:$4 sm:$0x3f]  }
  0xc5   : > { %v4479_v14 = vld [vmem:[%s5357_s29 + $0x234] ss:$20 sps:$4 sm:$0x3f]   ;;  %v4477_v19 = vld [vmem:[%s5357_s29 + $0x230] ss:$20 sps:$4 sm:$0x3f]   ;;  %v1507_v23 = vand.u32 %v4482_v15, %v5355_v17 }
  0xc6   : > { %936 = vmatpush1.bf16.msra.mxu0 %v4435_v41  ;;  %977 = vmatpush1.bf16.msra.mxu1 %v4436_v42  ;;  %v4476_v20 = vld [vmem:[%s5357_s29 + $0xd8] ss:$20 sps:$4 sm:$0xff]   ;;  %v1501_v22 = vand.u32 %v4479_v14, %v5355_v17  ;;  %v1498_v24 = vand.u32 %v4477_v19, %v5355_v17  ;;  %v4488_v27 = vld [vmem:[%s5357_s29 + $0x214] ss:$20 sps:$4 sm:$0xff]   ;;  %v4486_v29 = vld [vmem:[%s5357_s29 + $0x210] ss:$20 sps:$4 sm:$0xff]  }
  0xc7   : > { %4250 = vmatprep.subr.bf16.mxu0 %v4749_v49  ;;  %1220 = vmatprep.subr.bf16.mxu1 %v1203_v45  ;;  %v4480_v21 = vld [vmem:[%s5357_s29 + $0x238] ss:$20 sps:$4 sm:$0x3f]   ;;  %v4483_v28 = vld [vmem:[%s5357_s29 + $0x208] ss:$20 sps:$4 sm:$0xff]  }
  0xc8   : > { %v1504_v25 = vand.u32 %v4480_v21, %v5355_v17  ;;  %v4485_v26 = vld [vmem:[%s5357_s29 + $0x20c] ss:$20 sps:$4 sm:$0xff]   ;;  %v4491_v30 = vld [vmem:[%s5357_s29 + $0x1e4] ss:$20 sps:$4 sm:$0xff]   ;;  %v4492_v33 = vld [vmem:[%s5357_s29 + $0x1e8] ss:$20 sps:$4 sm:$0xff]  }
  0xc9   : > { %3726 = vmatmul.mubr.msk.bf16.vlgmr.msra.gmra.mxu0 %vm898_vm2, %v5390_v46  ;;  %3727 = vmatmul.mubr.msk.bf16.vlgmr.msra.gmra.mxu1 %vm898_vm2, %v5390_v46  ;;  %v4494_v31 = vld [vmem:[%s5357_s29 + $0x1ec] ss:$20 sps:$4 sm:$0xff]   ;;  %v4497_v34 = vld [vmem:[%s5357_s29 + $0x1bc] ss:$20 sps:$4 sm:$0xff]   ;;  %v4500_v35 = vld [vmem:[%s5357_s29 + $0x1c4] ss:$20 sps:$4 sm:$0xff]  }
  0xca   : > { %4251 = vmatpush3.bf16.msra.mxu0 %v919_v47  ;;  %1221 = vmatpush1.bf16.msra.mxu1 %v1200_v48  ;;  %v4489_v32 = vld [vmem:[%s5357_s29 + $0x1e0] ss:$20 sps:$4 sm:$0xff]   ;;  %v4495_v36 = vld [vmem:[%s5357_s29 + $0x1b8] ss:$20 sps:$4 sm:$0xff]   ;;  %v4506_v39 = vld [vmem:[%s5357_s29 + $0x19c] ss:$20 sps:$4 sm:$0xff]  }
  0xcb   : > { %4252 = vmatprep.subr.bf16.mxu0 %v4749_v49  ;;  %1222 = vmatprep.subr.bf16.mxu1 %v4443_v50  ;;  %v4498_v37 = vld [vmem:[%s5357_s29 + $0x1c0] ss:$20 sps:$4 sm:$0xff]   ;;  %v4509_v40 = vld [vmem:[%s5357_s29 + $0x2fc] ss:$20 sps:$4 sm:$0x3f]  }
  0xcc   : > { %4260 = vmatprep.mubr.msk.bf16.mxu0 %vm4750_vm3, %v4749_v49  ;;  %1246 = vmatprep.mubr.bf16.mxu1 %v4748_v16  ;;  %v4503_v38 = vld [vmem:[%s5357_s29 + $0x194] ss:$20 sps:$4 sm:$0xff]   ;;  %v4501_v41 = vld [vmem:[%s5357_s29 + $0x190] ss:$20 sps:$4 sm:$0xff]   ;;  %v4504_v43 = vld [vmem:[%s5357_s29 + $0x198] ss:$20 sps:$4 sm:$0xff]   ;;  %v1799_v45 = vand.u32 %v4509_v40, %v5355_v17 }
  0xcd   : > { %v4507_v42 = vld [vmem:[%s5357_s29 + $0x2f8] ss:$20 sps:$4 sm:$0x3f]   ;;  %v4510_v44 = vld [vmem:[%s5357_s29 + $0x240] ss:$20 sps:$4 sm:$0x3f]  }
  0xce   : > { %4253 = vmatpush3.bf16.msra.mxu0 %v4444_v52  ;;  %1223 = vmatpush1.bf16.msra.mxu1 %v4441_v51  ;;  %v1510_v47 = vand.u32 %v4510_v44, %v5355_v17  ;;  %v1796_v48 = vand.u32 %v4507_v42, %v5355_v17  ;;  %v4513_v50 = vld [vmem:[%s5357_s29 + $0x2d4] ss:$20 sps:$4 sm:$0xff]   ;;  %v4511_v51 = vld [vmem:[%s5357_s29 + $0x2d0] ss:$20 sps:$4 sm:$0xff]   ;;  %v4514_v52 = vld [vmem:[%s5357_s29 + $0x218] ss:$20 sps:$4 sm:$0xff]  }
  0xcf   : > { %4254 = vmatprep.subr.bf16.mxu0 %v4749_v49  ;;  %1224 = vmatprep.subr.bf16.mxu1 %v4447_v53  ;;  %v4517_v53 = vld [vmem:[%s5357_s29 + $0x2ac] ss:$20 sps:$4 sm:$0xff]   ;;  %v4529_v60 = vld [vmem:[%s5357_s29 + $0x304] ss:$20 sps:$4 sm:$0x3f]  }
  0xd0   : > { %v4527_v63 = vld [vmem:[%s5357_s29 + $0x300] ss:$20 sps:$4 sm:$0x3f]   ;;  %v4530_v0 = vld [vmem:[%s5357_s29 + $0x308] ss:$20 sps:$4 sm:$0x3f]  }
  0xd1   : > { %v4545_v14 = vld [vmem:[%s5357_s29 + $0x264] ss:$20 sps:$4 sm:$0xff]   ;;  %v4552_v15 = vld [vmem:[%s5357_s29 + $0x3cc] ss:$20 sps:$4 sm:$0x3f]  }
  0xd2   : > { %4255 = vmatpush3.bf16.msra.mxu0 %v4448_v55  ;;  %1225 = vmatpush1.bf16.msra.mxu1 %v4445_v54  ;;  %v4515_v54 = vld [vmem:[%s5357_s29 + $0x2a8] ss:$20 sps:$4 sm:$0xff]   ;;  %v4518_v55 = vld [vmem:[%s5357_s29 + $0x1f0] ss:$20 sps:$4 sm:$0xff]  }
  0xd3   : > { %4256 = vmatprep.subr.bf16.mxu0 %v4749_v49  ;;  %1226 = vmatprep.subr.bf16.mxu1 %v4451_v56  ;;  %v4521_v56 = vld [vmem:[%s5357_s29 + $0x284] ss:$20 sps:$4 sm:$0xff]   ;;  %v4546_v19 = vld [vmem:[%s5357_s29 + $0x268] ss:$20 sps:$4 sm:$0xff]  }
  0xd4   : > { %v4550_v21 = vld [vmem:[%s5357_s29 + $0x3c8] ss:$20 sps:$4 sm:$0x3f]   ;;  %v4579_v40 = vld [vmem:[%s5357_s29 + $0x48c] ss:$20 sps:$4 sm:$0x3f]  }
  0xd5   : > { %v4574_v42 = vld [vmem:[%s5357_s29 + $0x328] ss:$20 sps:$4 sm:$0xff]   ;;  %v4580_v44 = vld [vmem:[%s5357_s29 + $0x3d0] ss:$20 sps:$4 sm:$0x3f]  }
  0xd6   : > { %4257 = vmatpush3.bf16.msra.mxu0 %v4452_v58  ;;  %1227 = vmatpush1.bf16.msra.mxu1 %v4449_v57  ;;  %v4519_v57 = vld [vmem:[%s5357_s29 + $0x280] ss:$20 sps:$4 sm:$0xff]   ;;  %v4522_v58 = vld [vmem:[%s5357_s29 + $0x1c8] ss:$20 sps:$4 sm:$0xff]  }
  0xd7   : > { %4258 = vmatprep.subr.bf16.mxu0 %v4749_v49  ;;  %1228 = vmatprep.subr.bf16.mxu1 %v4455_v59  ;;  %v4525_v59 = vld [vmem:[%s5357_s29 + $0x25c] ss:$20 sps:$4 sm:$0xff]  }
  0xda   : > { %4259 = vmatpush3.bf16.msra.mxu0 %v4456_v62  ;;  %1229 = vmatpush1.bf16.msra.mxu1 %v4453_v61  ;;  %v4523_v61 = vld [vmem:[%s5357_s29 + $0x258] ss:$20 sps:$4 sm:$0xff]   ;;  %v4526_v62 = vld [vmem:[%s5357_s29 + $0x1a0] ss:$20 sps:$4 sm:$0xff]  }
  0xdb   : > { %1261 = vmatprep.subr.bf16.mxu0 %v1209_v1  ;;  %4264 = vmatprep.subr.bf16.mxu1 %v4749_v49  ;;  %v1805_v1 = vand.u32 %v4529_v60, %v5355_v17  ;;  %v4593_v60 = vld [vmem:[%s5357_s29 + $0x3e8] ss:$20 sps:$4 sm:$0xff]  }
  0xdd   : > { %4261 = vmatmul.mubr.msk.bf16.vlgmr.msra.gmra.mxu0 %vm898_vm2, %v5390_v46  ;;  %3784 = vmatmul.mubr.msk.bf16.vlgmr.msra.gmra.mxu1 %vm898_vm2, %v5390_v46 }
  0xde   : > { %1262 = vmatpush1.bf16.msra.mxu0 %v1206_v2  ;;  %4265 = vmatpush3.bf16.msra.mxu1 %v1212_v3  ;;  %v1802_v2 = vand.u32 %v4527_v63, %v5355_v17  ;;  %v1808_v3 = vand.u32 %v4530_v0, %v5355_v17  ;;  %v4600_v63 = vld [vmem:[%s5357_s29 + $0x498] ss:$20 sps:$4 sm:$0x3f]  }
  0xdf   : > { %1263 = vmatprep.subr.bf16.mxu0 %v4463_v4  ;;  %4266 = vmatprep.subr.bf16.mxu1 %v4749_v49  ;;  %v4533_v4 = vld [vmem:[%s5357_s29 + $0x2dc] ss:$20 sps:$4 sm:$0xff]  }
  0xe0   : > { %1287 = vmatprep.mubr.bf16.mxu0 %v4748_v16  ;;  %4274 = vmatprep.mubr.msk.bf16.mxu1 %vm4750_vm3, %v4749_v49 }
  0xe2   : > { %1264 = vmatpush1.bf16.msra.mxu0 %v4461_v5  ;;  %4267 = vmatpush3.bf16.msra.mxu1 %v4464_v6  ;;  %v4531_v5 = vld [vmem:[%s5357_s29 + $0x2d8] ss:$20 sps:$4 sm:$0xff]   ;;  %v4534_v6 = vld [vmem:[%s5357_s29 + $0x2e0] ss:$20 sps:$4 sm:$0xff]  }
  0xe3   : > { %1265 = vmatprep.subr.bf16.mxu0 %v4467_v7  ;;  %4268 = vmatprep.subr.bf16.mxu1 %v4749_v49  ;;  %v4537_v7 = vld [vmem:[%s5357_s29 + $0x2b4] ss:$20 sps:$4 sm:$0xff]  }
  0xe6   : > { %1266 = vmatpush1.bf16.msra.mxu0 %v4465_v8  ;;  %4269 = vmatpush3.bf16.msra.mxu1 %v4468_v9  ;;  %v4535_v8 = vld [vmem:[%s5357_s29 + $0x2b0] ss:$20 sps:$4 sm:$0xff]   ;;  %v4538_v9 = vld [vmem:[%s5357_s29 + $0x2b8] ss:$20 sps:$4 sm:$0xff]  }
  0xe7   : > { %1267 = vmatprep.subr.bf16.mxu0 %v4471_v10  ;;  %4270 = vmatprep.subr.bf16.mxu1 %v4749_v49  ;;  %v4541_v10 = vld [vmem:[%s5357_s29 + $0x28c] ss:$20 sps:$4 sm:$0xff]  }
  0xea   : > { %1268 = vmatpush1.bf16.msra.mxu0 %v4469_v11  ;;  %4271 = vmatpush3.bf16.msra.mxu1 %v4472_v12  ;;  %v4539_v11 = vld [vmem:[%s5357_s29 + $0x288] ss:$20 sps:$4 sm:$0xff]   ;;  %v4542_v12 = vld [vmem:[%s5357_s29 + $0x290] ss:$20 sps:$4 sm:$0xff]  }
  0xeb   : > { %1269 = vmatprep.subr.bf16.mxu0 %v4475_v13  ;;  %4272 = vmatprep.subr.bf16.mxu1 %v4749_v49  ;;  %v4549_v13 = vld [vmem:[%s5357_s29 + $0x3c4] ss:$20 sps:$4 sm:$0x3f]  }
  0xee   : > { %1270 = vmatpush1.bf16.msra.mxu0 %v4473_v18  ;;  %4273 = vmatpush3.bf16.msra.mxu1 %v4476_v20  ;;  %v4543_v18 = vld [vmem:[%s5357_s29 + $0x260] ss:$20 sps:$4 sm:$0xff]  }
  0xef   : > { %1518 = vmatprep.subr.bf16.mxu0 %v1501_v22  ;;  %1559 = vmatprep.subr.bf16.mxu1 %v1507_v23  ;;  %v4547_v20 = vld [vmem:[%s5357_s29 + $0x3c0] ss:$20 sps:$4 sm:$0x3f]   ;;  %v2097_v22 = vand.u32 %v4549_v13, %v5355_v17  ;;  %v2103_v23 = vand.u32 %v4552_v15, %v5355_v17  ;;  %v4622_v15 = vld [vmem:[%s5357_s29 + $0x55c] ss:$20 sps:$4 sm:$0x3f]  }
  0xf0   : > { %v4615_v13 = vld [vmem:[%s5357_s29 + $0x3f4] ss:$20 sps:$4 sm:$0xff]  }
  0xf1   : > { %3785 = vmatmul.mubr.msk.bf16.vlgmr.msra.gmra.mxu0 %vm898_vm2, %v5390_v46  ;;  %4275 = vmatmul.mubr.msk.bf16.vlgmr.msra.gmra.mxu1 %vm898_vm2, %v5390_v46 }
  0xf2   : > { %1519 = vmatpush1.bf16.msra.mxu0 %v1498_v24  ;;  %1560 = vmatpush1.bf16.msra.mxu1 %v1504_v25  ;;  %v2094_v24 = vand.u32 %v4547_v20, %v5355_v17  ;;  %v2100_v25 = vand.u32 %v4550_v21, %v5355_v17  ;;  %v4617_v20 = vld [vmem:[%s5357_s29 + $0x550] ss:$20 sps:$4 sm:$0x3f]   ;;  %v4620_v21 = vld [vmem:[%s5357_s29 + $0x558] ss:$20 sps:$4 sm:$0x3f]  }
  0xf3   : > { %1520 = vmatprep.subr.bf16.mxu0 %v4485_v26  ;;  %1561 = vmatprep.subr.bf16.mxu1 %v4488_v27  ;;  %v4555_v26 = vld [vmem:[%s5357_s29 + $0x39c] ss:$20 sps:$4 sm:$0xff]   ;;  %v4558_v27 = vld [vmem:[%s5357_s29 + $0x3a4] ss:$20 sps:$4 sm:$0xff]  }
  0xf4   : > { %1544 = vmatprep.mubr.bf16.mxu0 %v4748_v16  ;;  %1585 = vmatprep.mubr.bf16.mxu1 %v4748_v16 }
  0xf6   : > { %1521 = vmatpush1.bf16.msra.mxu0 %v4483_v28  ;;  %1562 = vmatpush1.bf16.msra.mxu1 %v4486_v29  ;;  %v4553_v28 = vld [vmem:[%s5357_s29 + $0x398] ss:$20 sps:$4 sm:$0xff]   ;;  %v4556_v29 = vld [vmem:[%s5357_s29 + $0x3a0] ss:$20 sps:$4 sm:$0xff]  }
  0xf7   : > { %1522 = vmatprep.subr.bf16.mxu0 %v4491_v30  ;;  %1563 = vmatprep.subr.bf16.mxu1 %v4494_v31  ;;  %v4561_v30 = vld [vmem:[%s5357_s29 + $0x374] ss:$20 sps:$4 sm:$0xff]   ;;  %v4564_v31 = vld [vmem:[%s5357_s29 + $0x37c] ss:$20 sps:$4 sm:$0xff]  }
  0xfa   : > { %1523 = vmatpush1.bf16.msra.mxu0 %v4489_v32  ;;  %1564 = vmatpush1.bf16.msra.mxu1 %v4492_v33  ;;  %v4559_v32 = vld [vmem:[%s5357_s29 + $0x370] ss:$20 sps:$4 sm:$0xff]   ;;  %v4562_v33 = vld [vmem:[%s5357_s29 + $0x378] ss:$20 sps:$4 sm:$0xff]  }
  0xfb   : > { %1524 = vmatprep.subr.bf16.mxu0 %v4497_v34  ;;  %1565 = vmatprep.subr.bf16.mxu1 %v4500_v35  ;;  %v4567_v34 = vld [vmem:[%s5357_s29 + $0x34c] ss:$20 sps:$4 sm:$0xff]   ;;  %v4570_v35 = vld [vmem:[%s5357_s29 + $0x354] ss:$20 sps:$4 sm:$0xff]  }
  0xfe   : > { %1525 = vmatpush1.bf16.msra.mxu0 %v4495_v36  ;;  %1566 = vmatpush1.bf16.msra.mxu1 %v4498_v37  ;;  %v4565_v36 = vld [vmem:[%s5357_s29 + $0x348] ss:$20 sps:$4 sm:$0xff]   ;;  %v4568_v37 = vld [vmem:[%s5357_s29 + $0x350] ss:$20 sps:$4 sm:$0xff]  }
  0xff   : > { %1526 = vmatprep.subr.bf16.mxu0 %v4503_v38  ;;  %1567 = vmatprep.subr.bf16.mxu1 %v4506_v39  ;;  %v4573_v38 = vld [vmem:[%s5357_s29 + $0x324] ss:$20 sps:$4 sm:$0xff]   ;;  %v4576_v39 = vld [vmem:[%s5357_s29 + $0x32c] ss:$20 sps:$4 sm:$0xff]  }
 0x102   : > { %1527 = vmatpush1.bf16.msra.mxu0 %v4501_v41  ;;  %1568 = vmatpush1.bf16.msra.mxu1 %v4504_v43  ;;  %v4571_v41 = vld [vmem:[%s5357_s29 + $0x320] ss:$20 sps:$4 sm:$0xff]   ;;  %v4577_v43 = vld [vmem:[%s5357_s29 + $0x488] ss:$20 sps:$4 sm:$0x3f]  }
 0x103   : > { %4278 = vmatprep.subr.bf16.mxu0 %v4749_v49  ;;  %1816 = vmatprep.subr.bf16.mxu1 %v1799_v45  ;;  %v2395_v45 = vand.u32 %v4579_v40, %v5355_v17  ;;  %v4649_v40 = vld [vmem:[%s5357_s29 + $0x61c] ss:$20 sps:$4 sm:$0x3f]  }
 0x105   : > { %3842 = vmatmul.mubr.msk.bf16.vlgmr.msra.gmra.mxu0 %vm898_vm2, %v5390_v46  ;;  %3843 = vmatmul.mubr.msk.bf16.vlgmr.msra.gmra.mxu1 %vm898_vm2, %v5390_v46 }
 0x106   : > { %4279 = vmatpush3.bf16.msra.mxu0 %v1510_v47  ;;  %1817 = vmatpush1.bf16.msra.mxu1 %v1796_v48  ;;  %v2106_v47 = vand.u32 %v4580_v44, %v5355_v17  ;;  %v2392_v48 = vand.u32 %v4577_v43, %v5355_v17  ;;  %v4644_v43 = vld [vmem:[%s5357_s29 + $0x4b8] ss:$20 sps:$4 sm:$0xff]  }
 0x107   : > { %4280 = vmatprep.subr.bf16.mxu0 %v4749_v49  ;;  %1818 = vmatprep.subr.bf16.mxu1 %v4513_v50  ;;  %v4583_v50 = vld [vmem:[%s5357_s29 + $0x464] ss:$20 sps:$4 sm:$0xff]  }
 0x108   : > { %4288 = vmatprep.mubr.msk.bf16.mxu0 %vm4750_vm3, %v4749_v49  ;;  %1842 = vmatprep.mubr.bf16.mxu1 %v4748_v16  ;;  %v4647_v44 = vld [vmem:[%s5357_s29 + $0x618] ss:$20 sps:$4 sm:$0x3f]  }
 0x10a   : > { %4281 = vmatpush3.bf16.msra.mxu0 %v4514_v52  ;;  %1819 = vmatpush1.bf16.msra.mxu1 %v4511_v51  ;;  %v4581_v51 = vld [vmem:[%s5357_s29 + $0x460] ss:$20 sps:$4 sm:$0xff]   ;;  %v4584_v52 = vld [vmem:[%s5357_s29 + $0x3a8] ss:$20 sps:$4 sm:$0xff]  }
 0x10b   : > { %4282 = vmatprep.subr.bf16.mxu0 %v4749_v49  ;;  %1820 = vmatprep.subr.bf16.mxu1 %v4517_v53  ;;  %v4587_v53 = vld [vmem:[%s5357_s29 + $0x43c] ss:$20 sps:$4 sm:$0xff]  }
 0x10e   : > { %4283 = vmatpush3.bf16.msra.mxu0 %v4518_v55  ;;  %1821 = vmatpush1.bf16.msra.mxu1 %v4515_v54  ;;  %v4588_v54 = vld [vmem:[%s5357_s29 + $0x380] ss:$20 sps:$4 sm:$0xff]  }
 0x10f   : > { %4284 = vmatprep.subr.bf16.mxu0 %v4749_v49  ;;  %1822 = vmatprep.subr.bf16.mxu1 %v4521_v56  ;;  %v4591_v55 = vld [vmem:[%s5357_s29 + $0x414] ss:$20 sps:$4 sm:$0xff]   ;;  %v4589_v56 = vld [vmem:[%s5357_s29 + $0x410] ss:$20 sps:$4 sm:$0xff]  }
 0x112   : > { %4285 = vmatpush3.bf16.msra.mxu0 %v4522_v58  ;;  %1823 = vmatpush1.bf16.msra.mxu1 %v4519_v57  ;;  %v4592_v57 = vld [vmem:[%s5357_s29 + $0x358] ss:$20 sps:$4 sm:$0xff]  }
 0x113   : > { %4286 = vmatprep.subr.bf16.mxu0 %v4749_v49  ;;  %1824 = vmatprep.subr.bf16.mxu1 %v4525_v59  ;;  %v4595_v58 = vld [vmem:[%s5357_s29 + $0x3ec] ss:$20 sps:$4 sm:$0xff]   ;;  %v4599_v59 = vld [vmem:[%s5357_s29 + $0x494] ss:$20 sps:$4 sm:$0x3f]  }
 0x114   : > { %v2401_v0 = vand.u32 %v4599_v59, %v5355_v17  ;;  %v4665_v59 = vld [vmem:[%s5357_s29 + $0x57c] ss:$20 sps:$4 sm:$0xff]  }
 0x116   : > { %4287 = vmatpush3.bf16.msra.mxu0 %v4526_v62  ;;  %1825 = vmatpush1.bf16.msra.mxu1 %v4523_v61  ;;  %v4596_v61 = vld [vmem:[%s5357_s29 + $0x330] ss:$20 sps:$4 sm:$0xff]  }
 0x117   : > { %1857 = vmatprep.subr.bf16.mxu0 %v1805_v1  ;;  %4292 = vmatprep.subr.bf16.mxu1 %v4749_v49  ;;  %v4597_v62 = vld [vmem:[%s5357_s29 + $0x490] ss:$20 sps:$4 sm:$0x3f]  }
 0x118   : > { %v2398_v1 = vand.u32 %v4597_v62, %v5355_v17  ;;  %v4663_v62 = vld [vmem:[%s5357_s29 + $0x578] ss:$20 sps:$4 sm:$0xff]  }
 0x119   : > { %4289 = vmatmul.mubr.msk.bf16.vlgmr.msra.gmra.mxu0 %vm898_vm2, %v5390_v46  ;;  %3900 = vmatmul.mubr.msk.bf16.vlgmr.msra.gmra.mxu1 %vm898_vm2, %v5390_v46 }
 0x11a   : > { %1858 = vmatpush1.bf16.msra.mxu0 %v1802_v2  ;;  %4293 = vmatpush3.bf16.msra.mxu1 %v1808_v3  ;;  %v2404_v2 = vand.u32 %v4600_v63, %v5355_v17  ;;  %v4603_v3 = vld [vmem:[%s5357_s29 + $0x46c] ss:$20 sps:$4 sm:$0xff]  }
 0x11b   : > { %1859 = vmatprep.subr.bf16.mxu0 %v4533_v4  ;;  %4294 = vmatprep.subr.bf16.mxu1 %v4749_v49  ;;  %v5609_v4 = vld [vmem:[%s5827_s1] sm:$0xf] }
 0x11c   : > { %1883 = vmatprep.mubr.bf16.mxu0 %v4748_v16  ;;  %4302 = vmatprep.mubr.msk.bf16.mxu1 %vm4750_vm3, %v4749_v49  ;;  %v4666_v63 = vld [vmem:[%s5357_s29 + $0x4c0] ss:$20 sps:$4 sm:$0xff]  }
 0x11e   : > { %1860 = vmatpush1.bf16.msra.mxu0 %v4531_v5  ;;  %4295 = vmatpush3.bf16.msra.mxu1 %v4534_v6  ;;  %v4601_v5 = vld [vmem:[%s5357_s29 + $0x468] ss:$20 sps:$4 sm:$0xff]   ;;  %v4604_v6 = vld [vmem:[%s5357_s29 + $0x470] ss:$20 sps:$4 sm:$0xff]  }
 0x11f   : > { %1861 = vmatprep.subr.bf16.mxu0 %v4537_v7  ;;  %4296 = vmatprep.subr.bf16.mxu1 %v4749_v49  ;;  %v4607_v7 = vld [vmem:[%s5357_s29 + $0x444] ss:$20 sps:$4 sm:$0xff]  }
 0x122   : > { %1862 = vmatpush1.bf16.msra.mxu0 %v4535_v8  ;;  %4297 = vmatpush3.bf16.msra.mxu1 %v4538_v9  ;;  %v4605_v8 = vld [vmem:[%s5357_s29 + $0x440] ss:$20 sps:$4 sm:$0xff]   ;;  %v4608_v9 = vld [vmem:[%s5357_s29 + $0x448] ss:$20 sps:$4 sm:$0xff]  }
 0x123   : > { %1863 = vmatprep.subr.bf16.mxu0 %v4541_v10  ;;  %4298 = vmatprep.subr.bf16.mxu1 %v4749_v49  ;;  %v4611_v10 = vld [vmem:[%s5357_s29 + $0x41c] ss:$20 sps:$4 sm:$0xff]  }
 0x126   : > { %1864 = vmatpush1.bf16.msra.mxu0 %v4539_v11  ;;  %4299 = vmatpush3.bf16.msra.mxu1 %v4542_v12  ;;  %v4609_v11 = vld [vmem:[%s5357_s29 + $0x418] ss:$20 sps:$4 sm:$0xff]   ;;  %v4612_v12 = vld [vmem:[%s5357_s29 + $0x420] ss:$20 sps:$4 sm:$0xff]  }
 0x127   : > { %1865 = vmatprep.subr.bf16.mxu0 %v4545_v14  ;;  %4300 = vmatprep.subr.bf16.mxu1 %v4749_v49  ;;  %v4619_v14 = vld [vmem:[%s5357_s29 + $0x554] ss:$20 sps:$4 sm:$0x3f]  }
 0x12a   : > { %1866 = vmatpush1.bf16.msra.mxu0 %v4543_v18  ;;  %4301 = vmatpush3.bf16.msra.mxu1 %v4546_v19  ;;  %v4613_v18 = vld [vmem:[%s5357_s29 + $0x3f0] ss:$20 sps:$4 sm:$0xff]   ;;  %v4616_v19 = vld [vmem:[%s5357_s29 + $0x3f8] ss:$20 sps:$4 sm:$0xff]  }
 0x12b   : > { %2114 = vmatprep.subr.bf16.mxu0 %v2097_v22  ;;  %2155 = vmatprep.subr.bf16.mxu1 %v2103_v23  ;;  %v2693_v22 = vand.u32 %v4619_v14, %v5355_v17  ;;  %v2699_v23 = vand.u32 %v4622_v15, %v5355_v17  ;;  %v4671_v14 = vld [vmem:[%s5357_s29 + $0x5f8] ss:$20 sps:$4 sm:$0xff]   ;;  %v4674_v15 = vld [vmem:[%s5357_s29 + $0x600] ss:$20 sps:$4 sm:$0xff]  }
 0x12d   : > { %3901 = vmatmul.mubr.msk.bf16.vlgmr.msra.gmra.mxu0 %vm898_vm2, %v5390_v46  ;;  %4303 = vmatmul.mubr.msk.bf16.vlgmr.msra.gmra.mxu1 %vm898_vm2, %v5390_v46 }
 0x12e   : > { %2115 = vmatpush1.bf16.msra.mxu0 %v2094_v24  ;;  %2156 = vmatpush1.bf16.msra.mxu1 %v2100_v25  ;;  %v2690_v24 = vand.u32 %v4617_v20, %v5355_v17  ;;  %v2696_v25 = vand.u32 %v4620_v21, %v5355_v17  ;;  %v4678_v20 = vld [vmem:[%s5357_s29 + $0x5d8] ss:$20 sps:$4 sm:$0xff]  }
 0x12f   : > { %2116 = vmatprep.subr.bf16.mxu0 %v4555_v26  ;;  %2157 = vmatprep.subr.bf16.mxu1 %v4558_v27  ;;  %v4625_v26 = vld [vmem:[%s5357_s29 + $0x52c] ss:$20 sps:$4 sm:$0xff]   ;;  %v4628_v27 = vld [vmem:[%s5357_s29 + $0x534] ss:$20 sps:$4 sm:$0xff]  }
 0x130   : > { %2140 = vmatprep.mubr.bf16.mxu0 %v4748_v16  ;;  %2181 = vmatprep.mubr.bf16.mxu1 %v4748_v16  ;;  %v4681_v21 = vld [vmem:[%s5357_s29 + $0x5ac] ss:$20 sps:$4 sm:$0xff]  }
 0x132   : > { %2117 = vmatpush1.bf16.msra.mxu0 %v4553_v28  ;;  %2158 = vmatpush1.bf16.msra.mxu1 %v4556_v29  ;;  %v4623_v28 = vld [vmem:[%s5357_s29 + $0x528] ss:$20 sps:$4 sm:$0xff]   ;;  %v4626_v29 = vld [vmem:[%s5357_s29 + $0x530] ss:$20 sps:$4 sm:$0xff]  }
 0x133   : > { %2118 = vmatprep.subr.bf16.mxu0 %v4561_v30  ;;  %2159 = vmatprep.subr.bf16.mxu1 %v4564_v31  ;;  %v4631_v30 = vld [vmem:[%s5357_s29 + $0x504] ss:$20 sps:$4 sm:$0xff]   ;;  %v4634_v31 = vld [vmem:[%s5357_s29 + $0x50c] ss:$20 sps:$4 sm:$0xff]  }
 0x136   : > { %2119 = vmatpush1.bf16.msra.mxu0 %v4559_v32  ;;  %2160 = vmatpush1.bf16.msra.mxu1 %v4562_v33  ;;  %v4629_v32 = vld [vmem:[%s5357_s29 + $0x500] ss:$20 sps:$4 sm:$0xff]   ;;  %v4632_v33 = vld [vmem:[%s5357_s29 + $0x508] ss:$20 sps:$4 sm:$0xff]  }
 0x137   : > { %2120 = vmatprep.subr.bf16.mxu0 %v4567_v34  ;;  %2161 = vmatprep.subr.bf16.mxu1 %v4570_v35  ;;  %v4637_v34 = vld [vmem:[%s5357_s29 + $0x4dc] ss:$20 sps:$4 sm:$0xff]   ;;  %v4640_v35 = vld [vmem:[%s5357_s29 + $0x4e4] ss:$20 sps:$4 sm:$0xff]  }
 0x13a   : > { %2121 = vmatpush1.bf16.msra.mxu0 %v4565_v36  ;;  %2162 = vmatpush1.bf16.msra.mxu1 %v4568_v37  ;;  %v4635_v36 = vld [vmem:[%s5357_s29 + $0x4d8] ss:$20 sps:$4 sm:$0xff]   ;;  %v4638_v37 = vld [vmem:[%s5357_s29 + $0x4e0] ss:$20 sps:$4 sm:$0xff]  }
 0x13b   : > { %2122 = vmatprep.subr.bf16.mxu0 %v4573_v38  ;;  %2163 = vmatprep.subr.bf16.mxu1 %v4576_v39  ;;  %v4643_v38 = vld [vmem:[%s5357_s29 + $0x4b4] ss:$20 sps:$4 sm:$0xff]   ;;  %v4646_v39 = vld [vmem:[%s5357_s29 + $0x4bc] ss:$20 sps:$4 sm:$0xff]  }
 0x13e   : > { %2123 = vmatpush1.bf16.msra.mxu0 %v4571_v41  ;;  %2164 = vmatpush1.bf16.msra.mxu1 %v4574_v42  ;;  %v3427_v41 = vld [vmem:[%s5828_s2] sm:$0xff] }
 0x13f   : > { %4306 = vmatprep.subr.bf16.mxu0 %v4749_v49  ;;  %2412 = vmatprep.subr.bf16.mxu1 %v2395_v45  ;;  %v4641_v42 = vld [vmem:[%s5357_s29 + $0x4b0] ss:$20 sps:$4 sm:$0xff]   ;;  %v4650_v45 = vld [vmem:[%s5357_s29 + $0x560] ss:$20 sps:$4 sm:$0x3f]  }
 0x140   : > { %3430 = vperm.xlu0 %4406, %v3427_v41  }
 0x141   : > { %3958 = vmatmul.mubr.msk.bf16.vlgmr.msra.gmra.mxu0 %vm898_vm2, %v5390_v46  ;;  %3959 = vmatmul.mubr.msk.bf16.vlgmr.msra.gmra.mxu1 %vm898_vm2, %v5390_v46  ;;  %v4585_v46 = vld [vmem:[%s5357_s29 + $0x438] ss:$20 sps:$4 sm:$0xff]  }
 0x142   : > { %4307 = vmatpush3.bf16.msra.mxu0 %v2106_v47  ;;  %2413 = vmatpush1.bf16.msra.mxu1 %v2392_v48  ;;  %v2991_v47 = vand.u32 %v4649_v40, %v5355_v17  ;;  %v2702_v48 = vand.u32 %v4650_v45, %v5355_v17  ;;  %v4698_v45 = vld [vmem:[%s5357_s29 + $0x6c4] ss:$20 sps:$4 sm:$0xff]  }
 0x143   : > { %4308 = vmatprep.subr.bf16.mxu0 %v4749_v49  ;;  %2414 = vmatprep.subr.bf16.mxu1 %v4583_v50  ;;  %v2988_v50 = vand.u32 %v4647_v44, %v5355_v17  ;;  %v4695_v44 = vld [vmem:[%s5357_s29 + $0x6bc] ss:$20 sps:$4 sm:$0xff]  }
 0x144   : > { %4316 = vmatprep.mubr.msk.bf16.mxu0 %vm4750_vm3, %v4749_v49  ;;  %2438 = vmatprep.mubr.bf16.mxu1 %v4748_v16 }
 0x146   : > { %4309 = vmatpush3.bf16.msra.mxu0 %v4584_v52  ;;  %2415 = vmatpush1.bf16.msra.mxu1 %v4581_v51  ;;  %v4653_v51 = vld [vmem:[%s5357_s29 + $0x5f4] ss:$20 sps:$4 sm:$0xff]   ;;  %v4651_v52 = vld [vmem:[%s5357_s29 + $0x5f0] ss:$20 sps:$4 sm:$0xff]  }
 0x147   : > { %4310 = vmatprep.subr.bf16.mxu0 %v4749_v49  ;;  %2416 = vmatprep.subr.bf16.mxu1 %v4587_v53  ;;  %v4654_v53 = vld [vmem:[%s5357_s29 + $0x538] ss:$20 sps:$4 sm:$0xff]  }
 0x14a   : > { %4311 = vmatpush3.bf16.msra.mxu0 %v4588_v54  ;;  %2417 = vmatpush1.bf16.msra.mxu1 %v4585_v46  ;;  %v4657_v46 = vld [vmem:[%s5357_s29 + $0x5cc] ss:$20 sps:$4 sm:$0xff]   ;;  %v4655_v54 = vld [vmem:[%s5357_s29 + $0x5c8] ss:$20 sps:$4 sm:$0xff]  }
 0x14b   : > { %4312 = vmatprep.subr.bf16.mxu0 %v4749_v49  ;;  %2418 = vmatprep.subr.bf16.mxu1 %v4591_v55  ;;  %v4658_v55 = vld [vmem:[%s5357_s29 + $0x510] ss:$20 sps:$4 sm:$0xff]  }
 0x14e   : > { %4313 = vmatpush3.bf16.msra.mxu0 %v4592_v57  ;;  %2419 = vmatpush1.bf16.msra.mxu1 %v4589_v56  ;;  %v4661_v56 = vld [vmem:[%s5357_s29 + $0x5a4] ss:$20 sps:$4 sm:$0xff]   ;;  %v4659_v57 = vld [vmem:[%s5357_s29 + $0x5a0] ss:$20 sps:$4 sm:$0xff]  }
 0x14f   : > { %4314 = vmatprep.subr.bf16.mxu0 %v4749_v49  ;;  %2420 = vmatprep.subr.bf16.mxu1 %v4595_v58  ;;  %v4662_v58 = vld [vmem:[%s5357_s29 + $0x4e8] ss:$20 sps:$4 sm:$0xff]  }
 0x152   : > { %4315 = vmatpush3.bf16.msra.mxu0 %v4596_v61  ;;  %2421 = vmatpush1.bf16.msra.mxu1 %v4593_v60  ;;  %v4669_v60 = vld [vmem:[%s5357_s29 + $0x624] ss:$20 sps:$4 sm:$0x3f]  }
 0x153   : > { %2453 = vmatprep.subr.bf16.mxu0 %v2401_v0  ;;  %4320 = vmatprep.subr.bf16.mxu1 %v4749_v49 }
 0x155   : > { %4317 = vmatmul.mubr.msk.bf16.vlgmr.msra.gmra.mxu0 %vm898_vm2, %v5609_v4  ;;  %4016 = vmatmul.mubr.msk.bf16.vlgmr.msra.gmra.mxu1 %vm898_vm2, %v5609_v4 }
 0x156   : > { %2454 = vmatpush1.bf16.msra.mxu0 %v2398_v1  ;;  %4321 = vmatpush3.bf16.msra.mxu1 %v2404_v2  ;;  %v4667_v1 = vld [vmem:[%s5357_s29 + $0x620] ss:$20 sps:$4 sm:$0x3f]   ;;  %v4670_v2 = vld [vmem:[%s5357_s29 + $0x628] ss:$20 sps:$4 sm:$0x3f]  }
 0x157   : > { %2455 = vmatprep.subr.bf16.mxu0 %v4603_v3  ;;  %4322 = vmatprep.subr.bf16.mxu1 %v4749_v49 }
 0x158   : > { %2479 = vmatprep.mubr.bf16.mxu0 %v4748_v16  ;;  %4330 = vmatprep.mubr.msk.bf16.mxu1 %vm4750_vm3, %v4749_v49 }
 0x15a   : > { %2456 = vmatpush1.bf16.msra.mxu0 %v4601_v5  ;;  %4323 = vmatpush3.bf16.msra.mxu1 %v4604_v6  ;;  %v2997_v5 = vand.u32 %v4669_v60, %v5355_v17 }
 0x15b   : > { %2457 = vmatprep.subr.bf16.mxu0 %v4607_v7  ;;  %4324 = vmatprep.subr.bf16.mxu1 %v4749_v49 }
 0x15e   : > { %2458 = vmatpush1.bf16.msra.mxu0 %v4605_v8  ;;  %4325 = vmatpush3.bf16.msra.mxu1 %v4608_v9  ;;  %v2994_v9 = vand.u32 %v4667_v1, %v5355_v17 }
 0x15f   : > { %2459 = vmatprep.subr.bf16.mxu0 %v4611_v10  ;;  %4326 = vmatprep.subr.bf16.mxu1 %v4749_v49  ;;  %v3000_v10 = vand.u32 %v4670_v2, %v5355_v17  ;;  %v4714_v2 = vld [vmem:[%s5357_s29 + $0x648] ss:$20 sps:$4 sm:$0xff]  }
 0x162   : > { %2460 = vmatpush1.bf16.msra.mxu0 %v4609_v11  ;;  %4327 = vmatpush3.bf16.msra.mxu1 %v4612_v12  ;;  %v4673_v12 = vld [vmem:[%s5357_s29 + $0x5fc] ss:$20 sps:$4 sm:$0xff]  }
 0x163   : > { %2461 = vmatprep.subr.bf16.mxu0 %v4615_v13  ;;  %4328 = vmatprep.subr.bf16.mxu1 %v4749_v49 }
 0x166   : > { %2462 = vmatpush1.bf16.msra.mxu0 %v4613_v18  ;;  %4329 = vmatpush3.bf16.msra.mxu1 %v4616_v19  ;;  %v4677_v18 = vld [vmem:[%s5357_s29 + $0x5d4] ss:$20 sps:$4 sm:$0xff]   ;;  %v4675_v19 = vld [vmem:[%s5357_s29 + $0x5d0] ss:$20 sps:$4 sm:$0xff]  }
 0x167   : > { %2710 = vmatprep.subr.bf16.mxu0 %v2693_v22  ;;  %2751 = vmatprep.subr.bf16.mxu1 %v2699_v23  ;;  %v4679_v22 = vld [vmem:[%s5357_s29 + $0x5a8] ss:$20 sps:$4 sm:$0xff]   ;;  %v4682_v23 = vld [vmem:[%s5357_s29 + $0x5b0] ss:$20 sps:$4 sm:$0xff]  }
 0x169   : > { %4017 = vmatmul.mubr.msk.bf16.vlgmr.msra.gmra.mxu0 %vm898_vm2, %v5609_v4  ;;  %4331 = vmatmul.mubr.msk.bf16.vlgmr.msra.gmra.mxu1 %vm898_vm2, %v5609_v4 }
 0x16a   : > { %2711 = vmatpush1.bf16.msra.mxu0 %v2690_v24  ;;  %2752 = vmatpush1.bf16.msra.mxu1 %v2696_v25  ;;  %v4685_v24 = vld [vmem:[%s5357_s29 + $0x584] ss:$20 sps:$4 sm:$0xff]  }
 0x16b   : > { %2712 = vmatprep.subr.bf16.mxu0 %v4625_v26  ;;  %2753 = vmatprep.subr.bf16.mxu1 %v4628_v27  ;;  %v4689_v25 = vld [vmem:[%s5357_s29 + $0x6e4] ss:$20 sps:$4 sm:$0x3f]   ;;  %v4692_v26 = vld [vmem:[%s5357_s29 + $0x6ec] ss:$20 sps:$4 sm:$0x3f]  }
 0x16c   : > { %2736 = vmatprep.mubr.bf16.mxu0 %v4748_v16  ;;  %2777 = vmatprep.mubr.bf16.mxu1 %v4748_v16 }
 0x16e   : > { %2713 = vmatpush1.bf16.msra.mxu0 %v4623_v28  ;;  %2754 = vmatpush1.bf16.msra.mxu1 %v4626_v29  ;;  %v4683_v29 = vld [vmem:[%s5357_s29 + $0x580] ss:$20 sps:$4 sm:$0xff]  }
 0x16f   : > { %2714 = vmatprep.subr.bf16.mxu0 %v4631_v30  ;;  %2755 = vmatprep.subr.bf16.mxu1 %v4634_v31  ;;  %v4686_v30 = vld [vmem:[%s5357_s29 + $0x588] ss:$20 sps:$4 sm:$0xff]  }
 0x172   : > { %2715 = vmatpush1.bf16.msra.mxu0 %v4629_v32  ;;  %2756 = vmatpush1.bf16.msra.mxu1 %v4632_v33  ;;  %v4687_v32 = vld [vmem:[%s5357_s29 + $0x6e0] ss:$20 sps:$4 sm:$0x3f]   ;;  %v4690_v33 = vld [vmem:[%s5357_s29 + $0x6e8] ss:$20 sps:$4 sm:$0x3f]  }
 0x173   : > { %2716 = vmatprep.subr.bf16.mxu0 %v4637_v34  ;;  %2757 = vmatprep.subr.bf16.mxu1 %v4640_v35  ;;  %v3286_v41 = vand.u32 %v4687_v32, %v5355_v17 }
 0x176   : > { %2717 = vmatpush1.bf16.msra.mxu0 %v4635_v36  ;;  %2758 = vmatpush1.bf16.msra.mxu1 %v4638_v37  ;;  %v3289_v36 = vand.u32 %v4689_v25, %v5355_v17  ;;  %v3295_v37 = vand.u32 %v4692_v26, %v5355_v17 }
 0x177   : > { %2718 = vmatprep.subr.bf16.mxu0 %v4643_v38  ;;  %2759 = vmatprep.subr.bf16.mxu1 %v4646_v39 }
 0x17a   : > { %2719 = vmatpush1.bf16.msra.mxu0 %v4641_v42  ;;  %2760 = vmatpush1.bf16.msra.mxu1 %v4644_v43  ;;  %v3292_v42 = vand.u32 %v4690_v33, %v5355_v17 }
 0x17b   : > { %4334 = vmatprep.subr.bf16.mxu0 %v4749_v49  ;;  %3008 = vmatprep.subr.bf16.mxu1 %v2991_v47 }
 0x17d   : > { %4074 = vmatmul.mubr.msk.bf16.vlgmr.msra.gmra.mxu0 %vm898_vm2, %v5609_v4  ;;  %4075 = vmatmul.mubr.msk.bf16.vlgmr.msra.gmra.mxu1 %vm898_vm2, %v5609_v4 }
 0x17e   : > { %4335 = vmatpush3.bf16.msra.mxu0 %v2702_v48  ;;  %3009 = vmatpush1.bf16.msra.mxu1 %v2988_v50  ;;  %v4693_v48 = vld [vmem:[%s5357_s29 + $0x6b8] ss:$20 sps:$4 sm:$0xff]   ;;  %v4696_v50 = vld [vmem:[%s5357_s29 + $0x6c0] ss:$20 sps:$4 sm:$0xff]  }
 0x17f   : > { %4336 = vmatprep.subr.bf16.mxu0 %v4749_v49  ;;  %3010 = vmatprep.subr.bf16.mxu1 %v4653_v51  ;;  %v4701_v51 = vld [vmem:[%s5357_s29 + $0x694] ss:$20 sps:$4 sm:$0xff]  }
 0x180   : > { %4344 = vmatprep.mubr.msk.bf16.mxu0 %vm4750_vm3, %v4749_v49  ;;  %3034 = vmatprep.mubr.bf16.mxu1 %v4748_v16 }
 0x182   : > { %4337 = vmatpush3.bf16.msra.mxu0 %v4654_v53  ;;  %3011 = vmatpush1.bf16.msra.mxu1 %v4651_v52  ;;  %v4704_v52 = vld [vmem:[%s5357_s29 + $0x69c] ss:$20 sps:$4 sm:$0xff]  }
 0x183   : > { %4338 = vmatprep.subr.bf16.mxu0 %v4749_v49  ;;  %3012 = vmatprep.subr.bf16.mxu1 %v4657_v46  ;;  %v4699_v53 = vld [vmem:[%s5357_s29 + $0x690] ss:$20 sps:$4 sm:$0xff]   ;;  %v4702_v46 = vld [vmem:[%s5357_s29 + $0x698] ss:$20 sps:$4 sm:$0xff]  }
 0x186   : > { %4339 = vmatpush3.bf16.msra.mxu0 %v4658_v55  ;;  %3013 = vmatpush1.bf16.msra.mxu1 %v4655_v54  ;;  %v4707_v54 = vld [vmem:[%s5357_s29 + $0x66c] ss:$20 sps:$4 sm:$0xff]   ;;  %v4710_v55 = vld [vmem:[%s5357_s29 + $0x674] ss:$20 sps:$4 sm:$0xff]  }
 0x187   : > { %4340 = vmatprep.subr.bf16.mxu0 %v4749_v49  ;;  %3014 = vmatprep.subr.bf16.mxu1 %v4661_v56  ;;  %v4705_v56 = vld [vmem:[%s5357_s29 + $0x668] ss:$20 sps:$4 sm:$0xff]  }
 0x189   : > { %v5694_v61 = vpop.f32.mrf.mxu0  ;;  %v5698_v0 = vpop.f32.mrf.mxu1 }
 0x18a   : > { %4341 = vmatpush3.bf16.msra.mxu0 %v4662_v58  ;;  %3015 = vmatpush1.bf16.msra.mxu1 %v4659_v57  ;;  %v4708_v57 = vld [vmem:[%s5357_s29 + $0x670] ss:$20 sps:$4 sm:$0xff]  }
 0x18b   : > { %v5702_v3 = vpop.f32.mrf.mxu0  ;;  %4342 = vmatprep.subr.bf16.mxu0 %v4749_v49  ;;  %3016 = vmatprep.subr.bf16.mxu1 %v4665_v59  ;;  %v5706_v6 = vpop.f32.mrf.mxu1  ;;  %v4713_v58 = vld [vmem:[%s5357_s29 + $0x644] ss:$20 sps:$4 sm:$0xff]  }
 0x18d   : > { %v959_v7 = vpop.f32.mrf.mxu0  ;;  %v1000_v8 = vpop.f32.mrf.mxu1 }
 0x18e   : > { %4343 = vmatpush3.bf16.msra.mxu0 %v4666_v63  ;;  %3017 = vmatpush1.bf16.msra.mxu1 %v4663_v62  ;;  %v4711_v62 = vld [vmem:[%s5357_s29 + $0x640] ss:$20 sps:$4 sm:$0xff]  }
 0x18f   : > { %v960_v11 = vpop.f32.mrf.mxu0  ;;  %3049 = vmatprep.subr.bf16.mxu0 %v2997_v5  ;;  %4348 = vmatprep.subr.bf16.mxu1 %v4749_v49  ;;  %v1001_v13 = vpop.f32.mrf.mxu1  ;;  %v4717_v5 = vld [vmem:[%s5357_s29 + $0x6f0] ss:$20 sps:$4 sm:$0x3f]  }
 0x191   : > { %4345 = vmatmul.mubr.msk.bf16.vlgmr.msra.gmra.mxu0 %vm898_vm2, %v5609_v4  ;;  %4132 = vmatmul.mubr.msk.bf16.vlgmr.msra.gmra.mxu1 %vm898_vm2, %v5609_v4 }
 0x192   : > { %3050 = vmatpush1.bf16.msra.mxu0 %v2994_v9  ;;  %4349 = vmatpush3.bf16.msra.mxu1 %v3000_v10 }
 0x193   : > { %3051 = vmatprep.subr.bf16.mxu0 %v4673_v12  ;;  %4350 = vmatprep.subr.bf16.mxu1 %v4749_v49 }
 0x194   : > { %3075 = vmatprep.mubr.bf16.mxu0 %v4748_v16  ;;  %4358 = vmatprep.mubr.msk.bf16.mxu1 %vm4750_vm3, %v4749_v49 }
 0x196   : > { %3052 = vmatpush1.bf16.msra.mxu0 %v4671_v14  ;;  %4351 = vmatpush3.bf16.msra.mxu1 %v4674_v15  ;;  %v4720_v14 = vld [vmem:[%s5357_s29 + $0x678] ss:$20 sps:$4 sm:$0xff]  }
 0x197   : > { %3053 = vmatprep.subr.bf16.mxu0 %v4677_v18  ;;  %4352 = vmatprep.subr.bf16.mxu1 %v4749_v49 }
 0x19a   : > { %3054 = vmatpush1.bf16.msra.mxu0 %v4675_v19  ;;  %4353 = vmatpush3.bf16.msra.mxu1 %v4678_v20 }
 0x19b   : > { %3055 = vmatprep.subr.bf16.mxu0 %v4681_v21  ;;  %4354 = vmatprep.subr.bf16.mxu1 %v4749_v49  ;;  %v4721_v21 = vld [vmem:[%s5357_s29 + $0x650] ss:$20 sps:$4 sm:$0xff]  }
 0x19d   : > { %v5733_v27 = vpop.f32.mrf.mxu0  ;;  %v5735_v28 = vpop.f32.mrf.mxu1 }
 0x19e   : > { %v1336_v31 = vmax.f32 %v5694_v61, %v5735_v28  ;;  %3056 = vmatpush1.bf16.msra.mxu0 %v4679_v22  ;;  %4355 = vmatpush3.bf16.msra.mxu1 %v4682_v23 }
 0x19f   : > { %v4262_v34 = vpop.f32.mrf.mxu0  ;;  %v5743_v35 = vpop.f32.mrf.mxu1  ;;  %3057 = vmatprep.subr.bf16.mxu0 %v4685_v24  ;;  %4356 = vmatprep.subr.bf16.mxu1 %v4749_v49 }
 0x1a0   : > { %v1337_v38 = vmax.f32 %v5702_v3, %v5743_v35 }
 0x1a1   : > { %v1040_v39 = vpop.f32.mrf.mxu0  ;;  %v1252_v40 = vpop.f32.mrf.mxu1 }
 0x1a2   : > { %3058 = vmatpush1.bf16.msra.mxu0 %v4683_v29  ;;  %4357 = vmatpush3.bf16.msra.mxu1 %v4686_v30 }
 0x1a3   : > { %v4263_v43 = vpop.f32.mrf.mxu0  ;;  %3306 = vmatprep.subr.bf16.mxu0 %v3289_v36  ;;  %3347 = vmatprep.subr.bf16.mxu1 %v3295_v37  ;;  %v1253_v47 = vpop.f32.mrf.mxu1 }
 0x1a5   : > { %4133 = vmatmul.mubr.msk.bf16.vlgmr.msra.gmra.mxu0 %vm898_vm2, %v5609_v4  ;;  %4359 = vmatmul.mubr.msk.bf16.vlgmr.msra.gmra.mxu1 %vm898_vm2, %v5609_v4 }
 0x1a6   : > { %3307 = vmatpush1.bf16.msra.mxu0 %v3286_v41  ;;  %3348 = vmatpush1.bf16.msra.mxu1 %v3292_v42 }
 0x1a7   : > { %3308 = vmatprep.subr.bf16.mxu0 %v4695_v44  ;;  %3349 = vmatprep.subr.bf16.mxu1 %v4698_v45 }
 0x1a8   : > { %3332 = vmatprep.mubr.bf16.mxu0 %v4748_v16  ;;  %3373 = vmatprep.mubr.bf16.mxu1 %v4748_v16  ;;  %v4716_v16 = vld [vmem:[%s5357_s29 + $0x64c] ss:$20 sps:$4 sm:$0xff]  }
 0x1aa   : > { %3309 = vmatpush1.bf16.msra.mxu0 %v4693_v48  ;;  %3350 = vmatpush1.bf16.msra.mxu1 %v4696_v50 }
 0x1ab   : > { %3310 = vmatprep.subr.bf16.mxu0 %v4701_v51  ;;  %3351 = vmatprep.subr.bf16.mxu1 %v4704_v52 }
 0x1ae   : > { %3311 = vmatpush1.bf16.msra.mxu0 %v4699_v53  ;;  %3352 = vmatpush1.bf16.msra.mxu1 %v4702_v46 }
 0x1af   : > { %3312 = vmatprep.subr.bf16.mxu0 %v4707_v54  ;;  %3353 = vmatprep.subr.bf16.mxu1 %v4710_v55 }
 0x1b1   : > { %v1289_v59 = vpop.f32.mrf.mxu0  ;;  %v1330_v60 = vpop.f32.mrf.mxu1 }
 0x1b2   : > { %v1338_v63 = vmax.f32 %v5698_v0, %v1289_v59  ;;  %v1340_v1 = vmax.f32 %v5733_v27, %v1330_v60  ;;  %3313 = vmatpush1.bf16.msra.mxu0 %v4705_v56  ;;  %3354 = vmatpush1.bf16.msra.mxu1 %v4708_v57  ;;  %v3298_v0 = vand.u32 %v4717_v5, %v5355_v17  ;;  %v4719_v17 = vld [vmem:[%s5357_s29 + $0x6a0] ss:$20 sps:$4 sm:$0xff]  }
 0x1b3   : > { %v1291_v7 = vpop.f32.mrf.mxu0  ;;  %3314 = vmatprep.subr.bf16.mxu0 %v4713_v58  ;;  %3355 = vmatprep.subr.bf16.mxu1 %v4716_v16  ;;  %v4276_v8 = vpop.f32.mrf.mxu1 }
 0x1b4   : > { %v1339_v9 = vmax.f32 %v5706_v6, %v1291_v7  ;;  %v4718_v6 = vld [vmem:[%s5357_s29 + $0x6c8] ss:$20 sps:$4 sm:$0xff]  }
 0x1b5   : > { %v1293_v10 = vpop.f32.mrf.mxu0  ;;  %v1333_v11 = vpop.f32.mrf.mxu1 }
 0x1b6   : > { %3315 = vmatpush1.bf16.msra.mxu0 %v4711_v62  ;;  %3356 = vmatpush1.bf16.msra.mxu1 %v4714_v2 }
 0x1b7   : > { %v1294_v12 = vpop.f32.mrf.mxu0  ;;  %4362 = vmatprep.subr.bf16.mxu0 %v4749_v49  ;;  %v4277_v13 = vpop.f32.mrf.mxu1 }
 0x1b9   : > { %4190 = vmatmul.mubr.msk.bf16.vlgmr.msra.gmra.mxu0 %vm898_vm2, %v5609_v4  ;;  %4191 = vmatmul.mubr.msk.bf16.vlgmr.msra.gmra.mxu1 %vm898_vm2, %v5609_v4 }
 0x1ba   : > { %4363 = vmatpush3.bf16.msra.mxu0 %v3298_v0  ;;  %4372 = vmatprep.mubr.msk.bf16.mxu0 %vm4750_vm3, %v4749_v49 }
 0x1bb   : > { %4364 = vmatprep.subr.bf16.mxu0 %v4749_v49 }
 0x1be   : > { %4365 = vmatpush3.bf16.msra.mxu0 %v4718_v6 }
 0x1bf   : > { %4366 = vmatprep.subr.bf16.mxu0 %v4749_v49 }
 0x1c2   : > { %4367 = vmatpush3.bf16.msra.mxu0 %v4719_v17 }
 0x1c3   : > { %4368 = vmatprep.subr.bf16.mxu0 %v4749_v49 }
 0x1c5   : > { %v1546_v15 = vpop.f32.mrf.mxu0  ;;  %v1587_v18 = vpop.f32.mrf.mxu1 }
 0x1c6   : > { %v1634_v19 = vmax.f32 %v1336_v31, %v1546_v15  ;;  %v1636_v20 = vmax.f32 %v1338_v63, %v1587_v18  ;;  %4369 = vmatpush3.bf16.msra.mxu0 %v4720_v14 }
 0x1c7   : > { %v1548_v22 = vpop.f32.mrf.mxu0  ;;  %v1589_v23 = vpop.f32.mrf.mxu1  ;;  %4370 = vmatprep.subr.bf16.mxu0 %v4749_v49 }
 0x1c8   : > { %v1635_v24 = vmax.f32 %v1337_v38, %v1548_v22  ;;  %v1637_v25 = vmax.f32 %v1339_v9, %v1589_v23 }
 0x1c9   : > { %v1550_v26 = vpop.f32.mrf.mxu0  ;;  %v1591_v27 = vpop.f32.mrf.mxu1 }
 0x1ca   : > { %4371 = vmatpush3.bf16.msra.mxu0 %v4721_v21 }
 0x1cb   : > { %v1551_v29 = vpop.f32.mrf.mxu0  ;;  %v1592_v30 = vpop.f32.mrf.mxu1 }
 0x1cd   : > { %4373 = vmatmul.mubr.msk.bf16.vlgmr.msra.gmra.mxu0 %vm898_vm2, %v5609_v4 }
 0x1d9   : > { %v1628_v61 = vpop.f32.mrf.mxu0  ;;  %v1844_v28 = vpop.f32.mrf.mxu1 }
 0x1da   : > { %v1638_v31 = vmax.f32 %v1340_v1, %v1628_v61  ;;  %v1932_v32 = vmax.f32 %v1634_v19, %v1844_v28 }
 0x1db   : > { %v4290_v33 = vpop.f32.mrf.mxu0  ;;  %v1846_v34 = vpop.f32.mrf.mxu1 }
 0x1dc   : > { %v1933_v49 = vmax.f32 %v1635_v24, %v1846_v34 }
 0x1dd   : > { %v1631_v36 = vpop.f32.mrf.mxu0  ;;  %v1848_v37 = vpop.f32.mrf.mxu1 }
 0x1df   : > { %v4291_v3 = vpop.f32.mrf.mxu0  ;;  %v1849_v35 = vpop.f32.mrf.mxu1 }
 0x1ed   : > { %v1885_v38 = vpop.f32.mrf.mxu0  ;;  %v1926_v39 = vpop.f32.mrf.mxu1 }
 0x1ee   : > { %v1934_v40 = vmax.f32 %v1636_v20, %v1885_v38  ;;  %v1936_v41 = vmax.f32 %v1638_v31, %v1926_v39 }
 0x1ef   : > { %v1887_v42 = vpop.f32.mrf.mxu0  ;;  %v4304_v43 = vpop.f32.mrf.mxu1 }
 0x1f0   : > { %v1935_v44 = vmax.f32 %v1637_v25, %v1887_v42 }
 0x1f1   : > { %v1889_v45 = vpop.f32.mrf.mxu0  ;;  %v1929_v4 = vpop.f32.mrf.mxu1 }
 0x1f3   : > { %v1890_v47 = vpop.f32.mrf.mxu0  ;;  %v4305_v48 = vpop.f32.mrf.mxu1 }
 0x201   : > { %v2142_v50 = vpop.f32.mrf.mxu0  ;;  %v2183_v51 = vpop.f32.mrf.mxu1 }
 0x202   : > { %v2230_v52 = vmax.f32 %v1932_v32, %v2142_v50  ;;  %v2232_v53 = vmax.f32 %v1934_v40, %v2183_v51  ;;  %v3431_v50 = vpop.permute.xlu0 %3430 }
 0x203   : > { %v2144_v46 = vpop.f32.mrf.mxu0  ;;  %v2185_v54 = vpop.f32.mrf.mxu1 }
 0x204   : > { %v2231_v55 = vmax.f32 %v1933_v49, %v2144_v46  ;;  %v2233_v56 = vmax.f32 %v1935_v44, %v2185_v54 }
 0x205   : > { %v2146_v57 = vpop.f32.mrf.mxu0  ;;  %v2187_v58 = vpop.f32.mrf.mxu1 }
 0x207   : > { %v2147_v16 = vpop.f32.mrf.mxu0  ;;  %v2188_v59 = vpop.f32.mrf.mxu1 }
 0x215   : > { %v2224_v60 = vpop.f32.mrf.mxu0  ;;  %v2440_v62 = vpop.f32.mrf.mxu1 }
 0x216   : > { %v5802_v63 = vmax.f32 %v1936_v41, %v2224_v60  ;;  %v2528_v1 = vmax.f32 %v2230_v52, %v2440_v62 }
 0x217   : > { %v4318_v2 = vpop.f32.mrf.mxu0  ;;  %v2442_v5 = vpop.f32.mrf.mxu1 }
 0x218   : > { %v2529_v7 = vmax.f32 %v2231_v55, %v2442_v5 }
 0x219   : > { %v2227_v8 = vpop.f32.mrf.mxu0  ;;  %v2444_v9 = vpop.f32.mrf.mxu1 }
 0x21b   : > { %v4319_v10 = vpop.f32.mrf.mxu0  ;;  %v2445_v11 = vpop.f32.mrf.mxu1 }
 0x229   : > { %v2481_v0 = vpop.f32.mrf.mxu0  ;;  %v5804_v12 = vpop.f32.mrf.mxu1 }
 0x22a   : > { %v2530_v13 = vmax.f32 %v2232_v53, %v2481_v0  ;;  %v2532_v6 = vmax.f32 %v5802_v63, %v5804_v12 }
 0x22b   : > { %v2483_v17 = vpop.f32.mrf.mxu0  ;;  %v4332_v14 = vpop.f32.mrf.mxu1 }
 0x22c   : > { %v2531_v15 = vmax.f32 %v2233_v56, %v2483_v17 }
 0x22d   : > { %v2485_v18 = vpop.f32.mrf.mxu0  ;;  %v2525_v19 = vpop.f32.mrf.mxu1 }
 0x22f   : > { %v2486_v20 = vpop.f32.mrf.mxu0  ;;  %v4333_v21 = vpop.f32.mrf.mxu1 }
 0x23d   : > { %v2738_v22 = vpop.f32.mrf.mxu0  ;;  %v2779_v23 = vpop.f32.mrf.mxu1 }
 0x23e   : > { %v2826_v43 = vmax.f32 %v2528_v1, %v2738_v22  ;;  %v2828_v44 = vmax.f32 %v2530_v13, %v2779_v23 }
 0x23f   : > { %v2740_v24 = vpop.f32.mrf.mxu0  ;;  %v2781_v25 = vpop.f32.mrf.mxu1 }
 0x240   : > { %v2827_v45 = vmax.f32 %v2529_v7, %v2740_v24  ;;  %v2829_v4 = vmax.f32 %v2531_v15, %v2781_v25 }
 0x241   : > { %v2742_v26 = vpop.f32.mrf.mxu0  ;;  %v2783_v27 = vpop.f32.mrf.mxu1 }
 0x243   : > { %v2743_v29 = vpop.f32.mrf.mxu0  ;;  %v2784_v30 = vpop.f32.mrf.mxu1 }
 0x251   : > { %v2820_v61 = vpop.f32.mrf.mxu0  ;;  %v3036_v28 = vpop.f32.mrf.mxu1 }
 0x252   : > { %v3124_v47 = vmax.f32 %v2826_v43, %v3036_v28  ;;  %v2830_v13 = vmax.f32 %v2532_v6, %v2820_v61 }
 0x253   : > { %v4346_v31 = vpop.f32.mrf.mxu0  ;;  %v3038_v32 = vpop.f32.mrf.mxu1 }
 0x254   : > { %v3125_v53 = vmax.f32 %v2827_v45, %v3038_v32 }
 0x255   : > { %v2823_v33 = vpop.f32.mrf.mxu0  ;;  %v3040_v34 = vpop.f32.mrf.mxu1 }
 0x257   : > { %v4347_v49 = vpop.f32.mrf.mxu0  ;;  %v3041_v36 = vpop.f32.mrf.mxu1 }
 0x265   : > { %v3077_v37 = vpop.f32.mrf.mxu0  ;;  %v3118_v3 = vpop.f32.mrf.mxu1 }
 0x266   : > { %v3126_v48 = vmax.f32 %v2828_v44, %v3077_v37  ;;  %v3128_v17 = vmax.f32 %v2830_v13, %v3118_v3 }
 0x267   : > { %v3079_v35 = vpop.f32.mrf.mxu0  ;;  %v4360_v38 = vpop.f32.mrf.mxu1 }
 0x268   : > { %v3127_v46 = vmax.f32 %v2829_v4, %v3079_v35 }
 0x269   : > { %v3081_v39 = vpop.f32.mrf.mxu0  ;;  %v3121_v40 = vpop.f32.mrf.mxu1 }
 0x26b   : > { %v3082_v41 = vpop.f32.mrf.mxu0  ;;  %v4361_v42 = vpop.f32.mrf.mxu1 }
 0x279   : > { %v3334_v51 = vpop.f32.mrf.mxu0  ;;  %v3375_v52 = vpop.f32.mrf.mxu1 }
 0x27a   : > { %v3422_v54 = vmax.f32 %v3124_v47, %v3334_v51  ;;  %v3424_v55 = vmax.f32 %v3126_v48, %v3375_v52 }
 0x27b   : > { %v3336_v56 = vpop.f32.mrf.mxu0  ;;  %v3377_v57 = vpop.f32.mrf.mxu1 }
 0x27c   : > { %v3433_v58 = vadd.f32 %v3431_v50, %v3422_v54  ;;  %v3435_v16 = vadd.f32 %v3431_v50, %v3424_v55  ;;  %v3423_v59 = vmax.f32 %v3125_v53, %v3336_v56  ;;  %v3425_v60 = vmax.f32 %v3127_v46, %v3377_v57 }
 0x27d   : > { %v3338_v62 = vpop.f32.mrf.mxu0  ;;  %v3379_v1 = vpop.f32.mrf.mxu1 }
 0x27e   : > { %v3438_v2 = vmax.f32 %v3433_v58, 0.0  ;;  %v3440_v5 = vmax.f32 %v3435_v16, 0.0  ;;  %v3434_v7 = vadd.f32 %v3431_v50, %v3423_v59  ;;  %v3436_v8 = vadd.f32 %v3431_v50, %v3425_v60 }
 0x27f   : > { %v3339_v9 = vpop.f32.mrf.mxu0  ;;  %v3380_v10 = vpop.f32.mrf.mxu1 }
 0x280   : > { %3443 = vst [vmem:[%s739_s14] sm:$0xff] %v3438_v2  ;;  %3445 = vst [vmem:[%s739_s14 + $0x10] sm:$0xff] %v3440_v5  ;;  %v3439_v11 = vmax.f32 %v3434_v7, 0.0  ;;  %v3441_v0 = vmax.f32 %v3436_v8, 0.0 }
 0x282   : > { %3444 = vst [vmem:[%s739_s14 + $0x8] sm:$0xff] %v3439_v11  ;;  %3446 = vst [vmem:[%s739_s14 + $0x18] sm:$0xff] %v3441_v0 }
 0x28d   : > { %v3416_v14 = vpop.f32.mrf.mxu0 }
 0x28e   : > { %v3426_v15 = vmax.f32 %v3128_v17, %v3416_v14 }
 0x28f   : > { %v4374_v18 = vpop.f32.mrf.mxu0 }
 0x290   : > { %v3437_v19 = vadd.f32 %v3431_v50, %v3426_v15 }
 0x291   : > { %v3419_v20 = vpop.f32.mrf.mxu0 }
 0x292   : > { %v3442_v21 = vmax.f32 %v3437_v19, 0.0 }
 0x293   : > { %v4375_v22 = vpop.f32.mrf.mxu0 }
 0x294   : > { %3447 = vst [vmem:[%s739_s14 + $0x20] sm:$0xff] %v3442_v21 }
 0x295 PF: > { %p10_p9 = scmp.ge.s32.totalorder %s4788_s16, 4   ;;  %s5830_s12 = smov %s4741_s13 }
 0x296   : > { %s5831_s13 = smov %s4797_s19  ;;  %s5832_s14 = smov %s4788_s16 }
 0x297   :  { %12 = sbr.rel (!%p10_p9) target bundleno = 2 (0x2), region = 107 }

// kernel: cnn_forward.4
= control target key start
LH: loop header
LB: loop body
LE: loop exit
PB: predicated region body
PF: predicated region fallthrough
CT: control target
= control target key end

     0   :  { %v1505_v0 = vmov 0   ;;  %vm102_vm0 = vcmask 179200   ;;  %vm106_vm1 = vcmask 1042432   ;;  %s1945_s0 = inlined_call_operand.vmem [shape: bf16[9,150,128], index: 0, kind: input, shape index: {}]   ;;  %s1946_s1 = inlined_call_operand.vmem [shape: bf16[16,150], index: 1, kind: input, shape index: {}]   ;;  %s1947_s2 = inlined_call_operand.vmem [shape: f32[16,1], index: 2, kind: input, shape index: {}]   ;;  %s1948_s3 = inlined_call_operand.vmem [shape: f32[16,128], index: 3, kind: output, shape index: {}]  }
   0x1   :  { %110 = vmatprep.subr.bf16.mxu0 %v1505_v0  ;;  %231 = vmatprep.subr.bf16.mxu1 %v1505_v0  ;;  %v1412_v1 = vld [vmem:[%s1945_s0 + $0x38] sm:$0xff]   ;;  %v1413_v2 = vld [vmem:[%s1945_s0 + $0x84] sm:$0xff]   ;;  %v1414_v3 = vld [vmem:[%s1945_s0 + $0x30] sm:$0xff]  }
   0x2   :  { %1411 = vset.pattern.permute.xlu0 %v1505_v0  ;;  %111 = vmatpush1.bf16.msra.mxu0 %v1412_v1  ;;  %v1415_v4 = vld [vmem:[%s1945_s0 + $0x7c] sm:$0xff]   ;;  %v1416_v5 = vld [vmem:[%s1945_s0 + $0x28] sm:$0xff]   ;;  %v1417_v6 = vld [vmem:[%s1945_s0 + $0x74] sm:$0xff]  }
   0x3   :  { %232 = vmatpush1.bf16.msra.mxu1 %v1413_v2  ;;  %112 = vmatprep.subr.bf16.mxu0 %v1505_v0  ;;  %v1418_v7 = vld [vmem:[%s1945_s0 + $0x20] sm:$0xff]   ;;  %v1419_v8 = vld [vmem:[%s1945_s0 + $0x6c] sm:$0xff]   ;;  %v1420_v9 = vld [vmem:[%s1945_s0 + $0x18] sm:$0xff]  }
   0x4   :  { %233 = vmatprep.subr.bf16.mxu1 %v1505_v0  ;;  %v1421_v10 = vld [vmem:[%s1945_s0 + $0x64] sm:$0xff]   ;;  %v1422_v11 = vld [vmem:[%s1945_s0 + $0x10] sm:$0xff]   ;;  %v1423_v12 = vld [vmem:[%s1945_s0 + $0x5c] sm:$0xff]  }
   0x5   :  { %v1578_v13 = vld [vmem:[%s1946_s1 + $0x4] ss:$8 sps:$4 sm:$0xff]   ;;  %v1425_v15 = vld [vmem:[%s1945_s0 + $0x54] sm:$0xff]   ;;  %v1428_v16 = vld [vmem:[%s1945_s0 + $0x48] ss:$0 sps:$4 sm:$0x77]  }
   0x6   :  { %113 = vmatpush1.bf16.msra.mxu0 %v1414_v3  ;;  %v1424_v14 = vld [vmem:[%s1945_s0 + $0x8] sm:$0xff]   ;;  %1169 = vmatprep.mubr.msk.bf16.mxu0 %vm102_vm0, %v1578_v13  ;;  %v1426_v17 = vld [vmem:[%s1945_s0] sm:$0xff]   ;;  %v1429_v18 = vld [vmem:[%s1945_s0 + $0x94] ss:$0 sps:$4 sm:$0x77]   ;;  %v108_v20 = vsel %vm106_vm1, %v1428_v16, 0 }
   0x7   :  { %234 = vmatpush1.bf16.msra.mxu1 %v1415_v4  ;;  %114 = vmatprep.subr.bf16.mxu0 %v1505_v0  ;;  %v1427_v19 = vld [vmem:[%s1945_s0 + $0x4c] sm:$0xff]   ;;  %v229_v21 = vsel %vm106_vm1, %v1429_v18, 0  ;;  %v1430_v22 = vld [vmem:[%s1945_s0 + $0x40] sm:$0xff]   ;;  %v1438_v28 = vld [vmem:[%s1945_s0 + $0x114] sm:$0xff]  }
   0x8   :  { %235 = vmatprep.subr.bf16.mxu1 %v1505_v0  ;;  %1199 = vmatprep.mubr.msk.bf16.mxu1 %vm102_vm0, %v1578_v13  ;;  %v1431_v23 = vld [vmem:[%s1945_s0 + $0x8c] sm:$0xff]   ;;  %v1621_v24 = vld [vmem:[%s1946_s1] ss:$8 sps:$4 sm:$0xff]   ;;  %v1441_v31 = vld [vmem:[%s1945_s0 + $0xb8] sm:$0xff]  }
   0x9   :  { %v1435_v25 = vld [vmem:[%s1945_s0 + $0xd0] sm:$0xff]   ;;  %v1436_v26 = vld [vmem:[%s1945_s0 + $0x11c] sm:$0xff]   ;;  %v1437_v27 = vld [vmem:[%s1945_s0 + $0xc8] sm:$0xff]  }
   0xa   :  { %115 = vmatpush1.bf16.msra.mxu0 %v1416_v5  ;;  %v1439_v29 = vld [vmem:[%s1945_s0 + $0xc0] sm:$0xff]   ;;  %v1440_v30 = vld [vmem:[%s1945_s0 + $0x10c] sm:$0xff]   ;;  %v1446_v36 = vld [vmem:[%s1945_s0 + $0xf4] sm:$0xff]  }
   0xb   :  { %236 = vmatpush1.bf16.msra.mxu1 %v1417_v6  ;;  %116 = vmatprep.subr.bf16.mxu0 %v1505_v0  ;;  %v1442_v32 = vld [vmem:[%s1945_s0 + $0x104] sm:$0xff]   ;;  %v1443_v33 = vld [vmem:[%s1945_s0 + $0xb0] sm:$0xff]   ;;  %v1444_v34 = vld [vmem:[%s1945_s0 + $0xfc] sm:$0xff]  }
   0xc   :  { %237 = vmatprep.subr.bf16.mxu1 %v1505_v0  ;;  %v1445_v35 = vld [vmem:[%s1945_s0 + $0xa8] sm:$0xff]   ;;  %v1447_v37 = vld [vmem:[%s1945_s0 + $0xa0] sm:$0xff]   ;;  %v1449_v40 = vld [vmem:[%s1945_s0 + $0x98] sm:$0xff]  }
   0xd   :  { %v1448_v38 = vld [vmem:[%s1945_s0 + $0xec] sm:$0xff]   ;;  %v1451_v39 = vld [vmem:[%s1945_s0 + $0xe0] ss:$0 sps:$4 sm:$0x77]   ;;  %v1450_v42 = vld [vmem:[%s1945_s0 + $0xe4] sm:$0xff]  }
   0xe   :  { %117 = vmatpush1.bf16.msra.mxu0 %v1418_v7  ;;  %v1452_v41 = vld [vmem:[%s1945_s0 + $0x12c] ss:$0 sps:$4 sm:$0x77]   ;;  %v352_v43 = vsel %vm106_vm1, %v1451_v39, 0  ;;  %v1453_v45 = vld [vmem:[%s1945_s0 + $0xd8] sm:$0xff]   ;;  %v1454_v46 = vld [vmem:[%s1945_s0 + $0x124] sm:$0xff]  }
   0xf   :  { %238 = vmatpush1.bf16.msra.mxu1 %v1419_v8  ;;  %118 = vmatprep.subr.bf16.mxu0 %v1505_v0  ;;  %v475_v44 = vsel %vm106_vm1, %v1452_v41, 0  ;;  %v1455_v47 = vld [vmem:[%s1945_s0 + $0x168] sm:$0xff]   ;;  %v1456_v48 = vld [vmem:[%s1945_s0 + $0x1b4] sm:$0xff]   ;;  %v1457_v49 = vld [vmem:[%s1945_s0 + $0x160] sm:$0xff]  }
  0x10   :  { %239 = vmatprep.subr.bf16.mxu1 %v1505_v0  ;;  %v1458_v50 = vld [vmem:[%s1945_s0 + $0x1ac] sm:$0xff]   ;;  %v1459_v51 = vld [vmem:[%s1945_s0 + $0x158] sm:$0xff]   ;;  %v1460_v52 = vld [vmem:[%s1945_s0 + $0x1a4] sm:$0xff]  }
  0x11   :  { %v1461_v53 = vld [vmem:[%s1945_s0 + $0x150] sm:$0xff]   ;;  %v1462_v54 = vld [vmem:[%s1945_s0 + $0x19c] sm:$0xff]   ;;  %v1463_v55 = vld [vmem:[%s1945_s0 + $0x148] sm:$0xff]  }
  0x12   :  { %119 = vmatpush1.bf16.msra.mxu0 %v1420_v9  ;;  %v1464_v56 = vld [vmem:[%s1945_s0 + $0x194] sm:$0xff]   ;;  %v1465_v57 = vld [vmem:[%s1945_s0 + $0x140] sm:$0xff]   ;;  %v1466_v58 = vld [vmem:[%s1945_s0 + $0x18c] sm:$0xff]  }
  0x13   :  { %240 = vmatpush1.bf16.msra.mxu1 %v1421_v10  ;;  %120 = vmatprep.subr.bf16.mxu0 %v1505_v0  ;;  %v1467_v59 = vld [vmem:[%s1945_s0 + $0x138] sm:$0xff]   ;;  %v1468_v60 = vld [vmem:[%s1945_s0 + $0x184] sm:$0xff]   ;;  %v1469_v61 = vld [vmem:[%s1945_s0 + $0x130] sm:$0xff]  }
  0x14   :  { %241 = vmatprep.subr.bf16.mxu1 %v1505_v0  ;;  %v1470_v62 = vld [vmem:[%s1945_s0 + $0x17c] sm:$0xff]   ;;  %v1471_v63 = vld [vmem:[%s1945_s0 + $0x178] ss:$0 sps:$4 sm:$0x77]   ;;  %v1473_v5 = vld [vmem:[%s1945_s0 + $0x170] sm:$0xff]  }
  0x15   :  { %v1472_v1 = vld [vmem:[%s1945_s0 + $0x1c4] ss:$0 sps:$4 sm:$0x77]   ;;  %v598_v2 = vsel %vm106_vm1, %v1471_v63, 0  ;;  %v1136_v6 = vld [vmem:[%s1947_s2 + $0x8] sm:$0xff]  ;;  %v1474_v7 = vld [vmem:[%s1945_s0 + $0x1bc] sm:$0xff]  }
  0x16   :  { %121 = vmatpush1.bf16.msra.mxu0 %v1422_v11  ;;  %v721_v3 = vsel %vm106_vm1, %v1472_v1, 0  ;;  %v1135_v4 = vld [vmem:[%s1947_s2] sm:$0xff]  ;;  %v1476_v9 = vld [vmem:[%s1945_s0 + $0x24c] sm:$0xff]   ;;  %v1477_v10 = vld [vmem:[%s1945_s0 + $0x1f8] sm:$0xff]  }
  0x17   :  { %242 = vmatpush1.bf16.msra.mxu1 %v1423_v12  ;;  %122 = vmatprep.subr.bf16.mxu0 %v1505_v0  ;;  %v1475_v8 = vld [vmem:[%s1945_s0 + $0x200] sm:$0xff]   ;;  %v1479_v12 = vld [vmem:[%s1945_s0 + $0x1f0] sm:$0xff]   ;;  %v1503_v39 = vld [vmem:[%s1945_s0 + $0x2a8] ss:$0 sps:$4 sm:$0x77]  }
  0x18   :  { %243 = vmatprep.subr.bf16.mxu1 %v1505_v0  ;;  %1139 = vperm.xlu0 %1411, %v1135_v4   ;;  %v1478_v11 = vld [vmem:[%s1945_s0 + $0x244] sm:$0xff]   ;;  %v1482_v16 = vld [vmem:[%s1945_s0 + $0x234] sm:$0xff]   ;;  %v1484_v18 = vld [vmem:[%s1945_s0 + $0x22c] sm:$0xff]  }
  0x19   :  { %v1504_v41 = vld [vmem:[%s1945_s0 + $0x2a0] sm:$0xff]  }
  0x1a   :  { %123 = vmatpush1.bf16.msra.mxu0 %v1424_v14  ;;  %v1480_v14 = vld [vmem:[%s1945_s0 + $0x23c] sm:$0xff]  }
  0x1b   :  { %244 = vmatpush1.bf16.msra.mxu1 %v1425_v15  ;;  %124 = vmatprep.subr.bf16.mxu0 %v1505_v0  ;;  %v1481_v15 = vld [vmem:[%s1945_s0 + $0x1e8] sm:$0xff]  }
  0x1c   :  { %245 = vmatprep.subr.bf16.mxu1 %v1505_v0  ;;  %1144 = vperm.xlu0 %1411, %v1136_v6  }
  0x1e   :  { %125 = vmatpush1.bf16.msra.mxu0 %v1426_v17  ;;  %v1483_v17 = vld [vmem:[%s1945_s0 + $0x1e0] sm:$0xff]  }
  0x1f   :  { %246 = vmatpush1.bf16.msra.mxu1 %v1427_v19  ;;  %138 = vmatprep.subr.bf16.mxu0 %v1505_v0  ;;  %v1485_v19 = vld [vmem:[%s1945_s0 + $0x1d8] sm:$0xff]  }
  0x20   :  { %259 = vmatprep.subr.bf16.mxu1 %v1505_v0 }
  0x22   :  { %139 = vmatpush2.bf16.msra.mxu0 %v108_v20  ;;  %v1486_v20 = vld [vmem:[%s1945_s0 + $0x224] sm:$0xff]  }
  0x23   :  { %260 = vmatpush2.bf16.msra.mxu1 %v229_v21  ;;  %140 = vmatprep.subr.bf16.mxu0 %v1505_v0  ;;  %v1487_v21 = vld [vmem:[%s1945_s0 + $0x1d0] sm:$0xff]  }
  0x24   :  { %261 = vmatprep.subr.bf16.mxu1 %v1505_v0 }
  0x26   :  { %141 = vmatpush2.bf16.msra.mxu0 %v1430_v22  ;;  %v1488_v22 = vld [vmem:[%s1945_s0 + $0x21c] sm:$0xff]  }
  0x27   :  { %262 = vmatpush2.bf16.msra.mxu1 %v1431_v23  ;;  %354 = vmatprep.subr.bf16.mxu0 %v1505_v0  ;;  %v1489_v23 = vld [vmem:[%s1945_s0 + $0x1c8] sm:$0xff]  }
  0x28   :  { %477 = vmatprep.subr.bf16.mxu1 %v1505_v0 }
  0x29   :  { %143 = vmatmul.mubr.bf16.vlgmr.msra.gmra.mxu0 %v1621_v24 }
  0x2a   :  { %264 = vmatmul.mubr.bf16.vlgmr.msra.gmra.mxu1 %v1621_v24  ;;  %355 = vmatpush1.bf16.msra.mxu0 %v1435_v25  ;;  %v1490_v25 = vld [vmem:[%s1945_s0 + $0x214] sm:$0xff]  }
  0x2b   :  { %478 = vmatpush1.bf16.msra.mxu1 %v1436_v26  ;;  %356 = vmatprep.subr.bf16.mxu0 %v1505_v0  ;;  %v1491_v26 = vld [vmem:[%s1945_s0 + $0x210] ss:$0 sps:$4 sm:$0x77]  }
  0x2c   :  { %479 = vmatprep.subr.bf16.mxu1 %v1505_v0  ;;  %1229 = vmatprep.mubr.msk.bf16.mxu0 %vm102_vm0, %v1578_v13 }
  0x2d   :  { %1259 = vmatprep.mubr.msk.bf16.mxu1 %vm102_vm0, %v1578_v13 }
  0x2e   :  { %357 = vmatpush1.bf16.msra.mxu0 %v1437_v27  ;;  %v1492_v27 = vld [vmem:[%s1945_s0 + $0x25c] ss:$0 sps:$4 sm:$0x77]  }
  0x2f   :  { %480 = vmatpush1.bf16.msra.mxu1 %v1438_v28  ;;  %358 = vmatprep.subr.bf16.mxu0 %v1505_v0  ;;  %v844_v28 = vsel %vm106_vm1, %v1491_v26, 0 }
  0x30   :  { %481 = vmatprep.subr.bf16.mxu1 %v1505_v0 }
  0x32   :  { %359 = vmatpush1.bf16.msra.mxu0 %v1439_v29  ;;  %v967_v29 = vsel %vm106_vm1, %v1492_v27, 0 }
  0x33   :  { %482 = vmatpush1.bf16.msra.mxu1 %v1440_v30  ;;  %360 = vmatprep.subr.bf16.mxu0 %v1505_v0  ;;  %v1493_v30 = vld [vmem:[%s1945_s0 + $0x208] sm:$0xff]  }
  0x34   :  { %483 = vmatprep.subr.bf16.mxu1 %v1505_v0 }
  0x36   :  { %361 = vmatpush1.bf16.msra.mxu0 %v1441_v31  ;;  %v1494_v31 = vld [vmem:[%s1945_s0 + $0x254] sm:$0xff]  }
  0x37   :  { %484 = vmatpush1.bf16.msra.mxu1 %v1442_v32  ;;  %362 = vmatprep.subr.bf16.mxu0 %v1505_v0  ;;  %v1495_v32 = vld [vmem:[%s1945_s0 + $0x298] sm:$0xff]  }
  0x38   :  { %485 = vmatprep.subr.bf16.mxu1 %v1505_v0 }
  0x3a   :  { %363 = vmatpush1.bf16.msra.mxu0 %v1443_v33  ;;  %v1496_v33 = vld [vmem:[%s1945_s0 + $0x290] sm:$0xff]  }
  0x3b   :  { %486 = vmatpush1.bf16.msra.mxu1 %v1444_v34  ;;  %364 = vmatprep.subr.bf16.mxu0 %v1505_v0  ;;  %v1497_v34 = vld [vmem:[%s1945_s0 + $0x288] sm:$0xff]  }
  0x3c   :  { %487 = vmatprep.subr.bf16.mxu1 %v1505_v0 }
  0x3e   :  { %365 = vmatpush1.bf16.msra.mxu0 %v1445_v35  ;;  %v1498_v35 = vld [vmem:[%s1945_s0 + $0x280] sm:$0xff]  }
  0x3f   :  { %488 = vmatpush1.bf16.msra.mxu1 %v1446_v36  ;;  %366 = vmatprep.subr.bf16.mxu0 %v1505_v0  ;;  %v1499_v36 = vld [vmem:[%s1945_s0 + $0x278] sm:$0xff]  }
  0x40   :  { %489 = vmatprep.subr.bf16.mxu1 %v1505_v0 }
  0x42   :  { %367 = vmatpush1.bf16.msra.mxu0 %v1447_v37  ;;  %v1501_v37 = vld [vmem:[%s1945_s0 + $0x268] sm:$0xff]  }
  0x43   :  { %490 = vmatpush1.bf16.msra.mxu1 %v1448_v38  ;;  %368 = vmatprep.subr.bf16.mxu0 %v1505_v0  ;;  %v1502_v38 = vld [vmem:[%s1945_s0 + $0x260] sm:$0xff]  }
  0x44   :  { %491 = vmatprep.subr.bf16.mxu1 %v1505_v0 }
  0x46   :  { %369 = vmatpush1.bf16.msra.mxu0 %v1449_v40  ;;  %v1090_v40 = vsel %vm106_vm1, %v1503_v39, 0 }
  0x47   :  { %492 = vmatpush1.bf16.msra.mxu1 %v1450_v42  ;;  %382 = vmatprep.subr.bf16.mxu0 %v1505_v0 }
  0x48   :  { %505 = vmatprep.subr.bf16.mxu1 %v1505_v0 }
  0x4a   :  { %383 = vmatpush2.bf16.msra.mxu0 %v352_v43 }
  0x4b   :  { %506 = vmatpush2.bf16.msra.mxu1 %v475_v44  ;;  %384 = vmatprep.subr.bf16.mxu0 %v1505_v0 }
  0x4c   :  { %507 = vmatprep.subr.bf16.mxu1 %v1505_v0 }
  0x4e   :  { %385 = vmatpush2.bf16.msra.mxu0 %v1453_v45 }
  0x4f   :  { %508 = vmatpush2.bf16.msra.mxu1 %v1454_v46  ;;  %600 = vmatprep.subr.bf16.mxu0 %v1505_v0 }
  0x50   :  { %723 = vmatprep.subr.bf16.mxu1 %v1505_v0 }
  0x51   :  { %387 = vmatmul.mubr.bf16.vlgmr.msra.gmra.mxu0 %v1621_v24 }
  0x52   :  { %601 = vmatpush1.bf16.msra.mxu0 %v1455_v47  ;;  %510 = vmatmul.mubr.bf16.vlgmr.msra.gmra.mxu1 %v1621_v24 }
  0x53   :  { %724 = vmatpush1.bf16.msra.mxu1 %v1456_v48  ;;  %602 = vmatprep.subr.bf16.mxu0 %v1505_v0 }
  0x54   :  { %725 = vmatprep.subr.bf16.mxu1 %v1505_v0  ;;  %1289 = vmatprep.mubr.msk.bf16.mxu0 %vm102_vm0, %v1578_v13 }
  0x55   :  { %1319 = vmatprep.mubr.msk.bf16.mxu1 %vm102_vm0, %v1578_v13 }
  0x56   :  { %603 = vmatpush1.bf16.msra.mxu0 %v1457_v49 }
  0x57   :  { %726 = vmatpush1.bf16.msra.mxu1 %v1458_v50  ;;  %604 = vmatprep.subr.bf16.mxu0 %v1505_v0 }
  0x58   :  { %727 = vmatprep.subr.bf16.mxu1 %v1505_v0 }
  0x5a   :  { %605 = vmatpush1.bf16.msra.mxu0 %v1459_v51 }
  0x5b   :  { %728 = vmatpush1.bf16.msra.mxu1 %v1460_v52  ;;  %606 = vmatprep.subr.bf16.mxu0 %v1505_v0 }
  0x5c   :  { %729 = vmatprep.subr.bf16.mxu1 %v1505_v0 }
  0x5e   :  { %607 = vmatpush1.bf16.msra.mxu0 %v1461_v53 }
  0x5f   :  { %730 = vmatpush1.bf16.msra.mxu1 %v1462_v54  ;;  %608 = vmatprep.subr.bf16.mxu0 %v1505_v0 }
  0x60   :  { %731 = vmatprep.subr.bf16.mxu1 %v1505_v0 }
  0x62   :  { %609 = vmatpush1.bf16.msra.mxu0 %v1463_v55 }
  0x63   :  { %732 = vmatpush1.bf16.msra.mxu1 %v1464_v56  ;;  %610 = vmatprep.subr.bf16.mxu0 %v1505_v0 }
  0x64   :  { %733 = vmatprep.subr.bf16.mxu1 %v1505_v0 }
  0x66   :  { %611 = vmatpush1.bf16.msra.mxu0 %v1465_v57 }
  0x67   :  { %734 = vmatpush1.bf16.msra.mxu1 %v1466_v58  ;;  %612 = vmatprep.subr.bf16.mxu0 %v1505_v0 }
  0x68   :  { %735 = vmatprep.subr.bf16.mxu1 %v1505_v0 }
  0x6a   :  { %613 = vmatpush1.bf16.msra.mxu0 %v1467_v59 }
  0x6b   :  { %736 = vmatpush1.bf16.msra.mxu1 %v1468_v60  ;;  %614 = vmatprep.subr.bf16.mxu0 %v1505_v0 }
  0x6c   :  { %737 = vmatprep.subr.bf16.mxu1 %v1505_v0 }
  0x6e   :  { %615 = vmatpush1.bf16.msra.mxu0 %v1469_v61 }
  0x6f   :  { %738 = vmatpush1.bf16.msra.mxu1 %v1470_v62  ;;  %628 = vmatprep.subr.bf16.mxu0 %v1505_v0 }
  0x70   :  { %751 = vmatprep.subr.bf16.mxu1 %v1505_v0 }
  0x72   :  { %629 = vmatpush2.bf16.msra.mxu0 %v598_v2 }
  0x73   :  { %752 = vmatpush2.bf16.msra.mxu1 %v721_v3  ;;  %630 = vmatprep.subr.bf16.mxu0 %v1505_v0 }
  0x74   :  { %753 = vmatprep.subr.bf16.mxu1 %v1505_v0 }
  0x76   :  { %631 = vmatpush2.bf16.msra.mxu0 %v1473_v5 }
  0x77   :  { %754 = vmatpush2.bf16.msra.mxu1 %v1474_v7  ;;  %846 = vmatprep.subr.bf16.mxu0 %v1505_v0 }
  0x78   :  { %969 = vmatprep.subr.bf16.mxu1 %v1505_v0 }
  0x79   :  { %633 = vmatmul.mubr.bf16.vlgmr.msra.gmra.mxu0 %v1621_v24 }
  0x7a   :  { %847 = vmatpush1.bf16.msra.mxu0 %v1475_v8  ;;  %756 = vmatmul.mubr.bf16.vlgmr.msra.gmra.mxu1 %v1621_v24 }
  0x7b   :  { %970 = vmatpush1.bf16.msra.mxu1 %v1476_v9  ;;  %848 = vmatprep.subr.bf16.mxu0 %v1505_v0 }
  0x7c   :  { %971 = vmatprep.subr.bf16.mxu1 %v1505_v0  ;;  %1349 = vmatprep.mubr.msk.bf16.mxu0 %vm102_vm0, %v1578_v13 }
  0x7d   :  { %1379 = vmatprep.mubr.msk.bf16.mxu1 %vm102_vm0, %v1578_v13 }
  0x7e   :  { %849 = vmatpush1.bf16.msra.mxu0 %v1477_v10 }
  0x7f   :  { %972 = vmatpush1.bf16.msra.mxu1 %v1478_v11  ;;  %850 = vmatprep.subr.bf16.mxu0 %v1505_v0 }
  0x80   :  { %973 = vmatprep.subr.bf16.mxu1 %v1505_v0 }
  0x82   :  { %851 = vmatpush1.bf16.msra.mxu0 %v1479_v12 }
  0x83   :  { %974 = vmatpush1.bf16.msra.mxu1 %v1480_v14  ;;  %852 = vmatprep.subr.bf16.mxu0 %v1505_v0 }
  0x84   :  { %975 = vmatprep.subr.bf16.mxu1 %v1505_v0 }
  0x86   :  { %853 = vmatpush1.bf16.msra.mxu0 %v1481_v15 }
  0x87   :  { %976 = vmatpush1.bf16.msra.mxu1 %v1482_v16  ;;  %854 = vmatprep.subr.bf16.mxu0 %v1505_v0 }
  0x88   :  { %977 = vmatprep.subr.bf16.mxu1 %v1505_v0 }
  0x8a   :  { %855 = vmatpush1.bf16.msra.mxu0 %v1483_v17 }
  0x8b   :  { %978 = vmatpush1.bf16.msra.mxu1 %v1484_v18  ;;  %856 = vmatprep.subr.bf16.mxu0 %v1505_v0 }
  0x8c   :  { %979 = vmatprep.subr.bf16.mxu1 %v1505_v0 }
  0x8e   :  { %857 = vmatpush1.bf16.msra.mxu0 %v1485_v19 }
  0x8f   :  { %980 = vmatpush1.bf16.msra.mxu1 %v1486_v20  ;;  %858 = vmatprep.subr.bf16.mxu0 %v1505_v0 }
  0x90   :  { %981 = vmatprep.subr.bf16.mxu1 %v1505_v0 }
  0x92   :  { %859 = vmatpush1.bf16.msra.mxu0 %v1487_v21 }
  0x93   :  { %982 = vmatpush1.bf16.msra.mxu1 %v1488_v22  ;;  %860 = vmatprep.subr.bf16.mxu0 %v1505_v0 }
  0x94   :  { %983 = vmatprep.subr.bf16.mxu1 %v1505_v0 }
  0x96   :  { %861 = vmatpush1.bf16.msra.mxu0 %v1489_v23  ;;  %v1140_v23 = vpop.permute.xlu0 %1139 }
  0x97   :  { %984 = vmatpush1.bf16.msra.mxu1 %v1490_v25  ;;  %874 = vmatprep.subr.bf16.mxu0 %v1505_v0 }
  0x98   :  { %997 = vmatprep.subr.bf16.mxu1 %v1505_v0 }
  0x9a   :  { %875 = vmatpush2.bf16.msra.mxu0 %v844_v28 }
  0x9b   :  { %998 = vmatpush2.bf16.msra.mxu1 %v967_v29  ;;  %876 = vmatprep.subr.bf16.mxu0 %v1505_v0 }
  0x9c   :  { %999 = vmatprep.subr.bf16.mxu1 %v1505_v0 }
  0x9e   :  { %877 = vmatpush2.bf16.msra.mxu0 %v1493_v30 }
  0x9f   :  { %1000 = vmatpush2.bf16.msra.mxu1 %v1494_v31  ;;  %1092 = vmatprep.subr.bf16.mxu0 %v1505_v0 }
  0xa1   :  { %879 = vmatmul.mubr.bf16.vlgmr.msra.gmra.mxu0 %v1621_v24 }
  0xa2   :  { %1093 = vmatpush1.bf16.msra.mxu0 %v1495_v32  ;;  %1002 = vmatmul.mubr.bf16.vlgmr.msra.gmra.mxu1 %v1621_v24 }
  0xa3   :  { %1094 = vmatprep.subr.bf16.mxu0 %v1505_v0  ;;  %1409 = vmatprep.mubr.msk.bf16.mxu0 %vm102_vm0, %v1578_v13  ;;  %v1500_v13 = vld [vmem:[%s1945_s0 + $0x270] sm:$0xff]  }
  0xa6   :  { %1095 = vmatpush1.bf16.msra.mxu0 %v1496_v33  ;;  %v1145_v33 = vpop.permute.xlu0 %1144 }
  0xa7   :  { %1096 = vmatprep.subr.bf16.mxu0 %v1505_v0 }
  0xaa   :  { %1097 = vmatpush1.bf16.msra.mxu0 %v1497_v34 }
  0xab   :  { %1098 = vmatprep.subr.bf16.mxu0 %v1505_v0 }
  0xae   :  { %1099 = vmatpush1.bf16.msra.mxu0 %v1498_v35 }
  0xaf   :  { %1100 = vmatprep.subr.bf16.mxu0 %v1505_v0 }
  0xb2   :  { %1101 = vmatpush1.bf16.msra.mxu0 %v1499_v36 }
  0xb3   :  { %1102 = vmatprep.subr.bf16.mxu0 %v1505_v0 }
  0xb6   :  { %1103 = vmatpush1.bf16.msra.mxu0 %v1500_v13 }
  0xb7   :  { %1104 = vmatprep.subr.bf16.mxu0 %v1505_v0 }
  0xba   :  { %1105 = vmatpush1.bf16.msra.mxu0 %v1501_v37 }
  0xbb   :  { %1106 = vmatprep.subr.bf16.mxu0 %v1505_v0 }
  0xbe   :  { %1107 = vmatpush1.bf16.msra.mxu0 %v1502_v38 }
  0xbf   :  { %1120 = vmatprep.subr.bf16.mxu0 %v1505_v0 }
  0xc2   :  { %1121 = vmatpush2.bf16.msra.mxu0 %v1090_v40 }
  0xc3   :  { %1122 = vmatprep.subr.bf16.mxu0 %v1505_v0 }
  0xc6   :  { %1123 = vmatpush2.bf16.msra.mxu0 %v1504_v41 }
  0xc9   :  { %1125 = vmatmul.mubr.bf16.vlgmr.msra.gmra.mxu0 %v1621_v24 }
  0xe9   :  { %v144_v42 = vpop.f32.mrf.mxu0 }
  0xea   :  { %v265_v43 = vpop.f32.mrf.mxu1 }
  0xeb   :  { %v272_v44 = vmax.f32 %v144_v42, %v265_v43  ;;  %v146_v45 = vpop.f32.mrf.mxu0 }
  0xec   :  { %v267_v46 = vpop.f32.mrf.mxu1 }
  0xed   :  { %v147_v47 = vpop.f32.mrf.mxu0 }
  0xee   :  { %v268_v48 = vpop.f32.mrf.mxu1 }
  0xef   :  { %v273_v49 = vmax.f32 %v147_v47, %v268_v48  ;;  %v149_v50 = vpop.f32.mrf.mxu0 }
  0xf0   :  { %v270_v51 = vpop.f32.mrf.mxu1 }
 0x111   :  { %v388_v52 = vpop.f32.mrf.mxu0 }
 0x112   :  { %v395_v53 = vmax.f32 %v272_v44, %v388_v52  ;;  %v511_v54 = vpop.f32.mrf.mxu1 }
 0x113   :  { %v390_v55 = vpop.f32.mrf.mxu0 }
 0x114   :  { %v518_v56 = vmax.f32 %v395_v53, %v511_v54  ;;  %v513_v57 = vpop.f32.mrf.mxu1 }
 0x115   :  { %v391_v0 = vpop.f32.mrf.mxu0 }
 0x116   :  { %v396_v58 = vmax.f32 %v273_v49, %v391_v0  ;;  %v514_v59 = vpop.f32.mrf.mxu1 }
 0x117   :  { %v393_v24 = vpop.f32.mrf.mxu0 }
 0x118   :  { %v519_v60 = vmax.f32 %v396_v58, %v514_v59  ;;  %v516_v61 = vpop.f32.mrf.mxu1 }
 0x139   :  { %v634_v62 = vpop.f32.mrf.mxu0 }
 0x13a   :  { %v641_v63 = vmax.f32 %v518_v56, %v634_v62  ;;  %v757_v1 = vpop.f32.mrf.mxu1 }
 0x13b   :  { %v636_v2 = vpop.f32.mrf.mxu0 }
 0x13c   :  { %v764_v3 = vmax.f32 %v641_v63, %v757_v1  ;;  %v759_v4 = vpop.f32.mrf.mxu1 }
 0x13d   :  { %v637_v5 = vpop.f32.mrf.mxu0 }
 0x13e   :  { %v642_v6 = vmax.f32 %v519_v60, %v637_v5  ;;  %v760_v7 = vpop.f32.mrf.mxu1 }
 0x13f   :  { %v639_v8 = vpop.f32.mrf.mxu0 }
 0x140   :  { %v765_v9 = vmax.f32 %v642_v6, %v760_v7  ;;  %v762_v10 = vpop.f32.mrf.mxu1 }
 0x161   :  { %v880_v11 = vpop.f32.mrf.mxu0 }
 0x162   :  { %v1003_v12 = vpop.f32.mrf.mxu1  ;;  %v887_v20 = vmax.f32 %v764_v3, %v880_v11 }
 0x163   :  { %v882_v14 = vpop.f32.mrf.mxu0 }
 0x164   :  { %v1005_v15 = vpop.f32.mrf.mxu1  ;;  %v1010_v21 = vmax.f32 %v887_v20, %v1003_v12 }
 0x165   :  { %v883_v16 = vpop.f32.mrf.mxu0 }
 0x166   :  { %v1006_v17 = vpop.f32.mrf.mxu1  ;;  %v888_v22 = vmax.f32 %v765_v9, %v883_v16 }
 0x167   :  { %v885_v18 = vpop.f32.mrf.mxu0 }
 0x168   :  { %v1008_v19 = vpop.f32.mrf.mxu1  ;;  %v1011_v28 = vmax.f32 %v888_v22, %v1006_v17 }
 0x189   :  { %v1126_v25 = vpop.f32.mrf.mxu0 }
 0x18a   :  { %v1133_v26 = vmax.f32 %v1010_v21, %v1126_v25 }
 0x18b   :  { %v1128_v27 = vpop.f32.mrf.mxu0 }
 0x18c   :  { %v1147_v29 = vadd.f32 %v1140_v23, %v1133_v26 }
 0x18d   :  { %v1129_v30 = vpop.f32.mrf.mxu0 }
 0x18e   :  { %v1149_v31 = vmax.f32 %v1147_v29, 0.0  ;;  %v1134_v32 = vmax.f32 %v1011_v28, %v1129_v30 }
 0x18f   :  { %v1131_v34 = vpop.f32.mrf.mxu0 }
 0x190   :  { %1151 = vst [vmem:[%s1948_s3] sm:$0xff] %v1149_v31  ;;  %v1148_v35 = vadd.f32 %v1145_v33, %v1134_v32 }
 0x192   :  { %v1150_v36 = vmax.f32 %v1148_v35, 0.0 }
 0x194   :  { %1152 = vst [vmem:[%s1948_s3 + $0x8] sm:$0xff] %v1150_v36 }

// kernel: cnn_forward.5
= control target key start
LH: loop header
LB: loop body
LE: loop exit
PB: predicated region body
PF: predicated region fallthrough
CT: control target
= control target key end

     0   :  { %v3950_v0 = vmov 0   ;;  %vm253_vm0 = vcmask 130048   ;;  %s4939_s0 = inlined_call_operand.vmem [shape: bf16[9,400,128], index: 0, kind: input, shape index: {}]   ;;  %s4940_s1 = inlined_call_operand.vmem [shape: bf16[24,400], index: 1, kind: input, shape index: {}]   ;;  %s4941_s2 = inlined_call_operand.vmem [shape: f32[24,1], index: 2, kind: input, shape index: {}]   ;;  %s4942_s3 = inlined_call_operand.vmem [shape: f32[24,128], index: 3, kind: output, shape index: {}]  }
   0x1   :  { %308 = vmatprep.subr.bf16.mxu1 %v3950_v0  ;;  %v3711_v1 = vld [vmem:[%s4939_s0 + $0x78] sm:$0xff]   ;;  %3709 = vset.pattern.permute.xlu0 %v3950_v0  ;;  %v3714_v4 = vld [vmem:[%s4939_s0 + $0x70] sm:$0xff]   ;;  %v3717_v7 = vld [vmem:[%s4939_s0 + $0x68] sm:$0xff]  }
   0x2   :  { %v3712_v2 = vld [vmem:[%s4939_s0 + $0xb8] sm:$0xff]   ;;  %3710 = vset.pattern.permute.xlu1 %v3950_v0  ;;  %3438 = vmatprep.subr.bf16.mxu0 %v3711_v1  ;;  %v3715_v5 = vld [vmem:[%s4939_s0 + $0xb0] sm:$0xff]   ;;  %v3718_v8 = vld [vmem:[%s4939_s0 + $0xa8] sm:$0xff]  }
   0x3   :  { %v3713_v3 = vld [vmem:[%s4939_s0 + $0x38] sm:$0xff]   ;;  %309 = vmatpush1.bf16.msra.mxu1 %v3712_v2  ;;  %v3716_v6 = vld [vmem:[%s4939_s0 + $0x30] sm:$0xff]   ;;  %v3719_v9 = vld [vmem:[%s4939_s0 + $0x28] sm:$0xff]  }
   0x4   :  { %3439 = vmatpush3.bf16.msra.mxu0 %v3713_v3  ;;  %310 = vmatprep.subr.bf16.mxu1 %v3950_v0  ;;  %v3720_v10 = vld [vmem:[%s4939_s0 + $0x60] sm:$0xff]   ;;  %v3723_v13 = vld [vmem:[%s4939_s0 + $0x58] sm:$0xff]   ;;  %v3726_v16 = vld [vmem:[%s4939_s0 + $0x50] sm:$0xff]  }
   0x5   :  { %3440 = vmatprep.subr.bf16.mxu0 %v3714_v4  ;;  %v3721_v11 = vld [vmem:[%s4939_s0 + $0xa0] sm:$0xff]   ;;  %v3724_v14 = vld [vmem:[%s4939_s0 + $0x98] sm:$0xff]   ;;  %v3727_v17 = vld [vmem:[%s4939_s0 + $0x90] sm:$0xff]  }
   0x6   :  { %v3722_v12 = vld [vmem:[%s4939_s0 + $0x20] sm:$0xff]   ;;  %v3725_v15 = vld [vmem:[%s4939_s0 + $0x18] sm:$0xff]   ;;  %v3728_v18 = vld [vmem:[%s4939_s0 + $0x10] sm:$0xff]  }
   0x7   :  { %311 = vmatpush1.bf16.msra.mxu1 %v3715_v5  ;;  %v3729_v19 = vld [vmem:[%s4939_s0 + $0x48] sm:$0xff]   ;;  %v4046_v22 = vld [vmem:[%s4940_s1 + $0x4] ss:$16 sps:$4 sm:$0xff]   ;;  %v4070_v28 = vld [vmem:[%s4940_s1] ss:$16 sps:$4 sm:$0xff]  }
   0x8   :  { %3441 = vmatpush3.bf16.msra.mxu0 %v3716_v6  ;;  %312 = vmatprep.subr.bf16.mxu1 %v3950_v0  ;;  %v3730_v20 = vld [vmem:[%s4939_s0 + $0x88] sm:$0xff]   ;;  %v3732_v23 = vld [vmem:[%s4939_s0 + $0x40] sm:$0xff]   ;;  %v3744_v31 = vld [vmem:[%s4939_s0 + $0x138] sm:$0xff]  }
   0x9   :  { %3442 = vmatprep.subr.bf16.mxu0 %v3717_v7  ;;  %v3731_v21 = vld [vmem:[%s4939_s0 + $0x8] sm:$0xff]   ;;  %292 = vmatprep.mubr.bf16.mxu0 %v4046_v22  ;;  %v3733_v24 = vld [vmem:[%s4939_s0 + $0x80] sm:$0xff]   ;;  %v3746_v34 = vld [vmem:[%s4939_s0 + $0xf8] sm:$0xff]  }
   0xa   :  { %v3734_v25 = vld [vmem:[%s4939_s0] sm:$0xff]   ;;  %v4065_v27 = vld [vmem:[%s4940_s1 + $0xc] ss:$16 sps:$4 sm:$0xff]   ;;  %v4087_v32 = vld [vmem:[%s4940_s1 + $0x8] ss:$16 sps:$4 sm:$0xff]  }
   0xb   :  { %313 = vmatpush1.bf16.msra.mxu1 %v3718_v8  ;;  %v3739_v26 = vld [vmem:[%s4939_s0 + $0x140] sm:$0xff]   ;;  %2820 = vmatprep.mubr.msk.bf16.mxu1 %vm253_vm0, %v4065_v27  ;;  %v3747_v35 = vld [vmem:[%s4939_s0 + $0x130] sm:$0xff]   ;;  %v3748_v36 = vld [vmem:[%s4939_s0 + $0x178] sm:$0xff]  }
   0xc   :  { %3443 = vmatpush3.bf16.msra.mxu0 %v3719_v9  ;;  %314 = vmatprep.subr.bf16.mxu1 %v3950_v0  ;;  %v3738_v29 = vld [vmem:[%s4939_s0 + $0xc0] sm:$0xff]   ;;  %v3749_v37 = vld [vmem:[%s4939_s0 + $0xf0] sm:$0xff]   ;;  %v3750_v38 = vld [vmem:[%s4939_s0 + $0x128] sm:$0xff]  }
   0xd   :  { %3444 = vmatprep.subr.bf16.mxu0 %v3720_v10  ;;  %v3740_v30 = vld [vmem:[%s4939_s0 + $0x100] sm:$0xff]   ;;  %v3751_v42 = vld [vmem:[%s4939_s0 + $0x170] sm:$0xff]   ;;  %v3752_v43 = vld [vmem:[%s4939_s0 + $0xe8] sm:$0xff]  }
   0xe   :  { %v3745_v33 = vld [vmem:[%s4939_s0 + $0x180] sm:$0xff]   ;;  %v3754_v45 = vld [vmem:[%s4939_s0 + $0x168] sm:$0xff]   ;;  %v3758_v48 = vld [vmem:[%s4939_s0 + $0x118] sm:$0xff]  }
   0xf   :  { %315 = vmatpush1.bf16.msra.mxu1 %v3721_v11  ;;  %v19_v39 = vld [vmem:[%s4940_s1 + $0x20] sm:$0xff]  ;;  %v20_v47 = vld [vmem:[%s4940_s1 + $0x28] sm:$0xff]  ;;  %v3760_v52 = vld [vmem:[%s4939_s0 + $0xd8] sm:$0xff]  }
  0x10   :  { %3445 = vmatpush3.bf16.msra.mxu0 %v3722_v12  ;;  %316 = vmatprep.subr.bf16.mxu1 %v3950_v0  ;;  %v4114_v40 = vcombine.high %v19_v39, %v19_v39  ;;  %v4116_v41 = vcombine.low %v19_v39, %v19_v39  ;;  %v3753_v44 = vld [vmem:[%s4939_s0 + $0x120] sm:$0xff]   ;;  %v4144_v49 = vcombine.high %v20_v47, %v20_v47  ;;  %v3761_v53 = vld [vmem:[%s4939_s0 + $0x110] sm:$0xff]   ;;  %v3762_v54 = vld [vmem:[%s4939_s0 + $0x158] sm:$0xff]  }
  0x11   :  { %3446 = vmatprep.subr.bf16.mxu0 %v3723_v13  ;;  %v3755_v46 = vld [vmem:[%s4939_s0 + $0xe0] sm:$0xff]   ;;  %v4146_v50 = vcombine.low %v20_v47, %v20_v47  ;;  %v3763_v55 = vld [vmem:[%s4939_s0 + $0xd0] sm:$0xff]   ;;  %v3766_v56 = vld [vmem:[%s4939_s0 + $0x108] sm:$0xff]  }
  0x12   :  { %v3759_v51 = vld [vmem:[%s4939_s0 + $0x160] sm:$0xff]   ;;  %v3767_v57 = vld [vmem:[%s4939_s0 + $0x150] sm:$0xff]   ;;  %v3768_v58 = vld [vmem:[%s4939_s0 + $0xc8] sm:$0xff]  }
  0x13   :  { %317 = vmatpush1.bf16.msra.mxu1 %v3724_v14  ;;  %v3770_v59 = vld [vmem:[%s4939_s0 + $0x208] sm:$0xff]   ;;  %v3773_v62 = vld [vmem:[%s4939_s0 + $0x200] sm:$0xff]   ;;  %v3775_v2 = vld [vmem:[%s4939_s0 + $0x1f8] sm:$0xff]  }
  0x14   :  { %3447 = vmatpush3.bf16.msra.mxu0 %v3725_v15  ;;  %318 = vmatprep.subr.bf16.mxu1 %v3950_v0  ;;  %v3769_v60 = vld [vmem:[%s4939_s0 + $0x148] sm:$0xff]   ;;  %v3774_v1 = vld [vmem:[%s4939_s0 + $0x1c0] sm:$0xff]   ;;  %v3777_v4 = vld [vmem:[%s4939_s0 + $0x1b8] sm:$0xff]  }
  0x15   :  { %3448 = vmatprep.subr.bf16.mxu0 %v3726_v16  ;;  %v3771_v61 = vld [vmem:[%s4939_s0 + $0x1c8] sm:$0xff]   ;;  %v3778_v5 = vld [vmem:[%s4939_s0 + $0x1f0] sm:$0xff]   ;;  %v3779_v6 = vld [vmem:[%s4939_s0 + $0x240] sm:$0xff]  }
  0x16   :  { %v3772_v63 = vld [vmem:[%s4939_s0 + $0x188] sm:$0xff]   ;;  %v3780_v7 = vld [vmem:[%s4939_s0 + $0x1b0] sm:$0xff]   ;;  %v3782_v9 = vld [vmem:[%s4939_s0 + $0x238] sm:$0xff]  }
  0x17   :  { %319 = vmatpush1.bf16.msra.mxu1 %v3727_v17  ;;  %v3776_v3 = vld [vmem:[%s4939_s0 + $0x248] sm:$0xff]   ;;  %v3784_v11 = vld [vmem:[%s4939_s0 + $0x1e0] sm:$0xff]   ;;  %v3785_v12 = vld [vmem:[%s4939_s0 + $0x230] sm:$0xff]  }
  0x18   :  { %3449 = vmatpush3.bf16.msra.mxu0 %v3728_v18  ;;  %320 = vmatprep.subr.bf16.mxu1 %v3950_v0  ;;  %v3781_v8 = vld [vmem:[%s4939_s0 + $0x1e8] sm:$0xff]   ;;  %v3786_v13 = vld [vmem:[%s4939_s0 + $0x1a0] sm:$0xff]   ;;  %v3787_v14 = vld [vmem:[%s4939_s0 + $0x1d8] sm:$0xff]  }
  0x19   :  { %3450 = vmatprep.subr.bf16.mxu0 %v3729_v19  ;;  %v3783_v10 = vld [vmem:[%s4939_s0 + $0x1a8] sm:$0xff]   ;;  %v3789_v16 = vld [vmem:[%s4939_s0 + $0x198] sm:$0xff]   ;;  %v3790_v17 = vld [vmem:[%s4939_s0 + $0x1d0] sm:$0xff]  }
  0x1a   :  { %v3788_v15 = vld [vmem:[%s4939_s0 + $0x228] sm:$0xff]   ;;  %v3791_v18 = vld [vmem:[%s4939_s0 + $0x220] sm:$0xff]   ;;  %v3792_v19 = vld [vmem:[%s4939_s0 + $0x190] sm:$0xff]  }
  0x1b   :  { %321 = vmatpush1.bf16.msra.mxu1 %v3730_v20  ;;  %v3794_v20 = vld [vmem:[%s4939_s0 + $0x2d0] sm:$0xff]   ;;  %v3808_v39 = vld [vmem:[%s4939_s0 + $0x2a8] sm:$0xff]   ;;  %v3814_v47 = vld [vmem:[%s4939_s0 + $0x298] sm:$0xff]  }
  0x1c   :  { %3451 = vmatpush3.bf16.msra.mxu0 %v3731_v21  ;;  %322 = vmatprep.subr.bf16.mxu1 %v3950_v0  ;;  %v3793_v21 = vld [vmem:[%s4939_s0 + $0x218] sm:$0xff]  }
  0x1d   :  { %3452 = vmatprep.subr.bf16.mxu0 %v3732_v23  ;;  %v3795_v23 = vld [vmem:[%s4939_s0 + $0x290] sm:$0xff]  }
  0x1f   :  { %323 = vmatpush1.bf16.msra.mxu1 %v3733_v24  ;;  %v3797_v24 = vld [vmem:[%s4939_s0 + $0x2c8] sm:$0xff]  }
  0x20   :  { %3453 = vmatpush3.bf16.msra.mxu0 %v3734_v25  ;;  %338 = vmatprep.subr.bf16.mxu1 %v3950_v0  ;;  %v3796_v25 = vld [vmem:[%s4939_s0 + $0x210] sm:$0xff]  }
  0x21   :  { %3466 = vmatprep.subr.bf16.mxu0 %v3739_v26  ;;  %v3798_v26 = vld [vmem:[%s4939_s0 + $0x288] sm:$0xff]  }
  0x23   :  { %293 = vmatmul.mubr.bf16.vlgmr.msra.gmra.mxu0 %v4070_v28  ;;  %339 = vmatpush2.bf16.msra.mxu1 %v3738_v29  ;;  %v3800_v29 = vld [vmem:[%s4939_s0 + $0x2c0] sm:$0xff]  }
  0x24   :  { %3467 = vmatpush3.bf16.msra.mxu0 %v3740_v30  ;;  %605 = vmatprep.subr.bf16.mxu1 %v3950_v0  ;;  %v3799_v30 = vld [vmem:[%s4939_s0 + $0x250] sm:$0xff]  }
  0x25   :  { %3468 = vmatprep.subr.bf16.mxu0 %v3744_v31  ;;  %300 = vmatprep.mubr.bf16.mxu0 %v4114_v40  ;;  %v3801_v31 = vld [vmem:[%s4939_s0 + $0x280] sm:$0xff]  }
  0x26   :  { %341 = vmatmul.mubr.bf16.vlgmr.msra.gmra.mxu1 %v4087_v32 }
  0x27   :  { %606 = vmatpush1.bf16.msra.mxu1 %v3745_v33  ;;  %2821 = vmatprep.mubr.msk.bf16.mxu1 %vm253_vm0, %v4144_v49  ;;  %v3802_v33 = vld [vmem:[%s4939_s0 + $0x2b8] sm:$0xff]  }
  0x28   :  { %3469 = vmatpush3.bf16.msra.mxu0 %v3746_v34  ;;  %607 = vmatprep.subr.bf16.mxu1 %v3950_v0  ;;  %v3803_v34 = vld [vmem:[%s4939_s0 + $0x310] sm:$0xff]  }
  0x29   :  { %3470 = vmatprep.subr.bf16.mxu0 %v3747_v35  ;;  %v3804_v35 = vld [vmem:[%s4939_s0 + $0x278] sm:$0xff]  }
  0x2b   :  { %608 = vmatpush1.bf16.msra.mxu1 %v3748_v36  ;;  %301 = vmatmul.mubr.bf16.gmra.mxu0 %v4116_v41  ;;  %v3805_v36 = vld [vmem:[%s4939_s0 + $0x2b0] sm:$0xff]  }
  0x2c   :  { %3471 = vmatpush3.bf16.msra.mxu0 %v3749_v37  ;;  %609 = vmatprep.subr.bf16.mxu1 %v3950_v0  ;;  %v3806_v37 = vld [vmem:[%s4939_s0 + $0x308] sm:$0xff]  }
  0x2d   :  { %3472 = vmatprep.subr.bf16.mxu0 %v3750_v38  ;;  %589 = vmatprep.mubr.bf16.mxu0 %v4046_v22  ;;  %v3807_v38 = vld [vmem:[%s4939_s0 + $0x270] sm:$0xff]  }
  0x2e   :  { %349 = vmatmul.mubr.bf16.gmra.mxu1 %v4146_v50 }
  0x2f   :  { %610 = vmatpush1.bf16.msra.mxu1 %v3751_v42  ;;  %2897 = vmatprep.mubr.msk.bf16.mxu1 %vm253_vm0, %v4065_v27  ;;  %v3809_v42 = vld [vmem:[%s4939_s0 + $0x300] sm:$0xff]  }
  0x30   :  { %3473 = vmatpush3.bf16.msra.mxu0 %v3752_v43  ;;  %611 = vmatprep.subr.bf16.mxu1 %v3950_v0  ;;  %v3810_v43 = vld [vmem:[%s4939_s0 + $0x268] sm:$0xff]  }
  0x31   :  { %3474 = vmatprep.subr.bf16.mxu0 %v3753_v44  ;;  %v3811_v44 = vld [vmem:[%s4939_s0 + $0x2a0] sm:$0xff]  }
  0x33   :  { %612 = vmatpush1.bf16.msra.mxu1 %v3754_v45  ;;  %v3812_v45 = vld [vmem:[%s4939_s0 + $0x2f8] sm:$0xff]  }
  0x34   :  { %3475 = vmatpush3.bf16.msra.mxu0 %v3755_v46  ;;  %613 = vmatprep.subr.bf16.mxu1 %v3950_v0  ;;  %v3813_v46 = vld [vmem:[%s4939_s0 + $0x260] sm:$0xff]  }
  0x35   :  { %3476 = vmatprep.subr.bf16.mxu0 %v3758_v48  ;;  %v3815_v48 = vld [vmem:[%s4939_s0 + $0x2f0] sm:$0xff]  }
  0x37   :  { %614 = vmatpush1.bf16.msra.mxu1 %v3759_v51  ;;  %v3816_v51 = vld [vmem:[%s4939_s0 + $0x258] sm:$0xff]  }
  0x38   :  { %3477 = vmatpush3.bf16.msra.mxu0 %v3760_v52  ;;  %615 = vmatprep.subr.bf16.mxu1 %v3950_v0  ;;  %v3818_v52 = vld [vmem:[%s4939_s0 + $0x398] sm:$0xff]  }
  0x39   :  { %3478 = vmatprep.subr.bf16.mxu0 %v3761_v53  ;;  %v3817_v53 = vld [vmem:[%s4939_s0 + $0x2e8] sm:$0xff]  }
  0x3b   :  { %616 = vmatpush1.bf16.msra.mxu1 %v3762_v54  ;;  %v3819_v54 = vld [vmem:[%s4939_s0 + $0x358] sm:$0xff]  }
  0x3c   :  { %3479 = vmatpush3.bf16.msra.mxu0 %v3763_v55  ;;  %617 = vmatprep.subr.bf16.mxu1 %v3950_v0  ;;  %v3821_v55 = vld [vmem:[%s4939_s0 + $0x390] sm:$0xff]  }
  0x3d   :  { %3480 = vmatprep.subr.bf16.mxu0 %v3766_v56  ;;  %v3820_v56 = vld [vmem:[%s4939_s0 + $0x2e0] sm:$0xff]  }
  0x3f   :  { %618 = vmatpush1.bf16.msra.mxu1 %v3767_v57  ;;  %v3822_v57 = vld [vmem:[%s4939_s0 + $0x350] sm:$0xff]  }
  0x40   :  { %3481 = vmatpush3.bf16.msra.mxu0 %v3768_v58  ;;  %619 = vmatprep.subr.bf16.mxu1 %v3950_v0  ;;  %v3824_v58 = vld [vmem:[%s4939_s0 + $0x388] sm:$0xff]  }
  0x41   :  { %3494 = vmatprep.subr.bf16.mxu0 %v3770_v59  ;;  %v3825_v59 = vld [vmem:[%s4939_s0 + $0x348] sm:$0xff]  }
  0x43   :  { %590 = vmatmul.mubr.bf16.vlgmr.msra.gmra.mxu0 %v4070_v28  ;;  %620 = vmatpush1.bf16.msra.mxu1 %v3769_v60  ;;  %v3827_v60 = vld [vmem:[%s4939_s0 + $0x380] sm:$0xff]  }
  0x44   :  { %3495 = vmatpush3.bf16.msra.mxu0 %v3771_v61  ;;  %635 = vmatprep.subr.bf16.mxu1 %v3950_v0  ;;  %v3826_v61 = vld [vmem:[%s4939_s0 + $0x318] sm:$0xff]  }
  0x45   :  { %3496 = vmatprep.subr.bf16.mxu0 %v3773_v62  ;;  %597 = vmatprep.mubr.bf16.mxu0 %v4114_v40  ;;  %v3828_v62 = vld [vmem:[%s4939_s0 + $0x340] sm:$0xff]  }
  0x47   :  { %636 = vmatpush2.bf16.msra.mxu1 %v3772_v63  ;;  %v3829_v63 = vld [vmem:[%s4939_s0 + $0x378] sm:$0xff]  }
  0x48   :  { %3497 = vmatpush3.bf16.msra.mxu0 %v3774_v1  ;;  %905 = vmatprep.subr.bf16.mxu1 %v3950_v0  ;;  %v3830_v1 = vld [vmem:[%s4939_s0 + $0x3d8] sm:$0xff]  }
  0x49   :  { %3498 = vmatprep.subr.bf16.mxu0 %v3775_v2  ;;  %v3831_v2 = vld [vmem:[%s4939_s0 + $0x338] sm:$0xff]  }
  0x4a   :  { %638 = vmatmul.mubr.bf16.vlgmr.msra.gmra.mxu1 %v4087_v32 }
  0x4b   :  { %906 = vmatpush1.bf16.msra.mxu1 %v3776_v3  ;;  %598 = vmatmul.mubr.bf16.gmra.mxu0 %v4116_v41  ;;  %v3832_v3 = vld [vmem:[%s4939_s0 + $0x370] sm:$0xff]  }
  0x4c   :  { %3499 = vmatpush3.bf16.msra.mxu0 %v3777_v4  ;;  %907 = vmatprep.subr.bf16.mxu1 %v3950_v0  ;;  %v3834_v4 = vld [vmem:[%s4939_s0 + $0x330] sm:$0xff]  }
  0x4d   :  { %3500 = vmatprep.subr.bf16.mxu0 %v3778_v5  ;;  %2898 = vmatprep.mubr.msk.bf16.mxu1 %vm253_vm0, %v4144_v49  ;;  %v3836_v5 = vld [vmem:[%s4939_s0 + $0x3c8] sm:$0xff]  }
  0x4e   :  { %889 = vmatprep.mubr.bf16.mxu0 %v4046_v22 }
  0x4f   :  { %908 = vmatpush1.bf16.msra.mxu1 %v3779_v6  ;;  %v3837_v6 = vld [vmem:[%s4939_s0 + $0x328] sm:$0xff]  }
  0x50   :  { %3501 = vmatpush3.bf16.msra.mxu0 %v3780_v7  ;;  %909 = vmatprep.subr.bf16.mxu1 %v3950_v0  ;;  %v3838_v7 = vld [vmem:[%s4939_s0 + $0x360] sm:$0xff]  }
  0x51   :  { %3502 = vmatprep.subr.bf16.mxu0 %v3781_v8  ;;  %v3839_v8 = vld [vmem:[%s4939_s0 + $0x3c0] sm:$0xff]  }
  0x52   :  { %646 = vmatmul.mubr.bf16.gmra.mxu1 %v4146_v50 }
  0x53   :  { %910 = vmatpush1.bf16.msra.mxu1 %v3782_v9  ;;  %2974 = vmatprep.mubr.msk.bf16.mxu1 %vm253_vm0, %v4065_v27  ;;  %v3840_v9 = vld [vmem:[%s4939_s0 + $0x320] sm:$0xff]  }
  0x54   :  { %3503 = vmatpush3.bf16.msra.mxu0 %v3783_v10  ;;  %911 = vmatprep.subr.bf16.mxu1 %v3950_v0  ;;  %v3842_v10 = vld [vmem:[%s4939_s0 + $0x460] sm:$0xff]  }
  0x55   :  { %3504 = vmatprep.subr.bf16.mxu0 %v3784_v11  ;;  %v3841_v11 = vld [vmem:[%s4939_s0 + $0x3b8] sm:$0xff]  }
  0x57   :  { %912 = vmatpush1.bf16.msra.mxu1 %v3785_v12  ;;  %v3845_v12 = vld [vmem:[%s4939_s0 + $0x458] sm:$0xff]  }
  0x58   :  { %3505 = vmatpush3.bf16.msra.mxu0 %v3786_v13  ;;  %913 = vmatprep.subr.bf16.mxu1 %v3950_v0  ;;  %v4466_v13 = vld [vmem:[%s4940_s1] ss:$16 sps:$4 sm:$0xff]  }
  0x59   :  { %3506 = vmatprep.subr.bf16.mxu0 %v3787_v14  ;;  %v3844_v14 = vld [vmem:[%s4939_s0 + $0x3b0] sm:$0xff]  }
  0x5b   :  { %914 = vmatpush1.bf16.msra.mxu1 %v3788_v15  ;;  %v3846_v15 = vld [vmem:[%s4939_s0 + $0x418] sm:$0xff]  }
  0x5c   :  { %3507 = vmatpush3.bf16.msra.mxu0 %v3789_v16  ;;  %915 = vmatprep.subr.bf16.mxu1 %v3950_v0  ;;  %v3848_v16 = vld [vmem:[%s4939_s0 + $0x450] sm:$0xff]  }
  0x5d   :  { %3508 = vmatprep.subr.bf16.mxu0 %v3790_v17  ;;  %v3847_v17 = vld [vmem:[%s4939_s0 + $0x3a8] sm:$0xff]  }
  0x5f   :  { %916 = vmatpush1.bf16.msra.mxu1 %v3791_v18  ;;  %v3849_v18 = vld [vmem:[%s4939_s0 + $0x410] sm:$0xff]  }
  0x60   :  { %3509 = vmatpush3.bf16.msra.mxu0 %v3792_v19  ;;  %917 = vmatprep.subr.bf16.mxu1 %v3950_v0  ;;  %v3851_v19 = vld [vmem:[%s4939_s0 + $0x448] sm:$0xff]  }
  0x61   :  { %3522 = vmatprep.subr.bf16.mxu0 %v3794_v20  ;;  %v3850_v20 = vld [vmem:[%s4939_s0 + $0x3a0] sm:$0xff]  }
  0x63   :  { %890 = vmatmul.mubr.bf16.vlgmr.msra.gmra.mxu0 %v4070_v28  ;;  %918 = vmatpush1.bf16.msra.mxu1 %v3793_v21  ;;  %v3852_v21 = vld [vmem:[%s4939_s0 + $0x408] sm:$0xff]  }
  0x64   :  { %3523 = vmatpush3.bf16.msra.mxu0 %v3795_v23  ;;  %919 = vmatprep.subr.bf16.mxu1 %v3950_v0  ;;  %v3854_v23 = vld [vmem:[%s4939_s0 + $0x440] sm:$0xff]  }
  0x65   :  { %3524 = vmatprep.subr.bf16.mxu0 %v3797_v24  ;;  %897 = vmatprep.mubr.bf16.mxu0 %v4114_v40  ;;  %v4504_v24 = vld [vmem:[%s4940_s1 + $0x4] ss:$16 sps:$4 sm:$0xff]  }
  0x67   :  { %920 = vmatpush1.bf16.msra.mxu1 %v3796_v25  ;;  %v3853_v25 = vld [vmem:[%s4939_s0 + $0x3e0] sm:$0xff]  }
  0x68   :  { %3525 = vmatpush3.bf16.msra.mxu0 %v3798_v26  ;;  %935 = vmatprep.subr.bf16.mxu1 %v3950_v0  ;;  %v3855_v26 = vld [vmem:[%s4939_s0 + $0x400] sm:$0xff]  }
  0x69   :  { %3526 = vmatprep.subr.bf16.mxu0 %v3800_v29  ;;  %v3856_v29 = vld [vmem:[%s4939_s0 + $0x438] sm:$0xff]  }
  0x6b   :  { %936 = vmatpush2.bf16.msra.mxu1 %v3799_v30  ;;  %898 = vmatmul.mubr.bf16.gmra.mxu0 %v4116_v41  ;;  %v3857_v30 = vld [vmem:[%s4939_s0 + $0x4a0] sm:$0xff]  }
  0x6c   :  { %3527 = vmatpush3.bf16.msra.mxu0 %v3801_v31  ;;  %1205 = vmatprep.subr.bf16.mxu1 %v3950_v0  ;;  %v3858_v31 = vld [vmem:[%s4939_s0 + $0x3f8] sm:$0xff]  }
  0x6d   :  { %3528 = vmatprep.subr.bf16.mxu0 %v3802_v33  ;;  %1189 = vmatprep.mubr.bf16.mxu0 %v4046_v22  ;;  %v3859_v33 = vld [vmem:[%s4939_s0 + $0x430] sm:$0xff]  }
  0x6e   :  { %938 = vmatmul.mubr.bf16.vlgmr.msra.gmra.mxu1 %v4087_v32 }
  0x6f   :  { %1206 = vmatpush1.bf16.msra.mxu1 %v3803_v34  ;;  %2975 = vmatprep.mubr.msk.bf16.mxu1 %vm253_vm0, %v4144_v49  ;;  %v4530_v34 = vld [vmem:[%s4940_s1 + $0x8] ss:$16 sps:$4 sm:$0xff]  }
  0x70   :  { %3529 = vmatpush3.bf16.msra.mxu0 %v3804_v35  ;;  %1207 = vmatprep.subr.bf16.mxu1 %v3950_v0  ;;  %v3860_v35 = vld [vmem:[%s4939_s0 + $0x498] sm:$0xff]  }
  0x71   :  { %3530 = vmatprep.subr.bf16.mxu0 %v3805_v36  ;;  %v3861_v36 = vld [vmem:[%s4939_s0 + $0x3f0] sm:$0xff]  }
  0x73   :  { %1208 = vmatpush1.bf16.msra.mxu1 %v3806_v37  ;;  %v3862_v37 = vld [vmem:[%s4939_s0 + $0x428] sm:$0xff]  }
  0x74   :  { %3531 = vmatpush3.bf16.msra.mxu0 %v3807_v38  ;;  %1209 = vmatprep.subr.bf16.mxu1 %v3950_v0  ;;  %v3863_v38 = vld [vmem:[%s4939_s0 + $0x490] sm:$0xff]  }
  0x75   :  { %3532 = vmatprep.subr.bf16.mxu0 %v3808_v39  ;;  %v3864_v39 = vld [vmem:[%s4939_s0 + $0x3e8] sm:$0xff]  }
  0x76   :  { %946 = vmatmul.mubr.bf16.gmra.mxu1 %v4146_v50 }
  0x77   :  { %1210 = vmatpush1.bf16.msra.mxu1 %v3809_v42  ;;  %3051 = vmatprep.mubr.msk.bf16.mxu1 %vm253_vm0, %v4065_v27  ;;  %v3866_v42 = vld [vmem:[%s4939_s0 + $0x528] sm:$0xff]  }
  0x78   :  { %3533 = vmatpush3.bf16.msra.mxu0 %v3810_v43  ;;  %1211 = vmatprep.subr.bf16.mxu1 %v3950_v0  ;;  %v3865_v43 = vld [vmem:[%s4939_s0 + $0x488] sm:$0xff]  }
  0x79   :  { %3534 = vmatprep.subr.bf16.mxu0 %v3811_v44  ;;  %v4562_v44 = vld [vmem:[%s4940_s1 + $0xc] ss:$16 sps:$4 sm:$0xff]  }
  0x7b   :  { %1212 = vmatpush1.bf16.msra.mxu1 %v3812_v45  ;;  %v3867_v45 = vld [vmem:[%s4939_s0 + $0x4e8] sm:$0xff]  }
  0x7c   :  { %3535 = vmatpush3.bf16.msra.mxu0 %v3813_v46  ;;  %1213 = vmatprep.subr.bf16.mxu1 %v3950_v0  ;;  %v3869_v46 = vld [vmem:[%s4939_s0 + $0x520] sm:$0xff]  }
  0x7d   :  { %3536 = vmatprep.subr.bf16.mxu0 %v3814_v47  ;;  %v3868_v47 = vld [vmem:[%s4939_s0 + $0x480] sm:$0xff]  }
  0x7f   :  { %1214 = vmatpush1.bf16.msra.mxu1 %v3815_v48  ;;  %v3870_v48 = vld [vmem:[%s4939_s0 + $0x4e0] sm:$0xff]  }
  0x80   :  { %3537 = vmatpush3.bf16.msra.mxu0 %v3816_v51  ;;  %1215 = vmatprep.subr.bf16.mxu1 %v3950_v0  ;;  %v3872_v51 = vld [vmem:[%s4939_s0 + $0x518] sm:$0xff]  }
  0x81   :  { %3550 = vmatprep.subr.bf16.mxu0 %v3818_v52  ;;  %v3871_v52 = vld [vmem:[%s4939_s0 + $0x478] sm:$0xff]  }
  0x83   :  { %1190 = vmatmul.mubr.bf16.vlgmr.msra.gmra.mxu0 %v4070_v28  ;;  %1216 = vmatpush1.bf16.msra.mxu1 %v3817_v53  ;;  %v3823_v28 = vld [vmem:[%s4939_s0 + $0x2d8] sm:$0xff]  }
  0x84   :  { %3551 = vmatpush3.bf16.msra.mxu0 %v3819_v54  ;;  %1217 = vmatprep.subr.bf16.mxu1 %v3950_v0  ;;  %v3873_v53 = vld [vmem:[%s4939_s0 + $0x4d8] sm:$0xff]   ;;  %v3875_v54 = vld [vmem:[%s4939_s0 + $0x510] sm:$0xff]  }
  0x85   :  { %3552 = vmatprep.subr.bf16.mxu0 %v3821_v55  ;;  %1197 = vmatprep.mubr.bf16.mxu0 %v4114_v40  ;;  %v3874_v55 = vld [vmem:[%s4939_s0 + $0x470] sm:$0xff]  }
  0x87   :  { %1218 = vmatpush1.bf16.msra.mxu1 %v3820_v56  ;;  %v3876_v56 = vld [vmem:[%s4939_s0 + $0x4d0] sm:$0xff]  }
  0x88   :  { %3553 = vmatpush3.bf16.msra.mxu0 %v3822_v57  ;;  %1219 = vmatprep.subr.bf16.mxu1 %v3950_v0  ;;  %v3878_v57 = vld [vmem:[%s4939_s0 + $0x508] sm:$0xff]  }
  0x89   :  { %3554 = vmatprep.subr.bf16.mxu0 %v3824_v58  ;;  %v3877_v58 = vld [vmem:[%s4939_s0 + $0x468] sm:$0xff]  }
  0x8b   :  { %1220 = vmatpush1.bf16.msra.mxu1 %v3823_v28  ;;  %1198 = vmatmul.mubr.bf16.gmra.mxu0 %v4116_v41  ;;  %v3879_v28 = vld [vmem:[%s4939_s0 + $0x4c8] sm:$0xff]  }
  0x8c   :  { %3555 = vmatpush3.bf16.msra.mxu0 %v3825_v59  ;;  %1235 = vmatprep.subr.bf16.mxu1 %v3950_v0  ;;  %v3881_v59 = vld [vmem:[%s4939_s0 + $0x500] sm:$0xff]  }
  0x8d   :  { %3556 = vmatprep.subr.bf16.mxu0 %v3827_v60  ;;  %1489 = vmatprep.mubr.bf16.mxu0 %v4046_v22  ;;  %v3833_v22 = vld [vmem:[%s4939_s0 + $0x3d0] sm:$0xff]   ;;  %v3880_v60 = vld [vmem:[%s4939_s0 + $0x4a8] sm:$0xff]  }
  0x8f   :  { %1236 = vmatpush2.bf16.msra.mxu1 %v3826_v61  ;;  %v3882_v61 = vld [vmem:[%s4939_s0 + $0x4c0] sm:$0xff]  }
  0x90   :  { %3557 = vmatpush3.bf16.msra.mxu0 %v3828_v62  ;;  %1505 = vmatprep.subr.bf16.mxu1 %v3950_v0  ;;  %v3883_v62 = vld [vmem:[%s4939_s0 + $0x4f8] sm:$0xff]  }
  0x91   :  { %3558 = vmatprep.subr.bf16.mxu0 %v3829_v63  ;;  %v3884_v63 = vld [vmem:[%s4939_s0 + $0x568] sm:$0xff]  }
  0x92   :  { %1238 = vmatmul.mubr.bf16.vlgmr.msra.gmra.mxu1 %v4087_v32  ;;  %v3835_v32 = vld [vmem:[%s4939_s0 + $0x368] sm:$0xff]  }
  0x93   :  { %1506 = vmatpush1.bf16.msra.mxu1 %v3830_v1  ;;  %3052 = vmatprep.mubr.msk.bf16.mxu1 %vm253_vm0, %v4144_v49  ;;  %v3885_v1 = vld [vmem:[%s4939_s0 + $0x4b8] sm:$0xff]  }
  0x94   :  { %3559 = vmatpush3.bf16.msra.mxu0 %v3831_v2  ;;  %1507 = vmatprep.subr.bf16.mxu1 %v3950_v0  ;;  %v3886_v2 = vld [vmem:[%s4939_s0 + $0x4f0] sm:$0xff]  }
  0x95   :  { %3560 = vmatprep.subr.bf16.mxu0 %v3832_v3  ;;  %v3887_v3 = vld [vmem:[%s4939_s0 + $0x560] sm:$0xff]  }
  0x97   :  { %1508 = vmatpush1.bf16.msra.mxu1 %v3833_v22  ;;  %v3888_v22 = vld [vmem:[%s4939_s0 + $0x4b0] sm:$0xff]  }
  0x98   :  { %3561 = vmatpush3.bf16.msra.mxu0 %v3834_v4  ;;  %1509 = vmatprep.subr.bf16.mxu1 %v3950_v0  ;;  %v3890_v4 = vld [vmem:[%s4939_s0 + $0x5f0] sm:$0xff]  }
  0x99   :  { %3562 = vmatprep.subr.bf16.mxu0 %v3835_v32  ;;  %v3889_v32 = vld [vmem:[%s4939_s0 + $0x558] sm:$0xff]  }
  0x9a   :  { %1246 = vmatmul.mubr.bf16.gmra.mxu1 %v4146_v50 }
  0x9b   :  { %1510 = vmatpush1.bf16.msra.mxu1 %v3836_v5  ;;  %3128 = vmatprep.mubr.msk.bf16.mxu1 %vm253_vm0, %v4065_v27  ;;  %v3843_v27 = vld [vmem:[%s4939_s0 + $0x420] sm:$0xff]   ;;  %v3891_v5 = vld [vmem:[%s4939_s0 + $0x5b0] sm:$0xff]  }
  0x9c   :  { %3563 = vmatpush3.bf16.msra.mxu0 %v3837_v6  ;;  %1511 = vmatprep.subr.bf16.mxu1 %v3950_v0  ;;  %v3893_v6 = vld [vmem:[%s4939_s0 + $0x5e8] sm:$0xff]  }
  0x9d   :  { %3564 = vmatprep.subr.bf16.mxu0 %v3838_v7 }
  0x9f   :  { %1512 = vmatpush1.bf16.msra.mxu1 %v3839_v8  ;;  %v3892_v8 = vld [vmem:[%s4939_s0 + $0x550] sm:$0xff]  }
  0xa0   :  { %3565 = vmatpush3.bf16.msra.mxu0 %v3840_v9  ;;  %1513 = vmatprep.subr.bf16.mxu1 %v3950_v0  ;;  %v3894_v9 = vld [vmem:[%s4939_s0 + $0x5a8] sm:$0xff]  }
  0xa1   :  { %3578 = vmatprep.subr.bf16.mxu0 %v3842_v10 }
  0xa3   :  { %1490 = vmatmul.mubr.bf16.vlgmr.msra.gmra.mxu0 %v4466_v13  ;;  %1514 = vmatpush1.bf16.msra.mxu1 %v3841_v11  ;;  %v3896_v11 = vld [vmem:[%s4939_s0 + $0x5e0] sm:$0xff]  }
  0xa4   :  { %3579 = vmatpush3.bf16.msra.mxu0 %v3843_v27  ;;  %1515 = vmatprep.subr.bf16.mxu1 %v3950_v0 }
  0xa5   :  { %3580 = vmatprep.subr.bf16.mxu0 %v3845_v12  ;;  %1497 = vmatprep.mubr.bf16.mxu0 %v4114_v40 }
  0xa7   :  { %1516 = vmatpush1.bf16.msra.mxu1 %v3844_v14 }
  0xa8   :  { %3581 = vmatpush3.bf16.msra.mxu0 %v3846_v15  ;;  %1517 = vmatprep.subr.bf16.mxu1 %v3950_v0  ;;  %v3895_v15 = vld [vmem:[%s4939_s0 + $0x548] sm:$0xff]  }
  0xa9   :  { %3582 = vmatprep.subr.bf16.mxu0 %v3848_v16 }
  0xab   :  { %1518 = vmatpush1.bf16.msra.mxu1 %v3847_v17  ;;  %1498 = vmatmul.mubr.bf16.gmra.mxu0 %v4116_v41 }
  0xac   :  { %3583 = vmatpush3.bf16.msra.mxu0 %v3849_v18  ;;  %1519 = vmatprep.subr.bf16.mxu1 %v3950_v0  ;;  %v3897_v18 = vld [vmem:[%s4939_s0 + $0x5a0] sm:$0xff]  }
  0xad   :  { %3584 = vmatprep.subr.bf16.mxu0 %v3851_v19  ;;  %1789 = vmatprep.mubr.bf16.mxu0 %v4504_v24 }
  0xaf   :  { %1520 = vmatpush1.bf16.msra.mxu1 %v3850_v20  ;;  %v3899_v20 = vld [vmem:[%s4939_s0 + $0x5d8] sm:$0xff]  }
  0xb0   :  { %3585 = vmatpush3.bf16.msra.mxu0 %v3852_v21  ;;  %1535 = vmatprep.subr.bf16.mxu1 %v3950_v0 }
  0xb1   :  { %3586 = vmatprep.subr.bf16.mxu0 %v3854_v23 }
  0xb3   :  { %1536 = vmatpush2.bf16.msra.mxu1 %v3853_v25  ;;  %v3898_v25 = vld [vmem:[%s4939_s0 + $0x540] sm:$0xff]  }
  0xb4   :  { %3587 = vmatpush3.bf16.msra.mxu0 %v3855_v26  ;;  %1805 = vmatprep.subr.bf16.mxu1 %v3950_v0 }
  0xb5   :  { %3588 = vmatprep.subr.bf16.mxu0 %v3856_v29 }
  0xb6   :  { %1538 = vmatmul.mubr.bf16.vlgmr.msra.gmra.mxu1 %v4530_v34 }
  0xb7   :  { %1806 = vmatpush1.bf16.msra.mxu1 %v3857_v30  ;;  %3129 = vmatprep.mubr.msk.bf16.mxu1 %vm253_vm0, %v4144_v49  ;;  %v3900_v30 = vld [vmem:[%s4939_s0 + $0x598] sm:$0xff]  }
  0xb8   :  { %3589 = vmatpush3.bf16.msra.mxu0 %v3858_v31  ;;  %1807 = vmatprep.subr.bf16.mxu1 %v3950_v0  ;;  %v3902_v31 = vld [vmem:[%s4939_s0 + $0x5d0] sm:$0xff]  }
  0xb9   :  { %3590 = vmatprep.subr.bf16.mxu0 %v3859_v33 }
  0xbb   :  { %1808 = vmatpush1.bf16.msra.mxu1 %v3860_v35  ;;  %v3901_v35 = vld [vmem:[%s4939_s0 + $0x538] sm:$0xff]  }
  0xbc   :  { %3591 = vmatpush3.bf16.msra.mxu0 %v3861_v36  ;;  %1809 = vmatprep.subr.bf16.mxu1 %v3950_v0  ;;  %v3903_v36 = vld [vmem:[%s4939_s0 + $0x590] sm:$0xff]  }
  0xbd   :  { %3592 = vmatprep.subr.bf16.mxu0 %v3862_v37 }
  0xbe   :  { %1546 = vmatmul.mubr.bf16.gmra.mxu1 %v4146_v50 }
  0xbf   :  { %1810 = vmatpush1.bf16.msra.mxu1 %v3863_v38  ;;  %3205 = vmatprep.mubr.msk.bf16.mxu1 %vm253_vm0, %v4562_v44  ;;  %v3905_v38 = vld [vmem:[%s4939_s0 + $0x5c8] sm:$0xff]  }
  0xc0   :  { %3593 = vmatpush3.bf16.msra.mxu0 %v3864_v39  ;;  %1811 = vmatprep.subr.bf16.mxu1 %v3950_v0 }
  0xc1   :  { %3606 = vmatprep.subr.bf16.mxu0 %v3866_v42 }
  0xc3   :  { %1790 = vmatmul.mubr.bf16.vlgmr.msra.gmra.mxu0 %v4466_v13  ;;  %1812 = vmatpush1.bf16.msra.mxu1 %v3865_v43  ;;  %v3904_v43 = vld [vmem:[%s4939_s0 + $0x530] sm:$0xff]  }
  0xc4   :  { %3607 = vmatpush3.bf16.msra.mxu0 %v3867_v45  ;;  %1813 = vmatprep.subr.bf16.mxu1 %v3950_v0  ;;  %v3906_v45 = vld [vmem:[%s4939_s0 + $0x588] sm:$0xff]  }
  0xc5   :  { %3608 = vmatprep.subr.bf16.mxu0 %v3869_v46  ;;  %1797 = vmatprep.mubr.bf16.mxu0 %v4114_v40 }
  0xc7   :  { %1814 = vmatpush1.bf16.msra.mxu1 %v3868_v47  ;;  %v3908_v47 = vld [vmem:[%s4939_s0 + $0x5c0] sm:$0xff]  }
  0xc8   :  { %3609 = vmatpush3.bf16.msra.mxu0 %v3870_v48  ;;  %1815 = vmatprep.subr.bf16.mxu1 %v3950_v0 }
  0xc9   :  { %3610 = vmatprep.subr.bf16.mxu0 %v3872_v51 }
  0xcb   :  { %1816 = vmatpush1.bf16.msra.mxu1 %v3871_v52  ;;  %1798 = vmatmul.mubr.bf16.gmra.mxu0 %v4116_v41  ;;  %v3907_v52 = vld [vmem:[%s4939_s0 + $0x570] sm:$0xff]  }
  0xcc   :  { %3611 = vmatpush3.bf16.msra.mxu0 %v3873_v53  ;;  %1817 = vmatprep.subr.bf16.mxu1 %v3950_v0 }
  0xcd   :  { %3612 = vmatprep.subr.bf16.mxu0 %v3875_v54  ;;  %2089 = vmatprep.mubr.bf16.mxu0 %v4504_v24  ;;  %v3909_v54 = vld [vmem:[%s4939_s0 + $0x580] sm:$0xff]  }
  0xcf   :  { %1818 = vmatpush1.bf16.msra.mxu1 %v3874_v55  ;;  %v3910_v55 = vld [vmem:[%s4939_s0 + $0x5b8] sm:$0xff]  }
  0xd0   :  { %3613 = vmatpush3.bf16.msra.mxu0 %v3876_v56  ;;  %1819 = vmatprep.subr.bf16.mxu1 %v3950_v0 }
  0xd1   :  { %3614 = vmatprep.subr.bf16.mxu0 %v3878_v57  ;;  %v3911_v57 = vld [vmem:[%s4939_s0 + $0x630] sm:$0xff]  }
  0xd3   :  { %1820 = vmatpush1.bf16.msra.mxu1 %v3877_v58 }
  0xd4   :  { %3615 = vmatpush3.bf16.msra.mxu0 %v3879_v28  ;;  %1835 = vmatprep.subr.bf16.mxu1 %v3950_v0  ;;  %v3912_v28 = vld [vmem:[%s4939_s0 + $0x578] sm:$0xff]  }
  0xd5   :  { %3616 = vmatprep.subr.bf16.mxu0 %v3881_v59  ;;  %v3914_v59 = vld [vmem:[%s4939_s0 + $0x6b8] sm:$0xff]  }
  0xd7   :  { %1836 = vmatpush2.bf16.msra.mxu1 %v3880_v60  ;;  %v3913_v60 = vld [vmem:[%s4939_s0 + $0x628] sm:$0xff]  }
  0xd8   :  { %3617 = vmatpush3.bf16.msra.mxu0 %v3882_v61  ;;  %2105 = vmatprep.subr.bf16.mxu1 %v3950_v0  ;;  %v3915_v61 = vld [vmem:[%s4939_s0 + $0x678] sm:$0xff]  }
  0xd9   :  { %3618 = vmatprep.subr.bf16.mxu0 %v3883_v62  ;;  %v3917_v62 = vld [vmem:[%s4939_s0 + $0x6b0] sm:$0xff]  }
  0xda   :  { %1838 = vmatmul.mubr.bf16.vlgmr.msra.gmra.mxu1 %v4530_v34 }
  0xdb   :  { %2106 = vmatpush1.bf16.msra.mxu1 %v3884_v63  ;;  %3206 = vmatprep.mubr.msk.bf16.mxu1 %vm253_vm0, %v4144_v49 }
  0xdc   :  { %3619 = vmatpush3.bf16.msra.mxu0 %v3885_v1  ;;  %2107 = vmatprep.subr.bf16.mxu1 %v3950_v0  ;;  %v3916_v1 = vld [vmem:[%s4939_s0 + $0x620] sm:$0xff]  }
  0xdd   :  { %3620 = vmatprep.subr.bf16.mxu0 %v3886_v2  ;;  %v3918_v2 = vld [vmem:[%s4939_s0 + $0x670] sm:$0xff]  }
  0xdf   :  { %2108 = vmatpush1.bf16.msra.mxu1 %v3887_v3 }
  0xe0   :  { %3621 = vmatpush3.bf16.msra.mxu0 %v3888_v22  ;;  %2109 = vmatprep.subr.bf16.mxu1 %v3950_v0  ;;  %v3920_v22 = vld [vmem:[%s4939_s0 + $0x6a8] sm:$0xff]  }
  0xe1   :  { %3634 = vmatprep.subr.bf16.mxu0 %v3890_v4 }
  0xe2   :  { %1846 = vmatmul.mubr.bf16.gmra.mxu1 %v4146_v50 }
  0xe3   :  { %v3454_v7 = vpop.f32.mrf.mxu0  ;;  %2090 = vmatmul.mubr.bf16.vlgmr.msra.gmra.mxu0 %v4466_v13  ;;  %2110 = vmatpush1.bf16.msra.mxu1 %v3889_v32 }
  0xe4   :  { %3635 = vmatpush3.bf16.msra.mxu0 %v3891_v5  ;;  %2111 = vmatprep.subr.bf16.mxu1 %v3950_v0  ;;  %v3919_v5 = vld [vmem:[%s4939_s0 + $0x618] sm:$0xff]  }
  0xe5   :  { %v3455_v10 = vpop.f32.mrf.mxu0  ;;  %3636 = vmatprep.subr.bf16.mxu0 %v3893_v6  ;;  %2097 = vmatprep.mubr.bf16.mxu0 %v4114_v40  ;;  %v3921_v6 = vld [vmem:[%s4939_s0 + $0x668] sm:$0xff]  }
  0xe6   :  { %v3456_v27 = vadd.f32 %v3455_v10, %v3454_v7  ;;  %v342_v12 = vpop.f32.mrf.mxu1  ;;  %3282 = vmatprep.mubr.msk.bf16.mxu1 %vm253_vm0, %v4562_v44 }
  0xe7   :  { %v3457_v14 = vpop.f32.mrf.mxu0  ;;  %2112 = vmatpush1.bf16.msra.mxu1 %v3892_v8  ;;  %v3923_v8 = vld [vmem:[%s4939_s0 + $0x6a0] sm:$0xff]  }
  0xe8   :  { %v4678_v16 = vadd.f32 %v3456_v27, %v342_v12  ;;  %v344_v17 = vpop.f32.mrf.mxu1  ;;  %3637 = vmatpush3.bf16.msra.mxu0 %v3894_v9  ;;  %2113 = vmatprep.subr.bf16.mxu1 %v3950_v0  ;;  %v3922_v12 = vld [vmem:[%s4939_s0 + $0x610] sm:$0xff]  }
  0xe9   :  { %v3458_v19 = vpop.f32.mrf.mxu0  ;;  %3638 = vmatprep.subr.bf16.mxu0 %v3896_v11 }
  0xea   :  { %v3459_v21 = vadd.f32 %v3458_v19, %v3457_v14  ;;  %v345_v23 = vpop.f32.mrf.mxu1  ;;  %v2756_v14 = vld [vmem:[%s4941_s2] sm:$0xff] }
  0xeb   :  { %2114 = vmatpush1.bf16.msra.mxu1 %v3895_v15  ;;  %2098 = vmatmul.mubr.bf16.gmra.mxu0 %v4116_v41  ;;  %v3460_v33 = vpop.f32.mrf.mxu0  ;;  %v2758_v15 = vld [vmem:[%s4941_s2 + $0x10] sm:$0xff] }
  0xec   :  { %v4691_v26 = vadd.f32 %v3459_v21, %v345_v23  ;;  %v347_v29 = vpop.f32.mrf.mxu1  ;;  %3639 = vmatpush3.bf16.msra.mxu0 %v3897_v18  ;;  %2115 = vmatprep.subr.bf16.mxu1 %v3950_v0  ;;  %v3924_v18 = vld [vmem:[%s4939_s0 + $0x660] sm:$0xff]   ;;  %v3926_v21 = vld [vmem:[%s4939_s0 + $0x698] sm:$0xff]  }
  0xed   :  { %3640 = vmatprep.subr.bf16.mxu0 %v3899_v20  ;;  %2389 = vmatprep.mubr.bf16.mxu0 %v4504_v24  ;;  %v3461_v37 = vpop.f32.mrf.mxu0 }
  0xee   :  { %v3462_v39 = vadd.f32 %v3461_v37, %v3460_v33  ;;  %v350_v48 = vpop.f32.mrf.mxu1  ;;  %2761 = vperm.xlu0 %3709, %v2756_v14   ;;  %2771 = vperm.xlu1 %3710, %v2758_v15   ;;  %v2757_v33 = vld [vmem:[%s4941_s2 + $0x8] sm:$0xff]  ;;  %v3929_v37 = vld [vmem:[%s4939_s0 + $0x690] sm:$0xff]  }
  0xef   :  { %2116 = vmatpush1.bf16.msra.mxu1 %v3898_v25  ;;  %v3463_v42 = vpop.f32.mrf.mxu0  ;;  %v3943_v14 = vld [vmem:[%s4939_s0 + $0x6c8] sm:$0xff]  }
  0xf0   :  { %3641 = vmatpush3.bf16.msra.mxu0 %v3900_v30  ;;  %2117 = vmatprep.subr.bf16.mxu1 %v3950_v0  ;;  %v4721_v51 = vadd.f32 %v3462_v39, %v350_v48  ;;  %v352_v53 = vpop.f32.mrf.mxu1  ;;  %v3925_v30 = vld [vmem:[%s4939_s0 + $0x608] sm:$0xff]  }
  0xf1   :  { %3642 = vmatprep.subr.bf16.mxu0 %v3902_v31  ;;  %v3464_v46 = vpop.f32.mrf.mxu0  ;;  %v3932_v48 = vld [vmem:[%s4939_s0 + $0x688] sm:$0xff]   ;;  %v3931_v53 = vld [vmem:[%s4939_s0 + $0x5f8] sm:$0xff]  }
  0xf2   :  { %v353_v56 = vpop.f32.mrf.mxu1  ;;  %2766 = vperm.xlu0 %3709, %v2757_v33  }
  0xf3   :  { %2118 = vmatpush1.bf16.msra.mxu1 %v3901_v35  ;;  %v3935_v56 = vld [vmem:[%s4939_s0 + $0x680] sm:$0xff]  }
  0xf4   :  { %3643 = vmatpush3.bf16.msra.mxu0 %v3903_v36  ;;  %2119 = vmatprep.subr.bf16.mxu1 %v3950_v0  ;;  %v354_v58 = vpop.f32.mrf.mxu1 }
  0xf5   :  { %3644 = vmatprep.subr.bf16.mxu0 %v3905_v38  ;;  %v3936_v58 = vld [vmem:[%s4939_s0 + $0x640] sm:$0xff]  }
  0xf7   :  { %2120 = vmatpush1.bf16.msra.mxu1 %v3904_v43  ;;  %v3928_v43 = vld [vmem:[%s4939_s0 + $0x600] sm:$0xff]  }
  0xf8   :  { %3645 = vmatpush3.bf16.msra.mxu0 %v3906_v45  ;;  %2135 = vmatprep.subr.bf16.mxu1 %v3950_v0  ;;  %v3930_v45 = vld [vmem:[%s4939_s0 + $0x650] sm:$0xff]  }
  0xf9   :  { %3646 = vmatprep.subr.bf16.mxu0 %v3908_v47 }
  0xfb   :  { %2136 = vmatpush2.bf16.msra.mxu1 %v3907_v52 }
  0xfc   :  { %3647 = vmatpush3.bf16.msra.mxu0 %v3909_v54  ;;  %2405 = vmatprep.subr.bf16.mxu1 %v3950_v0  ;;  %v3933_v54 = vld [vmem:[%s4939_s0 + $0x648] sm:$0xff]  }
  0xfd   :  { %3648 = vmatprep.subr.bf16.mxu0 %v3910_v55 }
  0xfe   :  { %2138 = vmatmul.mubr.bf16.vlgmr.msra.gmra.mxu1 %v4530_v34 }
  0xff   :  { %2406 = vmatpush1.bf16.msra.mxu1 %v3911_v57  ;;  %3283 = vmatprep.mubr.msk.bf16.mxu1 %vm253_vm0, %v4144_v49  ;;  %v3934_v57 = vld [vmem:[%s4939_s0 + $0x638] sm:$0xff]  }
 0x100   :  { %3649 = vmatpush3.bf16.msra.mxu0 %v3912_v28  ;;  %2407 = vmatprep.subr.bf16.mxu1 %v3950_v0  ;;  %v3937_v28 = vld [vmem:[%s4939_s0 + $0x6f8] sm:$0xff]  }
 0x101   :  { %3662 = vmatprep.subr.bf16.mxu0 %v3914_v59 }
 0x103   :  { %v3482_v63 = vpop.f32.mrf.mxu0  ;;  %2390 = vmatmul.mubr.bf16.vlgmr.msra.gmra.mxu0 %v4466_v13  ;;  %2408 = vmatpush1.bf16.msra.mxu1 %v3913_v60  ;;  %v3938_v60 = vld [vmem:[%s4939_s0 + $0x6f0] sm:$0xff]  }
 0x104   :  { %3663 = vmatpush3.bf16.msra.mxu0 %v3915_v61  ;;  %2409 = vmatprep.subr.bf16.mxu1 %v3950_v0 }
 0x105   :  { %v3483_v3 = vpop.f32.mrf.mxu0  ;;  %3664 = vmatprep.subr.bf16.mxu0 %v3917_v62  ;;  %2397 = vmatprep.mubr.bf16.mxu0 %v4114_v40 }
 0x106   :  { %v3484_v4 = vadd.f32 %v3483_v3, %v3482_v63  ;;  %2146 = vmatmul.mubr.bf16.gmra.mxu1 %v4146_v50 }
 0x107   :  { %v3485_v32 = vpop.f32.mrf.mxu0  ;;  %2410 = vmatpush1.bf16.msra.mxu1 %v3916_v1  ;;  %3359 = vmatprep.mubr.msk.bf16.mxu1 %vm253_vm0, %v4562_v44 }
 0x108   :  { %3665 = vmatpush3.bf16.msra.mxu0 %v3918_v2  ;;  %2411 = vmatprep.subr.bf16.mxu1 %v3950_v0 }
 0x109   :  { %v3486_v7 = vpop.f32.mrf.mxu0  ;;  %3666 = vmatprep.subr.bf16.mxu0 %v3920_v22 }
 0x10a   :  { %v3487_v9 = vadd.f32 %v3486_v7, %v3485_v32  ;;  %v639_v10 = vpop.f32.mrf.mxu1 }
 0x10b   :  { %v4781_v11 = vadd.f32 %v3484_v4, %v639_v10  ;;  %2412 = vmatpush1.bf16.msra.mxu1 %v3919_v5  ;;  %v3488_v27 = vpop.f32.mrf.mxu0  ;;  %2398 = vmatmul.mubr.bf16.gmra.mxu0 %v4116_v41  ;;  %v3942_v10 = vld [vmem:[%s4939_s0 + $0x6d0] sm:$0xff]  }
 0x10c   :  { %v641_v17 = vpop.f32.mrf.mxu1  ;;  %3667 = vmatpush3.bf16.msra.mxu0 %v3921_v6  ;;  %2413 = vmatprep.subr.bf16.mxu1 %v3950_v0 }
 0x10d   :  { %v653_v19 = vmax.f32 %v4678_v16, %v4781_v11  ;;  %3668 = vmatprep.subr.bf16.mxu0 %v3923_v8  ;;  %v3489_v20 = vpop.f32.mrf.mxu0  ;;  %2689 = vmatprep.mubr.bf16.mxu0 %v4504_v24  ;;  %v3927_v24 = vld [vmem:[%s4939_s0 + $0x658] sm:$0xff]  }
 0x10e   :  { %v642_v23 = vpop.f32.mrf.mxu1  ;;  %v3490_v25 = vadd.f32 %v3489_v20, %v3488_v27 }
 0x10f   :  { %v4803_v29 = vadd.f32 %v3487_v9, %v642_v23  ;;  %2414 = vmatpush1.bf16.msra.mxu1 %v3922_v12  ;;  %v3491_v31 = vpop.f32.mrf.mxu0 }
 0x110   :  { %v644_v35 = vpop.f32.mrf.mxu1  ;;  %3669 = vmatpush3.bf16.msra.mxu0 %v3924_v18  ;;  %2415 = vmatprep.subr.bf16.mxu1 %v3950_v0  ;;  %v3944_v18 = vld [vmem:[%s4939_s0 + $0x6c0] sm:$0xff]  }
 0x111   :  { %v654_v36 = vmax.f32 %v4691_v26, %v4803_v29  ;;  %3670 = vmatprep.subr.bf16.mxu0 %v3926_v21  ;;  %v3492_v38 = vpop.f32.mrf.mxu0 }
 0x112   :  { %v647_v39 = vpop.f32.mrf.mxu1 }
 0x113   :  { %v4820_v42 = vadd.f32 %v3490_v25, %v647_v39  ;;  %2416 = vmatpush1.bf16.msra.mxu1 %v3925_v30 }
 0x114   :  { %3671 = vmatpush3.bf16.msra.mxu0 %v3927_v24  ;;  %2417 = vmatprep.subr.bf16.mxu1 %v3950_v0  ;;  %v649_v46 = vpop.f32.mrf.mxu1 }
 0x115   :  { %v655_v47 = vmax.f32 %v4721_v51, %v4820_v42  ;;  %3672 = vmatprep.subr.bf16.mxu0 %v3929_v37  ;;  %v3945_v51 = vld [vmem:[%s4939_s0 + $0x700] sm:$0xff]  }
 0x116   :  { %v650_v52 = vpop.f32.mrf.mxu1 }
 0x117   :  { %2418 = vmatpush1.bf16.msra.mxu1 %v3928_v43 }
 0x118   :  { %3673 = vmatpush3.bf16.msra.mxu0 %v3930_v45  ;;  %2419 = vmatprep.subr.bf16.mxu1 %v3950_v0  ;;  %v651_v55 = vpop.f32.mrf.mxu1 }
 0x119   :  { %3674 = vmatprep.subr.bf16.mxu0 %v3932_v48 }
 0x11b   :  { %2420 = vmatpush1.bf16.msra.mxu1 %v3931_v53 }
 0x11c   :  { %3675 = vmatpush3.bf16.msra.mxu0 %v3933_v54  ;;  %2435 = vmatprep.subr.bf16.mxu1 %v3950_v0 }
 0x11d   :  { %3676 = vmatprep.subr.bf16.mxu0 %v3935_v56 }
 0x11f   :  { %2436 = vmatpush2.bf16.msra.mxu1 %v3934_v57 }
 0x120   :  { %3677 = vmatpush3.bf16.msra.mxu0 %v3936_v58  ;;  %3690 = vmatprep.subr.bf16.mxu1 %v3950_v0 }
 0x121   :  { %2705 = vmatprep.subr.bf16.mxu0 %v3950_v0 }
 0x122   :  { %2438 = vmatmul.mubr.bf16.vlgmr.msra.gmra.mxu1 %v4530_v34 }
 0x123   :  { %v3510_v59 = vpop.f32.mrf.mxu0  ;;  %2690 = vmatmul.mubr.bf16.vlgmr.msra.gmra.mxu0 %v4466_v13  ;;  %3699 = vmatpush1.bf16.msra.mxu1 %v3937_v28  ;;  %v3939_v13 = vld [vmem:[%s4939_s0 + $0x6e8] sm:$0xff]  }
 0x124   :  { %2706 = vmatpush1.bf16.msra.mxu0 %v3937_v28  ;;  %3691 = vmatprep.subr.bf16.mxu1 %v3950_v0 }
 0x125   :  { %v3511_v61 = vpop.f32.mrf.mxu0  ;;  %2707 = vmatprep.subr.bf16.mxu0 %v3950_v0  ;;  %3360 = vmatprep.mubr.msk.bf16.mxu1 %vm253_vm0, %v4144_v49 }
 0x126   :  { %v3512_v62 = vadd.f32 %v3511_v61, %v3510_v59  ;;  %2697 = vmatprep.mubr.bf16.mxu0 %v4114_v40  ;;  %v3940_v40 = vld [vmem:[%s4939_s0 + $0x6e0] sm:$0xff]  }
 0x127   :  { %v3513_v63 = vpop.f32.mrf.mxu0  ;;  %3700 = vmatpush1.bf16.msra.mxu1 %v3938_v60 }
 0x128   :  { %2708 = vmatpush1.bf16.msra.mxu0 %v3938_v60  ;;  %3692 = vmatprep.subr.bf16.mxu1 %v3950_v0 }
 0x129   :  { %v3514_v1 = vpop.f32.mrf.mxu0  ;;  %2709 = vmatprep.subr.bf16.mxu0 %v3950_v0 }
 0x12a   :  { %v3515_v2 = vadd.f32 %v3514_v1, %v3513_v63  ;;  %2446 = vmatmul.mubr.bf16.gmra.mxu1 %v4146_v50 }
 0x12b   :  { %3701 = vmatpush1.bf16.msra.mxu1 %v3939_v13  ;;  %v3516_v3 = vpop.f32.mrf.mxu0  ;;  %2698 = vmatmul.mubr.bf16.gmra.mxu0 %v4116_v41  ;;  %v3941_v41 = vld [vmem:[%s4939_s0 + $0x6d8] sm:$0xff]  }
 0x12c   :  { %2710 = vmatpush1.bf16.msra.mxu0 %v3939_v13  ;;  %3693 = vmatprep.subr.bf16.mxu1 %v3950_v0 }
 0x12d   :  { %2711 = vmatprep.subr.bf16.mxu0 %v3950_v0  ;;  %v3517_v22 = vpop.f32.mrf.mxu0  ;;  %3437 = vmatprep.mubr.msk.bf16.mxu1 %vm253_vm0, %v4144_v49 }
 0x12e   :  { %v939_v4 = vpop.f32.mrf.mxu1  ;;  %v3518_v32 = vadd.f32 %v3517_v22, %v3516_v3  ;;  %3436 = vmatprep.mubr.msk.bf16.mxu0 %vm253_vm0, %v4562_v44 }
 0x12f   :  { %v940_v5 = vadd.f32 %v3512_v62, %v939_v4  ;;  %3702 = vmatpush1.bf16.msra.mxu1 %v3940_v40  ;;  %v3519_v6 = vpop.f32.mrf.mxu0 }
 0x130   :  { %v941_v7 = vpop.f32.mrf.mxu1  ;;  %2712 = vmatpush1.bf16.msra.mxu0 %v3940_v40  ;;  %3694 = vmatprep.subr.bf16.mxu1 %v3950_v0 }
 0x131   :  { %v4889_v49 = vmax.f32 %v653_v19, %v940_v5  ;;  %2713 = vmatprep.subr.bf16.mxu0 %v3950_v0  ;;  %v3520_v8 = vpop.f32.mrf.mxu0 }
 0x132   :  { %v942_v44 = vpop.f32.mrf.mxu1 }
 0x133   :  { %v943_v9 = vadd.f32 %v3515_v2, %v942_v44  ;;  %3703 = vmatpush1.bf16.msra.mxu1 %v3941_v41 }
 0x134   :  { %v944_v27 = vpop.f32.mrf.mxu1  ;;  %2714 = vmatpush1.bf16.msra.mxu0 %v3941_v41  ;;  %3695 = vmatprep.subr.bf16.mxu1 %v3950_v0 }
 0x135   :  { %v4899_v16 = vmax.f32 %v654_v36, %v943_v9  ;;  %2715 = vmatprep.subr.bf16.mxu0 %v3950_v0 }
 0x136   :  { %v947_v11 = vpop.f32.mrf.mxu1 }
 0x137   :  { %v948_v12 = vadd.f32 %v3518_v32, %v947_v11  ;;  %3704 = vmatpush1.bf16.msra.mxu1 %v3942_v10 }
 0x138   :  { %2716 = vmatpush1.bf16.msra.mxu0 %v3942_v10  ;;  %3696 = vmatprep.subr.bf16.mxu1 %v3950_v0  ;;  %v949_v15 = vpop.f32.mrf.mxu1 }
 0x139   :  { %v4909_v17 = vmax.f32 %v655_v47, %v948_v12  ;;  %2717 = vmatprep.subr.bf16.mxu0 %v3950_v0 }
 0x13a   :  { %v950_v26 = vpop.f32.mrf.mxu1 }
 0x13b   :  { %3705 = vmatpush1.bf16.msra.mxu1 %v3943_v14 }
 0x13c   :  { %2718 = vmatpush1.bf16.msra.mxu0 %v3943_v14  ;;  %3697 = vmatprep.subr.bf16.mxu1 %v3950_v0  ;;  %v951_v19 = vpop.f32.mrf.mxu1 }
 0x13d   :  { %2719 = vmatprep.subr.bf16.mxu0 %v3950_v0 }
 0x13f   :  { %3706 = vmatpush1.bf16.msra.mxu1 %v3944_v18 }
 0x140   :  { %2720 = vmatpush1.bf16.msra.mxu0 %v3944_v18  ;;  %3698 = vmatprep.subr.bf16.mxu1 %v3950_v0 }
 0x141   :  { %2735 = vmatprep.subr.bf16.mxu0 %v3950_v0 }
 0x143   :  { %v3538_v20 = vpop.f32.mrf.mxu0  ;;  %3707 = vmatpush2.bf16.msra.mxu1 %v3945_v51 }
 0x144   :  { %2736 = vmatpush2.bf16.msra.mxu0 %v3945_v51 }
 0x145   :  { %v3539_v21 = vpop.f32.mrf.mxu0 }
 0x146   :  { %v3540_v23 = vadd.f32 %v3539_v21, %v3538_v20  ;;  %2746 = vmatmul.mubr.bf16.vlgmr.msra.gmra.mxu1 %v4146_v50 }
 0x147   :  { %v3541_v25 = vpop.f32.mrf.mxu0  ;;  %2738 = vmatmul.mubr.bf16.vlgmr.msra.gmra.mxu0 %v4530_v34 }
 0x149   :  { %v3542_v29 = vpop.f32.mrf.mxu0 }
 0x14a   :  { %v3543_v30 = vadd.f32 %v3542_v29, %v3541_v25 }
 0x14b   :  { %v3544_v31 = vpop.f32.mrf.mxu0 }
 0x14d   :  { %v3545_v33 = vpop.f32.mrf.mxu0 }
 0x14e   :  { %v3546_v35 = vadd.f32 %v3545_v33, %v3544_v31 }
 0x14f   :  { %v3547_v24 = vpop.f32.mrf.mxu0 }
 0x151   :  { %v3548_v36 = vpop.f32.mrf.mxu0 }
 0x152   :  { %v1239_v37 = vpop.f32.mrf.mxu1 }
 0x153   :  { %v1240_v38 = vadd.f32 %v3540_v23, %v1239_v37 }
 0x154   :  { %v1241_v0 = vpop.f32.mrf.mxu1 }
 0x155   :  { %v1253_v39 = vmax.f32 %v4889_v49, %v1240_v38 }
 0x156   :  { %v1242_v42 = vpop.f32.mrf.mxu1 }
 0x157   :  { %v1243_v43 = vadd.f32 %v3543_v30, %v1242_v42 }
 0x158   :  { %v1244_v45 = vpop.f32.mrf.mxu1 }
 0x159   :  { %v1254_v50 = vmax.f32 %v4899_v16, %v1243_v43 }
 0x15a   :  { %v1247_v46 = vpop.f32.mrf.mxu1 }
 0x15b   :  { %v1248_v47 = vadd.f32 %v3546_v35, %v1247_v46 }
 0x15c   :  { %v1249_v34 = vpop.f32.mrf.mxu1 }
 0x15d   :  { %v1255_v48 = vmax.f32 %v4909_v17, %v1248_v47 }
 0x15e   :  { %v1250_v52 = vpop.f32.mrf.mxu1 }
 0x160   :  { %v1251_v53 = vpop.f32.mrf.mxu1 }
 0x163   :  { %v3566_v54 = vpop.f32.mrf.mxu0 }
 0x165   :  { %v3567_v55 = vpop.f32.mrf.mxu0 }
 0x166   :  { %v3568_v56 = vadd.f32 %v3567_v55, %v3566_v54 }
 0x167   :  { %v3569_v57 = vpop.f32.mrf.mxu0 }
 0x169   :  { %v3570_v58 = vpop.f32.mrf.mxu0 }
 0x16a   :  { %v3571_v28 = vadd.f32 %v3570_v58, %v3569_v57 }
 0x16b   :  { %v3572_v59 = vpop.f32.mrf.mxu0 }
 0x16d   :  { %v3573_v60 = vpop.f32.mrf.mxu0 }
 0x16e   :  { %v3574_v61 = vadd.f32 %v3573_v60, %v3572_v59 }
 0x16f   :  { %v3575_v62 = vpop.f32.mrf.mxu0 }
 0x171   :  { %v3576_v63 = vpop.f32.mrf.mxu0 }
 0x176   :  { %v1539_v13 = vpop.f32.mrf.mxu1 }
 0x177   :  { %v1540_v1 = vadd.f32 %v3568_v56, %v1539_v13 }
 0x178   :  { %v1541_v2 = vpop.f32.mrf.mxu1 }
 0x179   :  { %v1553_v40 = vmax.f32 %v1253_v39, %v1540_v1 }
 0x17a   :  { %v1542_v3 = vpop.f32.mrf.mxu1 }
 0x17b   :  { %v1543_v22 = vadd.f32 %v3571_v28, %v1542_v3 }
 0x17c   :  { %v1544_v4 = vpop.f32.mrf.mxu1 }
 0x17d   :  { %v1554_v32 = vmax.f32 %v1254_v50, %v1543_v22 }
 0x17e   :  { %v1547_v5 = vpop.f32.mrf.mxu1 }
 0x17f   :  { %v1548_v41 = vadd.f32 %v3574_v61, %v1547_v5 }
 0x180   :  { %v1549_v6 = vpop.f32.mrf.mxu1 }
 0x181   :  { %v1555_v7 = vmax.f32 %v1255_v48, %v1548_v41 }
 0x182   :  { %v1550_v49 = vpop.f32.mrf.mxu1 }
 0x183   :  { %v3594_v8 = vpop.f32.mrf.mxu0 }
 0x184   :  { %v1551_v44 = vpop.f32.mrf.mxu1 }
 0x185   :  { %v3595_v9 = vpop.f32.mrf.mxu0 }
 0x186   :  { %v3596_v10 = vadd.f32 %v3595_v9, %v3594_v8 }
 0x187   :  { %v3597_v27 = vpop.f32.mrf.mxu0 }
 0x189   :  { %v3598_v16 = vpop.f32.mrf.mxu0 }
 0x18a   :  { %v3599_v11 = vadd.f32 %v3598_v16, %v3597_v27 }
 0x18b   :  { %v3600_v12 = vpop.f32.mrf.mxu0 }
 0x18d   :  { %v3601_v14 = vpop.f32.mrf.mxu0 }
 0x18e   :  { %v3602_v15 = vadd.f32 %v3601_v14, %v3600_v12 }
 0x18f   :  { %v3603_v17 = vpop.f32.mrf.mxu0 }
 0x191   :  { %v3604_v26 = vpop.f32.mrf.mxu0 }
 0x19a   :  { %v1839_v18 = vpop.f32.mrf.mxu1 }
 0x19b   :  { %v1840_v19 = vadd.f32 %v3596_v10, %v1839_v18 }
 0x19c   :  { %v1841_v51 = vpop.f32.mrf.mxu1 }
 0x19d   :  { %v1853_v20 = vmax.f32 %v1553_v40, %v1840_v19 }
 0x19e   :  { %v1842_v21 = vpop.f32.mrf.mxu1 }
 0x19f   :  { %v1843_v23 = vadd.f32 %v3599_v11, %v1842_v21 }
 0x1a0   :  { %v1844_v25 = vpop.f32.mrf.mxu1 }
 0x1a1   :  { %v1854_v29 = vmax.f32 %v1554_v32, %v1843_v23 }
 0x1a2   :  { %v1847_v30 = vpop.f32.mrf.mxu1 }
 0x1a3   :  { %v1848_v31 = vadd.f32 %v3602_v15, %v1847_v30  ;;  %v3622_v33 = vpop.f32.mrf.mxu0 }
 0x1a4   :  { %v1849_v35 = vpop.f32.mrf.mxu1 }
 0x1a5   :  { %v1855_v24 = vmax.f32 %v1555_v7, %v1848_v31  ;;  %v3623_v36 = vpop.f32.mrf.mxu0 }
 0x1a6   :  { %v3624_v37 = vadd.f32 %v3623_v36, %v3622_v33  ;;  %v1850_v38 = vpop.f32.mrf.mxu1 }
 0x1a7   :  { %v3625_v0 = vpop.f32.mrf.mxu0  ;;  %v2772_v38 = vpop.permute.xlu1 %2771 }
 0x1a8   :  { %v1851_v39 = vpop.f32.mrf.mxu1 }
 0x1a9   :  { %v3626_v42 = vpop.f32.mrf.mxu0 }
 0x1aa   :  { %v3627_v43 = vadd.f32 %v3626_v42, %v3625_v0  ;;  %v2762_v0 = vpop.permute.xlu0 %2761 }
 0x1ab   :  { %v3628_v45 = vpop.f32.mrf.mxu0 }
 0x1ad   :  { %v3629_v50 = vpop.f32.mrf.mxu0 }
 0x1ae   :  { %v3630_v46 = vadd.f32 %v3629_v50, %v3628_v45 }
 0x1af   :  { %v3631_v47 = vpop.f32.mrf.mxu0 }
 0x1b1   :  { %v3632_v34 = vpop.f32.mrf.mxu0 }
 0x1be   :  { %v2139_v48 = vpop.f32.mrf.mxu1 }
 0x1bf   :  { %v2140_v52 = vadd.f32 %v3624_v37, %v2139_v48 }
 0x1c0   :  { %v2141_v53 = vpop.f32.mrf.mxu1 }
 0x1c1   :  { %v2153_v54 = vmax.f32 %v1853_v20, %v2140_v52 }
 0x1c2   :  { %v2142_v55 = vpop.f32.mrf.mxu1 }
 0x1c3   :  { %v2143_v56 = vadd.f32 %v3627_v43, %v2142_v55  ;;  %v3650_v57 = vpop.f32.mrf.mxu0 }
 0x1c4   :  { %v2144_v58 = vpop.f32.mrf.mxu1 }
 0x1c5   :  { %v4927_v28 = vmax.f32 %v1854_v29, %v2143_v56  ;;  %v3651_v59 = vpop.f32.mrf.mxu0 }
 0x1c6   :  { %v2147_v60 = vpop.f32.mrf.mxu1  ;;  %v3652_v5 = vadd.f32 %v3651_v59, %v3650_v57  ;;  %v2767_v57 = vpop.permute.xlu0 %2766 }
 0x1c7   :  { %v2148_v61 = vadd.f32 %v3630_v46, %v2147_v60  ;;  %v3653_v62 = vpop.f32.mrf.mxu0 }
 0x1c8   :  { %v2149_v63 = vpop.f32.mrf.mxu1 }
 0x1c9   :  { %v2155_v13 = vmax.f32 %v1855_v24, %v2148_v61  ;;  %v3654_v1 = vpop.f32.mrf.mxu0 }
 0x1ca   :  { %v2150_v2 = vpop.f32.mrf.mxu1  ;;  %v3655_v8 = vadd.f32 %v3654_v1, %v3653_v62 }
 0x1cb   :  { %v3656_v40 = vpop.f32.mrf.mxu0 }
 0x1cc   :  { %v2151_v3 = vpop.f32.mrf.mxu1 }
 0x1cd   :  { %v3657_v22 = vpop.f32.mrf.mxu0 }
 0x1ce   :  { %v3658_v23 = vadd.f32 %v3657_v22, %v3656_v40 }
 0x1cf   :  { %v3659_v4 = vpop.f32.mrf.mxu0 }
 0x1d1   :  { %v3660_v32 = vpop.f32.mrf.mxu0 }
 0x1e2   :  { %v2439_v41 = vpop.f32.mrf.mxu1 }
 0x1e3   :  { %v2440_v6 = vadd.f32 %v3652_v5, %v2439_v41  ;;  %v3678_v7 = vpop.f32.mrf.mxu0 }
 0x1e4   :  { %v2441_v49 = vpop.f32.mrf.mxu1 }
 0x1e5   :  { %v2453_v44 = vmax.f32 %v2153_v54, %v2440_v6  ;;  %v3679_v9 = vpop.f32.mrf.mxu0 }
 0x1e6   :  { %v2442_v10 = vpop.f32.mrf.mxu1  ;;  %v3680_v30 = vadd.f32 %v3679_v9, %v3678_v7 }
 0x1e7   :  { %v2443_v27 = vadd.f32 %v3655_v8, %v2442_v10  ;;  %v3681_v16 = vpop.f32.mrf.mxu0 }
 0x1e8   :  { %v2444_v11 = vpop.f32.mrf.mxu1 }
 0x1e9   :  { %v2454_v12 = vmax.f32 %v4927_v28, %v2443_v27  ;;  %v3682_v14 = vpop.f32.mrf.mxu0 }
 0x1ea   :  { %v2447_v15 = vpop.f32.mrf.mxu1  ;;  %v3683_v43 = vadd.f32 %v3682_v14, %v3681_v16 }
 0x1eb   :  { %v3684_v17 = vpop.f32.mrf.mxu0  ;;  %v2448_v25 = vadd.f32 %v3658_v23, %v2447_v15 }
 0x1ec   :  { %v2449_v26 = vpop.f32.mrf.mxu1 }
 0x1ed   :  { %v3685_v18 = vpop.f32.mrf.mxu0  ;;  %v2455_v33 = vmax.f32 %v2155_v13, %v2448_v25 }
 0x1ee   :  { %v2450_v19 = vpop.f32.mrf.mxu1  ;;  %v3686_v29 = vadd.f32 %v3685_v18, %v3684_v17 }
 0x1ef   :  { %v3687_v51 = vpop.f32.mrf.mxu0 }
 0x1f0   :  { %v2451_v20 = vpop.f32.mrf.mxu1 }
 0x1f1   :  { %v3688_v21 = vpop.f32.mrf.mxu0 }
 0x206   :  { %v2747_v31 = vpop.f32.mrf.mxu1 }
 0x207   :  { %v2748_v35 = vadd.f32 %v3686_v29, %v2747_v31  ;;  %v2739_v24 = vpop.f32.mrf.mxu0 }
 0x208   :  { %v2740_v36 = vadd.f32 %v3680_v30, %v2739_v24  ;;  %v2749_v37 = vpop.f32.mrf.mxu1 }
 0x209   :  { %v2741_v39 = vpop.f32.mrf.mxu0  ;;  %v2755_v42 = vmax.f32 %v2455_v33, %v2748_v35 }
 0x20a   :  { %v2753_v45 = vmax.f32 %v2453_v44, %v2740_v36  ;;  %v2750_v50 = vpop.f32.mrf.mxu1 }
 0x20b   :  { %v2776_v46 = vadd.f32 %v2772_v38, %v2755_v42  ;;  %v2742_v47 = vpop.f32.mrf.mxu0 }
 0x20c   :  { %v2774_v34 = vadd.f32 %v2762_v0, %v2753_v45  ;;  %v2743_v48 = vadd.f32 %v3683_v43, %v2742_v47  ;;  %v2751_v52 = vpop.f32.mrf.mxu1 }
 0x20d   :  { %v2779_v53 = vmax.f32 %v2776_v46, 0.0  ;;  %v2744_v54 = vpop.f32.mrf.mxu0 }
 0x20e   :  { %v2777_v55 = vmax.f32 %v2774_v34, 0.0  ;;  %v2754_v56 = vmax.f32 %v2454_v12, %v2743_v48 }
 0x20f   :  { %2782 = vst [vmem:[%s4942_s3 + $0x10] sm:$0xff] %v2779_v53 }
 0x210   :  { %2780 = vst [vmem:[%s4942_s3] sm:$0xff] %v2777_v55  ;;  %v2775_v58 = vadd.f32 %v2767_v57, %v2754_v56 }
 0x212   :  { %v2778_v28 = vmax.f32 %v2775_v58, 0.0 }
 0x214   :  { %2781 = vst [vmem:[%s4942_s3 + $0x8] sm:$0xff] %v2778_v28 }

</bundles_post_ra>
